<compile_context>
chip_gen: v7x
topology: tpu7x:2x2x1
jax: 0.10.0
libtpu: 0.0.40
codegen_flags: <defaults>
</compile_context>

<pallas_src>
import functools

import jax
import jax.numpy as jnp
from jax import lax
from jax.experimental import pallas as pl
from jax.experimental.pallas import tpu as pltpu


# ----------------------------------------------------------------------------
# Pallas kernels
# ----------------------------------------------------------------------------
def _recurrence(x_ref, wih_ref, whh_ref, b_ref, xproj_ref, h_ref, c_ref,
                out_ref, *, t_valid, unroll):
    """LSTM recurrence for one (batch block, time chunk). Returns the final hidden state.

    x_ref:    (tT, tB, Dp)   VMEM input chunk (activation dtype)
    wih_ref:  (Dp, 4Hp)      VMEM (matmul dtype, single-buffered)
    whh_ref:  (Hp, 4Hp)      VMEM (matmul dtype, single-buffered)
    b_ref:    (1, 4Hp)       VMEM f32 (b_ih + b_hh)
    xproj_ref:(tT, tB, 4Hp)  VMEM scratch (hoisted x @ W_ih + b)
    h_ref/c_ref: (tB, Hp)    VMEM f32 scratch (recurrent state, persists across chunks)
    out_ref:  (tT, tB, Hp) or None — hidden sequence (intermediate layers only)
    """
    Hp = whh_ref.shape[0]
    tT, tB, Dp = x_ref.shape
    t_chunk = pl.program_id(1)

    @pl.when(t_chunk == 0)
    def _():
        h_ref[...] = jnp.zeros_like(h_ref)
        c_ref[...] = jnp.zeros_like(c_ref)

    # Hoisted input projection for the whole time chunk: one tall MXU matmul, off the
    # serial critical path.  Collapsing (tT, tB) is layout-trivial (tB is 8/16-aligned).
    x_all = x_ref[...].astype(wih_ref.dtype).reshape(tT * tB, Dp)
    proj = jnp.dot(x_all, wih_ref[...], preferred_element_type=jnp.float32)
    xproj_ref[...] = (proj + b_ref[...]).astype(xproj_ref.dtype).reshape(tT, tB, 4 * Hp)

    w_hh = whh_ref[...]                     # hoisted weight load, live across the loop
    guard_tail = (t_valid % tT) != 0        # static: padded timesteps exist?
    t_base = t_chunk * tT

    def step(t, carry):
        h, c = carry                        # vreg-resident recurrent state (f32)
        gates = (xproj_ref[t].astype(jnp.float32)
                 + jnp.dot(h.astype(w_hh.dtype), w_hh,
                           preferred_element_type=jnp.float32))
        # Hp is a multiple of 128, so every gate slice is a full unmasked lane slab.
        # Note: 3 sigmoid + 2 tanh per hidden element all go through the single EUP pipe.
        i_g = jax.nn.sigmoid(gates[:, 0 * Hp:1 * Hp])
        f_g = jax.nn.sigmoid(gates[:, 1 * Hp:2 * Hp])
        g_g = jnp.tanh(gates[:, 2 * Hp:3 * Hp])
        o_g = jax.nn.sigmoid(gates[:, 3 * Hp:4 * Hp])
        c_new = f_g * c + i_g * g_g
        h_new = o_g * jnp.tanh(c_new)
        if guard_tail:
            # Padded timesteps must NOT advance the recurrence (x=0 is not inert).
            valid = (t_base + t) < t_valid
            h_new = jnp.where(valid, h_new, h)
            c_new = jnp.where(valid, c_new, c)
        if out_ref is not None:
            out_ref[t] = h_new.astype(out_ref.dtype)
        return (h_new, c_new)

    h_fin, c_fin = lax.fori_loop(0, tT, step, (h_ref[...], c_ref[...]), unroll=unroll)
    h_ref[...] = h_fin
    c_ref[...] = c_fin
    return h_fin


def lstm_layer_kernel(x_ref, wih_ref, whh_ref, b_ref, out_ref,
                      xproj_ref, h_ref, c_ref, *, t_valid, unroll):
    """Intermediate LSTM layer: emits the hidden sequence for this chunk."""
    _recurrence(x_ref, wih_ref, whh_ref, b_ref, xproj_ref, h_ref, c_ref,
                out_ref, t_valid=t_valid, unroll=unroll)


def lstm_last_layer_fc_kernel(x_ref, wih_ref, whh_ref, b_ref, wfc_ref, bfc_ref,
                              y_ref, xproj_ref, h_ref, c_ref, *, t_valid, unroll):
    """Last LSTM layer fused with the Linear(H, 1) head (no (T,B,H) sequence output)."""
    h_fin = _recurrence(x_ref, wih_ref, whh_ref, b_ref, xproj_ref, h_ref, c_ref,
                        None, t_valid=t_valid, unroll=unroll)

    @pl.when(pl.program_id(1) == pl.num_programs(1) - 1)
    def _():
        # Linear(H, 1): VPU multiply + lane reduction (cheaper than a 1-column MXU matmul
        # or a second pallas_call for the head).
        y = jnp.sum(h_fin * wfc_ref[...], axis=-1, keepdims=True) + bfc_ref[...]
        y_ref[...] = y.astype(y_ref.dtype)


# ----------------------------------------------------------------------------
# Sizing helpers (generation-aware VMEM budgeting, aligned tiles)
# ----------------------------------------------------------------------------
def _ceil_to(x, m):
    return ((x + m - 1) // m) * m


def _vmem_capacity_bytes():
    """Per-core VMEM capacity; conservative fallback (v7x: 64 MiB / TensorCore)."""
    try:
        return int(pltpu.get_tpu_info().vmem_capacity_bytes)
    except Exception:
        return 64 << 20


def _const_spec(shape):
    """BlockSpec for a grid-invariant operand: single-buffered (Buffered(1))."""
    idx_map = lambda b, t: (0,) * len(shape)
    try:
        return pl.BlockSpec(shape, idx_map, pipeline_mode=pl.Buffered(1))
    except TypeError:  # older jax without pipeline_mode kwarg
        return pl.BlockSpec(shape, idx_map)


def _choose_batch_tile(Bp, Hp, align):
    """Largest aligned divisor of Bp under a vreg-pressure cap; keep >=2 blocks if cheap."""
    # (h, c) carry costs 2 * tB*Hp/512 vregs; keep it <= ~32 vregs -> tB*Hp <= 16384.
    vreg_cap = max(align, (16384 // max(Hp, 128)) // align * align)
    cap = min(256, vreg_cap)
    tB = align
    for cand in range(align, min(Bp, cap) + 1, align):
        if Bp % cand == 0:
            tB = cand
    # Prefer >= 2 batch blocks (when tB stays >= 64) so the "parallel" batch axis can be
    # sharded across both v7x TensorCores instead of leaving one idle.
    if Bp // tB < 2:
        halves = [cand for cand in range(align, Bp // 2 + 1, align)
                  if Bp % cand == 0 and cand >= 64]
        if halves:
            tB = max(halves)
    return tB


def _choose_time_chunk(T, per_step_bytes, chunk_budget_bytes):
    tT = max(1, min(T, chunk_budget_bytes // max(per_step_bytes, 1)))
    return int(min(tT, 2048))


def _compiler_params(need_bytes, capacity):
    limit = max(32 << 20, int(need_bytes) + (16 << 20))
    limit = min(limit, int(capacity * 0.78))
    return pltpu.CompilerParams(
        dimension_semantics=("parallel", "arbitrary"),
        vmem_limit_bytes=int(limit))


def _pad_gate_cols(w, H, Hp):
    """(rows, 4H) -> (rows, 4Hp): zero-pad each of the 4 PyTorch-ordered gate blocks."""
    if Hp == H:
        return w
    parts = [jnp.pad(w[:, g * H:(g + 1) * H], ((0, 0), (0, Hp - H))) for g in range(4)]
    return jnp.concatenate(parts, axis=1)


def _pad_layer_params(layer, d_in, d_in_p, H, Hp, matmul_dtype):
    """Pad weights to lane/sublane-aligned shapes (zero padding is inert for the LSTM)."""
    w_ih = _pad_gate_cols(layer["w_ih"], H, Hp)
    w_ih = jnp.pad(w_ih, ((0, d_in_p - d_in), (0, 0)))             # (d_in_p, 4Hp)
    w_hh = _pad_gate_cols(layer["w_hh"], H, Hp)
    w_hh = jnp.pad(w_hh, ((0, Hp - H), (0, 0)))                     # (Hp, 4Hp)
    bias = _pad_gate_cols(layer["bias"].reshape(1, 4 * H), H, Hp)   # (1, 4Hp)
    return (w_ih.astype(matmul_dtype), w_hh.astype(matmul_dtype),
            bias.astype(jnp.float32))


# ----------------------------------------------------------------------------
# pallas_call wrappers
# ----------------------------------------------------------------------------
def lstm_layer(x_tbd, w_ih, w_hh, bias, *, tB, tT, t_valid, out_dtype,
               xproj_dtype, compiler_params):
    """Intermediate layer. x_tbd: (Tp, Bp, Dp) -> (Tp, Bp, Hp) hidden sequence."""
    Tp, Bp, Dp = x_tbd.shape
    Hp = w_hh.shape[0]
    grid = (Bp // tB, Tp // tT)
    unroll = tT if tT <= 8 else 4
    kernel = functools.partial(lstm_layer_kernel, t_valid=t_valid, unroll=unroll)

    return pl.pallas_call(
        kernel,
        out_shape=jax.ShapeDtypeStruct((Tp, Bp, Hp), out_dtype),
        grid_spec=pltpu.PrefetchScalarGridSpec(
            num_scalar_prefetch=0,
            grid=grid,
            in_specs=[
                pl.BlockSpec((tT, tB, Dp), lambda b, t: (t, b, 0)),
                _const_spec((Dp, 4 * Hp)),
                _const_spec((Hp, 4 * Hp)),
                _const_spec((1, 4 * Hp)),
            ],
            out_specs=pl.BlockSpec((tT, tB, Hp), lambda b, t: (t, b, 0)),
            scratch_shapes=[
                pltpu.VMEM((tT, tB, 4 * Hp), xproj_dtype),  # hoisted x-projection
                pltpu.VMEM((tB, Hp), jnp.float32),          # h (persists across chunks)
                pltpu.VMEM((tB, Hp), jnp.float32),          # c
            ]),
        compiler_params=compiler_params,
    )(x_tbd, w_ih, w_hh, bias)


def lstm_last_layer_fc(x_tbd, w_ih, w_hh, bias, w_fc_row, b_fc, *, tB, tT, t_valid,
                       xproj_dtype, compiler_params):
    """Last layer + fused FC head. Returns (Bp, 1) f32."""
    Tp, Bp, Dp = x_tbd.shape
    Hp = w_hh.shape[0]
    grid = (Bp // tB, Tp // tT)
    unroll = tT if tT <= 8 else 4
    kernel = functools.partial(lstm_last_layer_fc_kernel, t_valid=t_valid, unroll=unroll)

    return pl.pallas_call(
        kernel,
        out_shape=jax.ShapeDtypeStruct((Bp, 1), jnp.float32),
        grid_spec=pltpu.PrefetchScalarGridSpec(
            num_scalar_prefetch=0,
            grid=grid,
            in_specs=[
                pl.BlockSpec((tT, tB, Dp), lambda b, t: (t, b, 0)),
                _const_spec((Dp, 4 * Hp)),
                _const_spec((Hp, 4 * Hp)),
                _const_spec((1, 4 * Hp)),
                _const_spec((1, Hp)),
                _const_spec((1, 1)),
            ],
            out_specs=pl.BlockSpec((tB, 1), lambda b, t: (b, 0)),
            scratch_shapes=[
                pltpu.VMEM((tT, tB, 4 * Hp), xproj_dtype),
                pltpu.VMEM((tB, Hp), jnp.float32),
                pltpu.VMEM((tB, Hp), jnp.float32),
            ]),
        compiler_params=compiler_params,
    )(x_tbd, w_ih, w_hh, bias, w_fc_row, b_fc)


@functools.partial(jax.jit, static_argnames=("matmul_dtype",))
def lstm_regressor_forward(x_btd, params, matmul_dtype=jnp.float32):
    """Full forward pass matching LSTMRegressor.forward.

    x_btd: (B, T, input_dim)  (batch_first, like PyTorch)
    matmul_dtype: dtype of the MXU matmul inputs / inter-layer activations; accumulation,
                  gates and the c/h recurrence always stay in f32.  bf16 is the right
                  choice for throughput on v5e/v6e/v7x (MXUs are bf16-native); the default
                  stays f32 for bit-accurate parity with the PyTorch/NumPy reference.
    returns: (B,)
    """
    B, T, D = x_btd.shape
    H = params["fc_w"].shape[0]
    use_bf16 = jnp.dtype(matmul_dtype) == jnp.dtype(jnp.bfloat16)
    act_dtype = jnp.bfloat16 if use_bf16 else jnp.float32      # inter-layer activations
    xproj_dtype = act_dtype                                     # hoisted-projection scratch
    align = 16 if use_bf16 else 8                               # sublane packing
    act_bytes = jnp.dtype(act_dtype).itemsize
    mm_bytes = jnp.dtype(matmul_dtype).itemsize

    Bp = _ceil_to(B, align)      # sublanes
    Hp = _ceil_to(H, 128)        # lanes
    Dp = _ceil_to(D, 128)

    capacity = _vmem_capacity_bytes()
    tB = _choose_batch_tile(Bp, Hp, align)
    num_layers = len(params["lstm"])

    # Single-buffered weight footprint (worst layer) + persistent recurrent state.
    weight_bytes = (max(Dp, Hp) + Hp) * 4 * Hp * mm_bytes + 4 * Hp * 4
    state_bytes = 2 * tB * Hp * 4
    # Per-timestep VMEM per chunk (worst layer): double-buffered x tile, double-buffered
    # hidden-sequence output tile (intermediate layers only), plus the xproj scratch.
    per_step = tB * (2 * max(Dp, Hp) * act_bytes
                     + (2 * Hp * act_bytes if num_layers > 1 else 0)
                     + 4 * Hp * jnp.dtype(xproj_dtype).itemsize)
    # Generation-aware chunk budget: ~30% of VMEM capacity (=> ~38 MiB v5e/v6e, ~19 MiB v7x).
    chunk_budget = max(4 << 20,
                       min(int(capacity * 0.30),
                           int(capacity * 0.60) - weight_bytes - state_bytes))
    tT = _choose_time_chunk(T, per_step, chunk_budget)
    Tp = _ceil_to(T, tT)
    # vmem_limit: assume worst case (weights still double-buffered) + headroom.
    cparams = _compiler_params(2 * weight_bytes + state_bytes + tT * per_step, capacity)

    # time-major; pad batch (sublanes), features (lanes) and time (to a tT multiple).
    # Batch/feature zero padding is inert; padded TIMESTEPS are guarded inside the kernel.
    seq = jnp.transpose(x_btd, (1, 0, 2))                               # (T, B, D)
    seq = jnp.pad(seq, ((0, Tp - T), (0, Bp - B), (0, Dp - D))).astype(act_dtype)

    d_in, d_in_p = D, Dp
    y = None
    for li, layer in enumerate(params["lstm"]):
        w_ih, w_hh, bias = _pad_layer_params(layer, d_in, d_in_p, H, Hp, matmul_dtype)
        if li < num_layers - 1:
            seq = lstm_layer(seq, w_ih, w_hh, bias, tB=tB, tT=tT, t_valid=T,
                             out_dtype=act_dtype, xproj_dtype=xproj_dtype,
                             compiler_params=cparams)                   # (Tp, Bp, Hp)
        else:
            w_fc_row = jnp.pad(params["fc_w"][:, 0], (0, Hp - H)).reshape(1, Hp)
            b_fc = params["fc_b"].reshape(1, 1).astype(jnp.float32)
            y = lstm_last_layer_fc(seq, w_ih, w_hh, bias,
                                   w_fc_row.astype(jnp.float32), b_fc,
                                   tB=tB, tT=tT, t_valid=T,
                                   xproj_dtype=xproj_dtype,
                                   compiler_params=cparams)             # (Bp, 1)
        d_in, d_in_p = H, Hp
    return y[:B, 0]                                                     # .squeeze(1)


# ----------------------------------------------------------------------------
# Deterministic parameter init (matches PyTorch shapes; synthetic values)
# ----------------------------------------------------------------------------
def init_params(key, input_dim, hidden_dim, num_layers):
    H = hidden_dim
    bound = 1.0 / jnp.sqrt(H)
    layers = []
    for l in range(num_layers):
        d_in = input_dim if l == 0 else H
        key, k1, k2, k3, k4 = jax.random.split(key, 5)
        # PyTorch stores weight_ih_l{l}: (4H, d_in); we keep the transposed (d_in, 4H).
        w_ih = jax.random.uniform(k1, (d_in, 4 * H), jnp.float32, -bound, bound)
        w_hh = jax.random.uniform(k2, (H, 4 * H), jnp.float32, -bound, bound)
        b_ih = jax.random.uniform(k3, (4 * H,), jnp.float32, -bound, bound)
        b_hh = jax.random.uniform(k4, (4 * H,), jnp.float32, -bound, bound)
        layers.append({"w_ih": w_ih, "w_hh": w_hh, "bias": b_ih + b_hh})
    key, k5, k6 = jax.random.split(key, 3)
    fc_w = jax.random.uniform(k5, (H, 1), jnp.float32, -bound, bound)
    fc_b = jax.random.uniform(k6, (1,), jnp.float32, -bound, bound)
    return {"lstm": layers, "fc_w": fc_w, "fc_b": fc_b}


# ----------------------------------------------------------------------------
# Pure-JAX reference (for correctness check)
# ----------------------------------------------------------------------------
def reference_forward(x_btd, params):
    H = params["fc_w"].shape[0]
    seq = x_btd  # (B, T, D)
    for layer in params["lstm"]:
        B, T, _ = seq.shape
        h = jnp.zeros((B, H), jnp.float32)
        c = jnp.zeros((B, H), jnp.float32)
        outs = []
        for t in range(T):
            gates = seq[:, t, :] @ layer["w_ih"] + h @ layer["w_hh"] + layer["bias"]
            i_g = jax.nn.sigmoid(gates[:, 0 * H:1 * H])
            f_g = jax.nn.sigmoid(gates[:, 1 * H:2 * H])
            g_g = jnp.tanh(gates[:, 2 * H:3 * H])
            o_g = jax.nn.sigmoid(gates[:, 3 * H:4 * H])
            c = f_g * c + i_g * g_g
            h = o_g * jnp.tanh(c)
            outs.append(h)
        seq = jnp.stack(outs, axis=1)  # (B, T, H)
    last = seq[:, -1, :]
    return (last @ params["fc_w"] + params["fc_b"])[:, 0]


# ----------------------------------------------------------------------------
# Main
# ----------------------------------------------------------------------------
if __name__ == "__main__":
    B, T = 2, 8
    input_dim, hidden_dim, num_layers = 16, 32, 2

    key = jax.random.PRNGKey(0)
    key, kx = jax.random.split(key)
    x = jax.random.normal(kx, (B, T, input_dim), jnp.float32)
    params = init_params(key, input_dim, hidden_dim, num_layers)

    y_ref = reference_forward(x, params)

    # f32-matmul path: tight check against the pure-JAX reference.
    y32 = jax.block_until_ready(lstm_regressor_forward(x, params,
                                                       matmul_dtype=jnp.float32))
    assert y32.shape == (B,), f"unexpected output shape {y32.shape}"
    assert jnp.allclose(y32, y_ref, atol=1e-4, rtol=1e-4), (y32, y_ref)

    # bf16 path (MXU peak on v5e/v6e/v7x): bf16 matmul inputs, bf16 inter-layer
    # activations and bf16 xproj scratch; gates / c / h recurrence stay f32.
    y16 = jax.block_until_ready(lstm_regressor_forward(x, params,
                                                       matmul_dtype=jnp.bfloat16))
    assert y16.shape == (B,), f"unexpected output shape {y16.shape}"
    assert jnp.allclose(y16, y_ref, atol=5e-2, rtol=5e-2), (y16, y_ref)

    print("KERNEL_OK")
</pallas_src>

<mosaic_0001>
module attributes {stable_mosaic.version = 11 : i64} {
  func.func @lstm_layer_kernel(%arg0: i32, %arg1: i32, %arg2: memref<8x8x128xf32, #tpu.memory_space<vmem>>, %arg3: memref<128x512xf32, #tpu.memory_space<vmem>>, %arg4: memref<128x512xf32, #tpu.memory_space<vmem>>, %arg5: memref<1x512xf32, #tpu.memory_space<vmem>>, %arg6: memref<8x8x128xf32, #tpu.memory_space<vmem>>, %arg7: memref<8x8x512xf32, #tpu.memory_space<vmem>>, %arg8: memref<8x128xf32, #tpu.memory_space<vmem>>, %arg9: memref<8x128xf32, #tpu.memory_space<vmem>>) attributes {dimension_semantics = [#tpu.dimension_semantics<parallel>, #tpu.dimension_semantics<arbitrary>], iteration_bounds = array<i64: 1, 1>, scalar_prefetch = 0 : i64, scratch_operands = 3 : i64, tpu.core_type = #tpu.core_type<tc>, window_params = [{transform_indices = @transform_0, window_bounds = array<i64: 8, 8, 128>}, {pipeline_mode = #tpu.pipeline_mode<synchronous>, transform_indices = @transform_1, window_bounds = array<i64: 128, 512>}, {pipeline_mode = #tpu.pipeline_mode<synchronous>, transform_indices = @transform_2, window_bounds = array<i64: 128, 512>}, {pipeline_mode = #tpu.pipeline_mode<synchronous>, transform_indices = @transform_3, window_bounds = array<i64: 1, 512>}, {transform_indices = @transform_4, window_bounds = array<i64: 8, 8, 128>}]} {
    %c0_i32 = arith.constant 0 : i32
    %0 = arith.cmpi eq, %arg1, %c0_i32 : i32
    %1 = arith.extui %0 : i1 to i32
    %c0_i32_0 = arith.constant 0 : i32
    %2 = arith.cmpi ne, %1, %c0_i32_0 : i32
    scf.if %2 {
      %cst_85 = arith.constant 0.000000e+00 : f32
      %289 = vector.broadcast %cst_85 : f32 to vector<8x128xf32>
      %c0_86 = arith.constant 0 : index
      %c0_87 = arith.constant 0 : index
      %290 = vector.load %arg8[%c0_86, %c0_87] : memref<8x128xf32, #tpu.memory_space<vmem>>, vector<8x128xf32>
      tpu.vector_store %arg8[%c0_86, %c0_87], %289 {strides = array<i32>} : memref<8x128xf32, #tpu.memory_space<vmem>>, vector<8x128xf32>,
      %cst_88 = arith.constant 0.000000e+00 : f32
      %291 = vector.broadcast %cst_88 : f32 to vector<8x128xf32>
      %c0_89 = arith.constant 0 : index
      %c0_90 = arith.constant 0 : index
      %292 = vector.load %arg9[%c0_89, %c0_90] : memref<8x128xf32, #tpu.memory_space<vmem>>, vector<8x128xf32>
      tpu.vector_store %arg9[%c0_89, %c0_90], %291 {strides = array<i32>} : memref<8x128xf32, #tpu.memory_space<vmem>>, vector<8x128xf32>,
    } else {
    }
    %c0 = arith.constant 0 : index
    %c0_1 = arith.constant 0 : index
    %c0_2 = arith.constant 0 : index
    %3 = vector.load %arg2[%c0, %c0_1, %c0_2] : memref<8x8x128xf32, #tpu.memory_space<vmem>>, vector<8x8x128xf32>
    %4 = vector.shape_cast %3 : vector<8x8x128xf32> to vector<64x128xf32>
    %c0_3 = arith.constant 0 : index
    %c0_4 = arith.constant 0 : index
    %5 = vector.load %arg3[%c0_3, %c0_4] : memref<128x512xf32, #tpu.memory_space<vmem>>, vector<128x512xf32>
    %cst = arith.constant dense<0.000000e+00> : vector<64x512xf32>
    %6 = tpu.matmul %4, %5, %cst {dimension_numbers = #tpu.dot_dimension_numbers<[1], [0], [0], [1], [0, 0, 1, 1], [], []>} : vector<64x128xf32>, vector<128x512xf32>, vector<64x512xf32> -> vector<64x512xf32>
    %c0_5 = arith.constant 0 : index
    %c0_6 = arith.constant 0 : index
    %7 = vector.load %arg5[%c0_5, %c0_6] : memref<1x512xf32, #tpu.memory_space<vmem>>, vector<1x512xf32>
    %8 = vector.broadcast %7 : vector<1x512xf32> to vector<64x512xf32>
    %9 = arith.addf %6, %8 : vector<64x512xf32>
    %10 = vector.shape_cast %9 : vector<64x512xf32> to vector<8x8x512xf32>
    %c0_7 = arith.constant 0 : index
    %c0_8 = arith.constant 0 : index
    %c0_9 = arith.constant 0 : index
    %11 = vector.load %arg7[%c0_7, %c0_8, %c0_9] : memref<8x8x512xf32, #tpu.memory_space<vmem>>, vector<8x8x512xf32>
    tpu.vector_store %arg7[%c0_7, %c0_8, %c0_9], %10 {strides = array<i32>} : memref<8x8x512xf32, #tpu.memory_space<vmem>>, vector<8x8x512xf32>,
    %c0_10 = arith.constant 0 : index
    %c0_11 = arith.constant 0 : index
    %12 = vector.load %arg4[%c0_10, %c0_11] : memref<128x512xf32, #tpu.memory_space<vmem>>, vector<128x512xf32>
    %c0_12 = arith.constant 0 : index
    %c0_13 = arith.constant 0 : index
    %13 = vector.load %arg8[%c0_12, %c0_13] : memref<8x128xf32, #tpu.memory_space<vmem>>, vector<8x128xf32>
    %c0_14 = arith.constant 0 : index
    %c0_15 = arith.constant 0 : index
    %14 = vector.load %arg9[%c0_14, %c0_15] : memref<8x128xf32, #tpu.memory_space<vmem>>, vector<8x128xf32>
    %c0_i32_16 = arith.constant 0 : i32
    %15 = arith.index_cast %c0_i32_16 : i32 to index
    %c0_17 = arith.constant 0 : index
    %c0_18 = arith.constant 0 : index
    %16 = vector.load %arg7[%15, %c0_17, %c0_18] : memref<8x8x512xf32, #tpu.memory_space<vmem>>, vector<1x8x512xf32>
    %17 = vector.shape_cast %16 : vector<1x8x512xf32> to vector<8x512xf32>
    %cst_19 = arith.constant dense<0.000000e+00> : vector<8x512xf32>
    %18 = tpu.matmul %13, %12, %cst_19 {dimension_numbers = #tpu.dot_dimension_numbers<[1], [0], [0], [1], [0, 0, 1, 1], [], []>} : vector<8x128xf32>, vector<128x512xf32>, vector<8x512xf32> -> vector<8x512xf32>
    %19 = arith.addf %17, %18 : vector<8x512xf32>
    %20 = vector.extract_strided_slice %19 {offsets = [0, 0], sizes = [8, 128], strides = [1, 1]} : vector<8x512xf32> to vector<8x128xf32>
    %21 = arith.negf %20 : vector<8x128xf32>
    %22 = math.exp %21 : vector<8x128xf32>
    %cst_20 = arith.constant 1.000000e+00 : f32
    %23 = vector.broadcast %cst_20 : f32 to vector<8x128xf32>
    %24 = arith.addf %23, %22 : vector<8x128xf32>
    %25 = arith.divf %23, %24 : vector<8x128xf32>
    %26 = vector.extract_strided_slice %19 {offsets = [0, 128], sizes = [8, 128], strides = [1, 1]} : vector<8x512xf32> to vector<8x128xf32>
    %27 = arith.negf %26 : vector<8x128xf32>
    %28 = math.exp %27 : vector<8x128xf32>
    %cst_21 = arith.constant 1.000000e+00 : f32
    %29 = vector.broadcast %cst_21 : f32 to vector<8x128xf32>
    %30 = arith.addf %29, %28 : vector<8x128xf32>
    %31 = arith.divf %29, %30 : vector<8x128xf32>
    %32 = vector.extract_strided_slice %19 {offsets = [0, 256], sizes = [8, 128], strides = [1, 1]} : vector<8x512xf32> to vector<8x128xf32>
    %33 = math.tanh %32 : vector<8x128xf32>
    %34 = vector.extract_strided_slice %19 {offsets = [0, 384], sizes = [8, 128], strides = [1, 1]} : vector<8x512xf32> to vector<8x128xf32>
    %35 = arith.negf %34 : vector<8x128xf32>
    %36 = math.exp %35 : vector<8x128xf32>
    %cst_22 = arith.constant 1.000000e+00 : f32
    %37 = vector.broadcast %cst_22 : f32 to vector<8x128xf32>
    %38 = arith.addf %37, %36 : vector<8x128xf32>
    %39 = arith.divf %37, %38 : vector<8x128xf32>
    %40 = arith.mulf %31, %14 : vector<8x128xf32>
    %41 = arith.mulf %25, %33 : vector<8x128xf32>
    %42 = arith.addf %40, %41 : vector<8x128xf32>
    %43 = math.tanh %42 : vector<8x128xf32>
    %44 = arith.mulf %39, %43 : vector<8x128xf32>
    %45 = arith.index_cast %c0_i32_16 : i32 to index
    %c0_23 = arith.constant 0 : index
    %c0_24 = arith.constant 0 : index
    %46 = vector.load %arg6[%45, %c0_23, %c0_24] : memref<8x8x128xf32, #tpu.memory_space<vmem>>, vector<1x8x128xf32>
    %47 = vector.shape_cast %46 : vector<1x8x128xf32> to vector<8x128xf32>
    %48 = vector.shape_cast %44 : vector<8x128xf32> to vector<1x8x128xf32>
    tpu.vector_store %arg6[%45, %c0_23, %c0_24], %48 {strides = array<i32>} : memref<8x8x128xf32, #tpu.memory_space<vmem>>, vector<1x8x128xf32>,
    %c1_i32 = arith.constant 1 : i32
    %49 = arith.index_cast %c1_i32 : i32 to index
    %c0_25 = arith.constant 0 : index
    %c0_26 = arith.constant 0 : index
    %50 = vector.load %arg7[%49, %c0_25, %c0_26] : memref<8x8x512xf32, #tpu.memory_space<vmem>>, vector<1x8x512xf32>
    %51 = vector.shape_cast %50 : vector<1x8x512xf32> to vector<8x512xf32>
    %cst_27 = arith.constant dense<0.000000e+00> : vector<8x512xf32>
    %52 = tpu.matmul %44, %12, %cst_27 {dimension_numbers = #tpu.dot_dimension_numbers<[1], [0], [0], [1], [0, 0, 1, 1], [], []>} : vector<8x128xf32>, vector<128x512xf32>, vector<8x512xf32> -> vector<8x512xf32>
    %53 = arith.addf %51, %52 : vector<8x512xf32>
    %54 = vector.extract_strided_slice %53 {offsets = [0, 0], sizes = [8, 128], strides = [1, 1]} : vector<8x512xf32> to vector<8x128xf32>
    %55 = arith.negf %54 : vector<8x128xf32>
    %56 = math.exp %55 : vector<8x128xf32>
    %cst_28 = arith.constant 1.000000e+00 : f32
    %57 = vector.broadcast %cst_28 : f32 to vector<8x128xf32>
    %58 = arith.addf %57, %56 : vector<8x128xf32>
    %59 = arith.divf %57, %58 : vector<8x128xf32>
    %60 = vector.extract_strided_slice %53 {offsets = [0, 128], sizes = [8, 128], strides = [1, 1]} : vector<8x512xf32> to vector<8x128xf32>
    %61 = arith.negf %60 : vector<8x128xf32>
    %62 = math.exp %61 : vector<8x128xf32>
    %cst_29 = arith.constant 1.000000e+00 : f32
    %63 = vector.broadcast %cst_29 : f32 to vector<8x128xf32>
    %64 = arith.addf %63, %62 : vector<8x128xf32>
    %65 = arith.divf %63, %64 : vector<8x128xf32>
    %66 = vector.extract_strided_slice %53 {offsets = [0, 256], sizes = [8, 128], strides = [1, 1]} : vector<8x512xf32> to vector<8x128xf32>
    %67 = math.tanh %66 : vector<8x128xf32>
    %68 = vector.extract_strided_slice %53 {offsets = [0, 384], sizes = [8, 128], strides = [1, 1]} : vector<8x512xf32> to vector<8x128xf32>
    %69 = arith.negf %68 : vector<8x128xf32>
    %70 = math.exp %69 : vector<8x128xf32>
    %cst_30 = arith.constant 1.000000e+00 : f32
    %71 = vector.broadcast %cst_30 : f32 to vector<8x128xf32>
    %72 = arith.addf %71, %70 : vector<8x128xf32>
    %73 = arith.divf %71, %72 : vector<8x128xf32>
    %74 = arith.mulf %65, %42 : vector<8x128xf32>
    %75 = arith.mulf %59, %67 : vector<8x128xf32>
    %76 = arith.addf %74, %75 : vector<8x128xf32>
    %77 = math.tanh %76 : vector<8x128xf32>
    %78 = arith.mulf %73, %77 : vector<8x128xf32>
    %79 = arith.index_cast %c1_i32 : i32 to index
    %c0_31 = arith.constant 0 : index
    %c0_32 = arith.constant 0 : index
    %80 = vector.load %arg6[%79, %c0_31, %c0_32] : memref<8x8x128xf32, #tpu.memory_space<vmem>>, vector<1x8x128xf32>
    %81 = vector.shape_cast %80 : vector<1x8x128xf32> to vector<8x128xf32>
    %82 = vector.shape_cast %78 : vector<8x128xf32> to vector<1x8x128xf32>
    tpu.vector_store %arg6[%79, %c0_31, %c0_32], %82 {strides = array<i32>} : memref<8x8x128xf32, #tpu.memory_space<vmem>>, vector<1x8x128xf32>,
    %c2_i32 = arith.constant 2 : i32
    %83 = arith.index_cast %c2_i32 : i32 to index
    %c0_33 = arith.constant 0 : index
    %c0_34 = arith.constant 0 : index
    %84 = vector.load %arg7[%83, %c0_33, %c0_34] : memref<8x8x512xf32, #tpu.memory_space<vmem>>, vector<1x8x512xf32>
    %85 = vector.shape_cast %84 : vector<1x8x512xf32> to vector<8x512xf32>
    %cst_35 = arith.constant dense<0.000000e+00> : vector<8x512xf32>
    %86 = tpu.matmul %78, %12, %cst_35 {dimension_numbers = #tpu.dot_dimension_numbers<[1], [0], [0], [1], [0, 0, 1, 1], [], []>} : vector<8x128xf32>, vector<128x512xf32>, vector<8x512xf32> -> vector<8x512xf32>
    %87 = arith.addf %85, %86 : vector<8x512xf32>
    %88 = vector.extract_strided_slice %87 {offsets = [0, 0], sizes = [8, 128], strides = [1, 1]} : vector<8x512xf32> to vector<8x128xf32>
    %89 = arith.negf %88 : vector<8x128xf32>
    %90 = math.exp %89 : vector<8x128xf32>
    %cst_36 = arith.constant 1.000000e+00 : f32
    %91 = vector.broadcast %cst_36 : f32 to vector<8x128xf32>
    %92 = arith.addf %91, %90 : vector<8x128xf32>
    %93 = arith.divf %91, %92 : vector<8x128xf32>
    %94 = vector.extract_strided_slice %87 {offsets = [0, 128], sizes = [8, 128], strides = [1, 1]} : vector<8x512xf32> to vector<8x128xf32>
    %95 = arith.negf %94 : vector<8x128xf32>
    %96 = math.exp %95 : vector<8x128xf32>
    %cst_37 = arith.constant 1.000000e+00 : f32
    %97 = vector.broadcast %cst_37 : f32 to vector<8x128xf32>
    %98 = arith.addf %97, %96 : vector<8x128xf32>
    %99 = arith.divf %97, %98 : vector<8x128xf32>
    %100 = vector.extract_strided_slice %87 {offsets = [0, 256], sizes = [8, 128], strides = [1, 1]} : vector<8x512xf32> to vector<8x128xf32>
    %101 = math.tanh %100 : vector<8x128xf32>
    %102 = vector.extract_strided_slice %87 {offsets = [0, 384], sizes = [8, 128], strides = [1, 1]} : vector<8x512xf32> to vector<8x128xf32>
    %103 = arith.negf %102 : vector<8x128xf32>
    %104 = math.exp %103 : vector<8x128xf32>
    %cst_38 = arith.constant 1.000000e+00 : f32
    %105 = vector.broadcast %cst_38 : f32 to vector<8x128xf32>
    %106 = arith.addf %105, %104 : vector<8x128xf32>
    %107 = arith.divf %105, %106 : vector<8x128xf32>
    %108 = arith.mulf %99, %76 : vector<8x128xf32>
    %109 = arith.mulf %93, %101 : vector<8x128xf32>
    %110 = arith.addf %108, %109 : vector<8x128xf32>
    %111 = math.tanh %110 : vector<8x128xf32>
    %112 = arith.mulf %107, %111 : vector<8x128xf32>
    %113 = arith.index_cast %c2_i32 : i32 to index
    %c0_39 = arith.constant 0 : index
    %c0_40 = arith.constant 0 : index
    %114 = vector.load %arg6[%113, %c0_39, %c0_40] : memref<8x8x128xf32, #tpu.memory_space<vmem>>, vector<1x8x128xf32>
    %115 = vector.shape_cast %114 : vector<1x8x128xf32> to vector<8x128xf32>
    %116 = vector.shape_cast %112 : vector<8x128xf32> to vector<1x8x128xf32>
    tpu.vector_store %arg6[%113, %c0_39, %c0_40], %116 {strides = array<i32>} : memref<8x8x128xf32, #tpu.memory_space<vmem>>, vector<1x8x128xf32>,
    %c3_i32 = arith.constant 3 : i32
    %117 = arith.index_cast %c3_i32 : i32 to index
    %c0_41 = arith.constant 0 : index
    %c0_42 = arith.constant 0 : index
    %118 = vector.load %arg7[%117, %c0_41, %c0_42] : memref<8x8x512xf32, #tpu.memory_space<vmem>>, vector<1x8x512xf32>
    %119 = vector.shape_cast %118 : vector<1x8x512xf32> to vector<8x512xf32>
    %cst_43 = arith.constant dense<0.000000e+00> : vector<8x512xf32>
    %120 = tpu.matmul %112, %12, %cst_43 {dimension_numbers = #tpu.dot_dimension_numbers<[1], [0], [0], [1], [0, 0, 1, 1], [], []>} : vector<8x128xf32>, vector<128x512xf32>, vector<8x512xf32> -> vector<8x512xf32>
    %121 = arith.addf %119, %120 : vector<8x512xf32>
    %122 = vector.extract_strided_slice %121 {offsets = [0, 0], sizes = [8, 128], strides = [1, 1]} : vector<8x512xf32> to vector<8x128xf32>
    %123 = arith.negf %122 : vector<8x128xf32>
    %124 = math.exp %123 : vector<8x128xf32>
    %cst_44 = arith.constant 1.000000e+00 : f32
    %125 = vector.broadcast %cst_44 : f32 to vector<8x128xf32>
    %126 = arith.addf %125, %124 : vector<8x128xf32>
    %127 = arith.divf %125, %126 : vector<8x128xf32>
    %128 = vector.extract_strided_slice %121 {offsets = [0, 128], sizes = [8, 128], strides = [1, 1]} : vector<8x512xf32> to vector<8x128xf32>
    %129 = arith.negf %128 : vector<8x128xf32>
    %130 = math.exp %129 : vector<8x128xf32>
    %cst_45 = arith.constant 1.000000e+00 : f32
    %131 = vector.broadcast %cst_45 : f32 to vector<8x128xf32>
    %132 = arith.addf %131, %130 : vector<8x128xf32>
    %133 = arith.divf %131, %132 : vector<8x128xf32>
    %134 = vector.extract_strided_slice %121 {offsets = [0, 256], sizes = [8, 128], strides = [1, 1]} : vector<8x512xf32> to vector<8x128xf32>
    %135 = math.tanh %134 : vector<8x128xf32>
    %136 = vector.extract_strided_slice %121 {offsets = [0, 384], sizes = [8, 128], strides = [1, 1]} : vector<8x512xf32> to vector<8x128xf32>
    %137 = arith.negf %136 : vector<8x128xf32>
    %138 = math.exp %137 : vector<8x128xf32>
    %cst_46 = arith.constant 1.000000e+00 : f32
    %139 = vector.broadcast %cst_46 : f32 to vector<8x128xf32>
    %140 = arith.addf %139, %138 : vector<8x128xf32>
    %141 = arith.divf %139, %140 : vector<8x128xf32>
    %142 = arith.mulf %133, %110 : vector<8x128xf32>
    %143 = arith.mulf %127, %135 : vector<8x128xf32>
    %144 = arith.addf %142, %143 : vector<8x128xf32>
    %145 = math.tanh %144 : vector<8x128xf32>
    %146 = arith.mulf %141, %145 : vector<8x128xf32>
    %147 = arith.index_cast %c3_i32 : i32 to index
    %c0_47 = arith.constant 0 : index
    %c0_48 = arith.constant 0 : index
    %148 = vector.load %arg6[%147, %c0_47, %c0_48] : memref<8x8x128xf32, #tpu.memory_space<vmem>>, vector<1x8x128xf32>
    %149 = vector.shape_cast %148 : vector<1x8x128xf32> to vector<8x128xf32>
    %150 = vector.shape_cast %146 : vector<8x128xf32> to vector<1x8x128xf32>
    tpu.vector_store %arg6[%147, %c0_47, %c0_48], %150 {strides = array<i32>} : memref<8x8x128xf32, #tpu.memory_space<vmem>>, vector<1x8x128xf32>,
    %c4_i32 = arith.constant 4 : i32
    %151 = arith.index_cast %c4_i32 : i32 to index
    %c0_49 = arith.constant 0 : index
    %c0_50 = arith.constant 0 : index
    %152 = vector.load %arg7[%151, %c0_49, %c0_50] : memref<8x8x512xf32, #tpu.memory_space<vmem>>, vector<1x8x512xf32>
    %153 = vector.shape_cast %152 : vector<1x8x512xf32> to vector<8x512xf32>
    %cst_51 = arith.constant dense<0.000000e+00> : vector<8x512xf32>
    %154 = tpu.matmul %146, %12, %cst_51 {dimension_numbers = #tpu.dot_dimension_numbers<[1], [0], [0], [1], [0, 0, 1, 1], [], []>} : vector<8x128xf32>, vector<128x512xf32>, vector<8x512xf32> -> vector<8x512xf32>
    %155 = arith.addf %153, %154 : vector<8x512xf32>
    %156 = vector.extract_strided_slice %155 {offsets = [0, 0], sizes = [8, 128], strides = [1, 1]} : vector<8x512xf32> to vector<8x128xf32>
    %157 = arith.negf %156 : vector<8x128xf32>
    %158 = math.exp %157 : vector<8x128xf32>
    %cst_52 = arith.constant 1.000000e+00 : f32
    %159 = vector.broadcast %cst_52 : f32 to vector<8x128xf32>
    %160 = arith.addf %159, %158 : vector<8x128xf32>
    %161 = arith.divf %159, %160 : vector<8x128xf32>
    %162 = vector.extract_strided_slice %155 {offsets = [0, 128], sizes = [8, 128], strides = [1, 1]} : vector<8x512xf32> to vector<8x128xf32>
    %163 = arith.negf %162 : vector<8x128xf32>
    %164 = math.exp %163 : vector<8x128xf32>
    %cst_53 = arith.constant 1.000000e+00 : f32
    %165 = vector.broadcast %cst_53 : f32 to vector<8x128xf32>
    %166 = arith.addf %165, %164 : vector<8x128xf32>
    %167 = arith.divf %165, %166 : vector<8x128xf32>
    %168 = vector.extract_strided_slice %155 {offsets = [0, 256], sizes = [8, 128], strides = [1, 1]} : vector<8x512xf32> to vector<8x128xf32>
    %169 = math.tanh %168 : vector<8x128xf32>
    %170 = vector.extract_strided_slice %155 {offsets = [0, 384], sizes = [8, 128], strides = [1, 1]} : vector<8x512xf32> to vector<8x128xf32>
    %171 = arith.negf %170 : vector<8x128xf32>
    %172 = math.exp %171 : vector<8x128xf32>
    %cst_54 = arith.constant 1.000000e+00 : f32
    %173 = vector.broadcast %cst_54 : f32 to vector<8x128xf32>
    %174 = arith.addf %173, %172 : vector<8x128xf32>
    %175 = arith.divf %173, %174 : vector<8x128xf32>
    %176 = arith.mulf %167, %144 : vector<8x128xf32>
    %177 = arith.mulf %161, %169 : vector<8x128xf32>
    %178 = arith.addf %176, %177 : vector<8x128xf32>
    %179 = math.tanh %178 : vector<8x128xf32>
    %180 = arith.mulf %175, %179 : vector<8x128xf32>
    %181 = arith.index_cast %c4_i32 : i32 to index
    %c0_55 = arith.constant 0 : index
    %c0_56 = arith.constant 0 : index
    %182 = vector.load %arg6[%181, %c0_55, %c0_56] : memref<8x8x128xf32, #tpu.memory_space<vmem>>, vector<1x8x128xf32>
    %183 = vector.shape_cast %182 : vector<1x8x128xf32> to vector<8x128xf32>
    %184 = vector.shape_cast %180 : vector<8x128xf32> to vector<1x8x128xf32>
    tpu.vector_store %arg6[%181, %c0_55, %c0_56], %184 {strides = array<i32>} : memref<8x8x128xf32, #tpu.memory_space<vmem>>, vector<1x8x128xf32>,
    %c5_i32 = arith.constant 5 : i32
    %185 = arith.index_cast %c5_i32 : i32 to index
    %c0_57 = arith.constant 0 : index
    %c0_58 = arith.constant 0 : index
    %186 = vector.load %arg7[%185, %c0_57, %c0_58] : memref<8x8x512xf32, #tpu.memory_space<vmem>>, vector<1x8x512xf32>
    %187 = vector.shape_cast %186 : vector<1x8x512xf32> to vector<8x512xf32>
    %cst_59 = arith.constant dense<0.000000e+00> : vector<8x512xf32>
    %188 = tpu.matmul %180, %12, %cst_59 {dimension_numbers = #tpu.dot_dimension_numbers<[1], [0], [0], [1], [0, 0, 1, 1], [], []>} : vector<8x128xf32>, vector<128x512xf32>, vector<8x512xf32> -> vector<8x512xf32>
    %189 = arith.addf %187, %188 : vector<8x512xf32>
    %190 = vector.extract_strided_slice %189 {offsets = [0, 0], sizes = [8, 128], strides = [1, 1]} : vector<8x512xf32> to vector<8x128xf32>
    %191 = arith.negf %190 : vector<8x128xf32>
    %192 = math.exp %191 : vector<8x128xf32>
    %cst_60 = arith.constant 1.000000e+00 : f32
    %193 = vector.broadcast %cst_60 : f32 to vector<8x128xf32>
    %194 = arith.addf %193, %192 : vector<8x128xf32>
    %195 = arith.divf %193, %194 : vector<8x128xf32>
    %196 = vector.extract_strided_slice %189 {offsets = [0, 128], sizes = [8, 128], strides = [1, 1]} : vector<8x512xf32> to vector<8x128xf32>
    %197 = arith.negf %196 : vector<8x128xf32>
    %198 = math.exp %197 : vector<8x128xf32>
    %cst_61 = arith.constant 1.000000e+00 : f32
    %199 = vector.broadcast %cst_61 : f32 to vector<8x128xf32>
    %200 = arith.addf %199, %198 : vector<8x128xf32>
    %201 = arith.divf %199, %200 : vector<8x128xf32>
    %202 = vector.extract_strided_slice %189 {offsets = [0, 256], sizes = [8, 128], strides = [1, 1]} : vector<8x512xf32> to vector<8x128xf32>
    %203 = math.tanh %202 : vector<8x128xf32>
    %204 = vector.extract_strided_slice %189 {offsets = [0, 384], sizes = [8, 128], strides = [1, 1]} : vector<8x512xf32> to vector<8x128xf32>
    %205 = arith.negf %204 : vector<8x128xf32>
    %206 = math.exp %205 : vector<8x128xf32>
    %cst_62 = arith.constant 1.000000e+00 : f32
    %207 = vector.broadcast %cst_62 : f32 to vector<8x128xf32>
    %208 = arith.addf %207, %206 : vector<8x128xf32>
    %209 = arith.divf %207, %208 : vector<8x128xf32>
    %210 = arith.mulf %201, %178 : vector<8x128xf32>
    %211 = arith.mulf %195, %203 : vector<8x128xf32>
    %212 = arith.addf %210, %211 : vector<8x128xf32>
    %213 = math.tanh %212 : vector<8x128xf32>
    %214 = arith.mulf %209, %213 : vector<8x128xf32>
    %215 = arith.index_cast %c5_i32 : i32 to index
    %c0_63 = arith.constant 0 : index
    %c0_64 = arith.constant 0 : index
    %216 = vector.load %arg6[%215, %c0_63, %c0_64] : memref<8x8x128xf32, #tpu.memory_space<vmem>>, vector<1x8x128xf32>
    %217 = vector.shape_cast %216 : vector<1x8x128xf32> to vector<8x128xf32>
    %218 = vector.shape_cast %214 : vector<8x128xf32> to vector<1x8x128xf32>
    tpu.vector_store %arg6[%215, %c0_63, %c0_64], %218 {strides = array<i32>} : memref<8x8x128xf32, #tpu.memory_space<vmem>>, vector<1x8x128xf32>,
    %c6_i32 = arith.constant 6 : i32
    %219 = arith.index_cast %c6_i32 : i32 to index
    %c0_65 = arith.constant 0 : index
    %c0_66 = arith.constant 0 : index
    %220 = vector.load %arg7[%219, %c0_65, %c0_66] : memref<8x8x512xf32, #tpu.memory_space<vmem>>, vector<1x8x512xf32>
    %221 = vector.shape_cast %220 : vector<1x8x512xf32> to vector<8x512xf32>
    %cst_67 = arith.constant dense<0.000000e+00> : vector<8x512xf32>
    %222 = tpu.matmul %214, %12, %cst_67 {dimension_numbers = #tpu.dot_dimension_numbers<[1], [0], [0], [1], [0, 0, 1, 1], [], []>} : vector<8x128xf32>, vector<128x512xf32>, vector<8x512xf32> -> vector<8x512xf32>
    %223 = arith.addf %221, %222 : vector<8x512xf32>
    %224 = vector.extract_strided_slice %223 {offsets = [0, 0], sizes = [8, 128], strides = [1, 1]} : vector<8x512xf32> to vector<8x128xf32>
    %225 = arith.negf %224 : vector<8x128xf32>
    %226 = math.exp %225 : vector<8x128xf32>
    %cst_68 = arith.constant 1.000000e+00 : f32
    %227 = vector.broadcast %cst_68 : f32 to vector<8x128xf32>
    %228 = arith.addf %227, %226 : vector<8x128xf32>
    %229 = arith.divf %227, %228 : vector<8x128xf32>
    %230 = vector.extract_strided_slice %223 {offsets = [0, 128], sizes = [8, 128], strides = [1, 1]} : vector<8x512xf32> to vector<8x128xf32>
    %231 = arith.negf %230 : vector<8x128xf32>
    %232 = math.exp %231 : vector<8x128xf32>
    %cst_69 = arith.constant 1.000000e+00 : f32
    %233 = vector.broadcast %cst_69 : f32 to vector<8x128xf32>
    %234 = arith.addf %233, %232 : vector<8x128xf32>
    %235 = arith.divf %233, %234 : vector<8x128xf32>
    %236 = vector.extract_strided_slice %223 {offsets = [0, 256], sizes = [8, 128], strides = [1, 1]} : vector<8x512xf32> to vector<8x128xf32>
    %237 = math.tanh %236 : vector<8x128xf32>
    %238 = vector.extract_strided_slice %223 {offsets = [0, 384], sizes = [8, 128], strides = [1, 1]} : vector<8x512xf32> to vector<8x128xf32>
    %239 = arith.negf %238 : vector<8x128xf32>
    %240 = math.exp %239 : vector<8x128xf32>
    %cst_70 = arith.constant 1.000000e+00 : f32
    %241 = vector.broadcast %cst_70 : f32 to vector<8x128xf32>
    %242 = arith.addf %241, %240 : vector<8x128xf32>
    %243 = arith.divf %241, %242 : vector<8x128xf32>
    %244 = arith.mulf %235, %212 : vector<8x128xf32>
    %245 = arith.mulf %229, %237 : vector<8x128xf32>
    %246 = arith.addf %244, %245 : vector<8x128xf32>
    %247 = math.tanh %246 : vector<8x128xf32>
    %248 = arith.mulf %243, %247 : vector<8x128xf32>
    %249 = arith.index_cast %c6_i32 : i32 to index
    %c0_71 = arith.constant 0 : index
    %c0_72 = arith.constant 0 : index
    %250 = vector.load %arg6[%249, %c0_71, %c0_72] : memref<8x8x128xf32, #tpu.memory_space<vmem>>, vector<1x8x128xf32>
    %251 = vector.shape_cast %250 : vector<1x8x128xf32> to vector<8x128xf32>
    %252 = vector.shape_cast %248 : vector<8x128xf32> to vector<1x8x128xf32>
    tpu.vector_store %arg6[%249, %c0_71, %c0_72], %252 {strides = array<i32>} : memref<8x8x128xf32, #tpu.memory_space<vmem>>, vector<1x8x128xf32>,
    %c7_i32 = arith.constant 7 : i32
    %253 = arith.index_cast %c7_i32 : i32 to index
    %c0_73 = arith.constant 0 : index
    %c0_74 = arith.constant 0 : index
    %254 = vector.load %arg7[%253, %c0_73, %c0_74] : memref<8x8x512xf32, #tpu.memory_space<vmem>>, vector<1x8x512xf32>
    %255 = vector.shape_cast %254 : vector<1x8x512xf32> to vector<8x512xf32>
    %cst_75 = arith.constant dense<0.000000e+00> : vector<8x512xf32>
    %256 = tpu.matmul %248, %12, %cst_75 {dimension_numbers = #tpu.dot_dimension_numbers<[1], [0], [0], [1], [0, 0, 1, 1], [], []>} : vector<8x128xf32>, vector<128x512xf32>, vector<8x512xf32> -> vector<8x512xf32>
    %257 = arith.addf %255, %256 : vector<8x512xf32>
    %258 = vector.extract_strided_slice %257 {offsets = [0, 0], sizes = [8, 128], strides = [1, 1]} : vector<8x512xf32> to vector<8x128xf32>
    %259 = arith.negf %258 : vector<8x128xf32>
    %260 = math.exp %259 : vector<8x128xf32>
    %cst_76 = arith.constant 1.000000e+00 : f32
    %261 = vector.broadcast %cst_76 : f32 to vector<8x128xf32>
    %262 = arith.addf %261, %260 : vector<8x128xf32>
    %263 = arith.divf %261, %262 : vector<8x128xf32>
    %264 = vector.extract_strided_slice %257 {offsets = [0, 128], sizes = [8, 128], strides = [1, 1]} : vector<8x512xf32> to vector<8x128xf32>
    %265 = arith.negf %264 : vector<8x128xf32>
    %266 = math.exp %265 : vector<8x128xf32>
    %cst_77 = arith.constant 1.000000e+00 : f32
    %267 = vector.broadcast %cst_77 : f32 to vector<8x128xf32>
    %268 = arith.addf %267, %266 : vector<8x128xf32>
    %269 = arith.divf %267, %268 : vector<8x128xf32>
    %270 = vector.extract_strided_slice %257 {offsets = [0, 256], sizes = [8, 128], strides = [1, 1]} : vector<8x512xf32> to vector<8x128xf32>
    %271 = math.tanh %270 : vector<8x128xf32>
    %272 = vector.extract_strided_slice %257 {offsets = [0, 384], sizes = [8, 128], strides = [1, 1]} : vector<8x512xf32> to vector<8x128xf32>
    %273 = arith.negf %272 : vector<8x128xf32>
    %274 = math.exp %273 : vector<8x128xf32>
    %cst_78 = arith.constant 1.000000e+00 : f32
    %275 = vector.broadcast %cst_78 : f32 to vector<8x128xf32>
    %276 = arith.addf %275, %274 : vector<8x128xf32>
    %277 = arith.divf %275, %276 : vector<8x128xf32>
    %278 = arith.mulf %269, %246 : vector<8x128xf32>
    %279 = arith.mulf %263, %271 : vector<8x128xf32>
    %280 = arith.addf %278, %279 : vector<8x128xf32>
    %281 = math.tanh %280 : vector<8x128xf32>
    %282 = arith.mulf %277, %281 : vector<8x128xf32>
    %283 = arith.index_cast %c7_i32 : i32 to index
    %c0_79 = arith.constant 0 : index
    %c0_80 = arith.constant 0 : index
    %284 = vector.load %arg6[%283, %c0_79, %c0_80] : memref<8x8x128xf32, #tpu.memory_space<vmem>>, vector<1x8x128xf32>
    %285 = vector.shape_cast %284 : vector<1x8x128xf32> to vector<8x128xf32>
    %286 = vector.shape_cast %282 : vector<8x128xf32> to vector<1x8x128xf32>
    tpu.vector_store %arg6[%283, %c0_79, %c0_80], %286 {strides = array<i32>} : memref<8x8x128xf32, #tpu.memory_space<vmem>>, vector<1x8x128xf32>,
    %c8_i32 = arith.constant 8 : i32
    %c0_81 = arith.constant 0 : index
    %c0_82 = arith.constant 0 : index
    %287 = vector.load %arg8[%c0_81, %c0_82] : memref<8x128xf32, #tpu.memory_space<vmem>>, vector<8x128xf32>
    tpu.vector_store %arg8[%c0_81, %c0_82], %282 {strides = array<i32>} : memref<8x128xf32, #tpu.memory_space<vmem>>, vector<8x128xf32>,
    %c0_83 = arith.constant 0 : index
    %c0_84 = arith.constant 0 : index
    %288 = vector.load %arg9[%c0_83, %c0_84] : memref<8x128xf32, #tpu.memory_space<vmem>>, vector<8x128xf32>
    tpu.vector_store %arg9[%c0_83, %c0_84], %280 {strides = array<i32>} : memref<8x128xf32, #tpu.memory_space<vmem>>, vector<8x128xf32>,
    return
  }
  func.func @transform_0(%arg0: i32, %arg1: i32) -> (i32, i32, i32) {
    %c0_i32 = arith.constant 0 : i32
    %c0_i32_0 = arith.constant 0 : i32
    return %arg1, %arg0, %c0_i32 : i32, i32, i32
  }
  func.func @transform_1(%arg0: i32, %arg1: i32) -> (i32, i32) {
    %c0_i32 = arith.constant 0 : i32
    %c0_i32_0 = arith.constant 0 : i32
    %c0_i32_1 = arith.constant 0 : i32
    return %c0_i32, %c0_i32_0 : i32, i32
  }
  func.func @transform_2(%arg0: i32, %arg1: i32) -> (i32, i32) {
    %c0_i32 = arith.constant 0 : i32
    %c0_i32_0 = arith.constant 0 : i32
    %c0_i32_1 = arith.constant 0 : i32
    return %c0_i32, %c0_i32_0 : i32, i32
  }
  func.func @transform_3(%arg0: i32, %arg1: i32) -> (i32, i32) {
    %c0_i32 = arith.constant 0 : i32
    %c0_i32_0 = arith.constant 0 : i32
    %c0_i32_1 = arith.constant 0 : i32
    return %c0_i32, %c0_i32_0 : i32, i32
  }
  func.func @transform_4(%arg0: i32, %arg1: i32) -> (i32, i32, i32) {
    %c0_i32 = arith.constant 0 : i32
    %c0_i32_0 = arith.constant 0 : i32
    return %arg1, %arg0, %c0_i32 : i32, i32, i32
  }
}

module attributes {stable_mosaic.version = 11 : i64} {
  func.func @lstm_last_layer_fc_kernel(%arg0: i32, %arg1: i32, %arg2: memref<8x8x128xf32, #tpu.memory_space<vmem>>, %arg3: memref<128x512xf32, #tpu.memory_space<vmem>>, %arg4: memref<128x512xf32, #tpu.memory_space<vmem>>, %arg5: memref<1x512xf32, #tpu.memory_space<vmem>>, %arg6: memref<1x128xf32, #tpu.memory_space<vmem>>, %arg7: memref<1x1xf32, #tpu.memory_space<vmem>>, %arg8: memref<8x1xf32, #tpu.memory_space<vmem>>, %arg9: memref<8x8x512xf32, #tpu.memory_space<vmem>>, %arg10: memref<8x128xf32, #tpu.memory_space<vmem>>, %arg11: memref<8x128xf32, #tpu.memory_space<vmem>>) attributes {dimension_semantics = [#tpu.dimension_semantics<parallel>, #tpu.dimension_semantics<arbitrary>], iteration_bounds = array<i64: 1, 1>, scalar_prefetch = 0 : i64, scratch_operands = 3 : i64, tpu.core_type = #tpu.core_type<tc>, window_params = [{transform_indices = @transform_0, window_bounds = array<i64: 8, 8, 128>}, {pipeline_mode = #tpu.pipeline_mode<synchronous>, transform_indices = @transform_1, window_bounds = array<i64: 128, 512>}, {pipeline_mode = #tpu.pipeline_mode<synchronous>, transform_indices = @transform_2, window_bounds = array<i64: 128, 512>}, {pipeline_mode = #tpu.pipeline_mode<synchronous>, transform_indices = @transform_3, window_bounds = array<i64: 1, 512>}, {pipeline_mode = #tpu.pipeline_mode<synchronous>, transform_indices = @transform_4, window_bounds = array<i64: 1, 128>}, {pipeline_mode = #tpu.pipeline_mode<synchronous>, transform_indices = @transform_5, window_bounds = array<i64: 1, 1>}, {transform_indices = @transform_6, window_bounds = array<i64: 8, 1>}]} {
    %c0_i32 = arith.constant 0 : i32
    %0 = arith.cmpi eq, %arg1, %c0_i32 : i32
    %1 = arith.extui %0 : i1 to i32
    %c0_i32_0 = arith.constant 0 : i32
    %2 = arith.cmpi ne, %1, %c0_i32_0 : i32
    scf.if %2 {
      %cst_71 = arith.constant 0.000000e+00 : f32
      %260 = vector.broadcast %cst_71 : f32 to vector<8x128xf32>
      %c0_72 = arith.constant 0 : index
      %c0_73 = arith.constant 0 : index
      %261 = vector.load %arg10[%c0_72, %c0_73] : memref<8x128xf32, #tpu.memory_space<vmem>>, vector<8x128xf32>
      tpu.vector_store %arg10[%c0_72, %c0_73], %260 {strides = array<i32>} : memref<8x128xf32, #tpu.memory_space<vmem>>, vector<8x128xf32>,
      %cst_74 = arith.constant 0.000000e+00 : f32
      %262 = vector.broadcast %cst_74 : f32 to vector<8x128xf32>
      %c0_75 = arith.constant 0 : index
      %c0_76 = arith.constant 0 : index
      %263 = vector.load %arg11[%c0_75, %c0_76] : memref<8x128xf32, #tpu.memory_space<vmem>>, vector<8x128xf32>
      tpu.vector_store %arg11[%c0_75, %c0_76], %262 {strides = array<i32>} : memref<8x128xf32, #tpu.memory_space<vmem>>, vector<8x128xf32>,
    } else {
    }
    %c0 = arith.constant 0 : index
    %c0_1 = arith.constant 0 : index
    %c0_2 = arith.constant 0 : index
    %3 = vector.load %arg2[%c0, %c0_1, %c0_2] : memref<8x8x128xf32, #tpu.memory_space<vmem>>, vector<8x8x128xf32>
    %4 = vector.shape_cast %3 : vector<8x8x128xf32> to vector<64x128xf32>
    %c0_3 = arith.constant 0 : index
    %c0_4 = arith.constant 0 : index
    %5 = vector.load %arg3[%c0_3, %c0_4] : memref<128x512xf32, #tpu.memory_space<vmem>>, vector<128x512xf32>
    %cst = arith.constant dense<0.000000e+00> : vector<64x512xf32>
    %6 = tpu.matmul %4, %5, %cst {dimension_numbers = #tpu.dot_dimension_numbers<[1], [0], [0], [1], [0, 0, 1, 1], [], []>} : vector<64x128xf32>, vector<128x512xf32>, vector<64x512xf32> -> vector<64x512xf32>
    %c0_5 = arith.constant 0 : index
    %c0_6 = arith.constant 0 : index
    %7 = vector.load %arg5[%c0_5, %c0_6] : memref<1x512xf32, #tpu.memory_space<vmem>>, vector<1x512xf32>
    %8 = vector.broadcast %7 : vector<1x512xf32> to vector<64x512xf32>
    %9 = arith.addf %6, %8 : vector<64x512xf32>
    %10 = vector.shape_cast %9 : vector<64x512xf32> to vector<8x8x512xf32>
    %c0_7 = arith.constant 0 : index
    %c0_8 = arith.constant 0 : index
    %c0_9 = arith.constant 0 : index
    %11 = vector.load %arg9[%c0_7, %c0_8, %c0_9] : memref<8x8x512xf32, #tpu.memory_space<vmem>>, vector<8x8x512xf32>
    tpu.vector_store %arg9[%c0_7, %c0_8, %c0_9], %10 {strides = array<i32>} : memref<8x8x512xf32, #tpu.memory_space<vmem>>, vector<8x8x512xf32>,
    %c0_10 = arith.constant 0 : index
    %c0_11 = arith.constant 0 : index
    %12 = vector.load %arg4[%c0_10, %c0_11] : memref<128x512xf32, #tpu.memory_space<vmem>>, vector<128x512xf32>
    %c0_12 = arith.constant 0 : index
    %c0_13 = arith.constant 0 : index
    %13 = vector.load %arg10[%c0_12, %c0_13] : memref<8x128xf32, #tpu.memory_space<vmem>>, vector<8x128xf32>
    %c0_14 = arith.constant 0 : index
    %c0_15 = arith.constant 0 : index
    %14 = vector.load %arg11[%c0_14, %c0_15] : memref<8x128xf32, #tpu.memory_space<vmem>>, vector<8x128xf32>
    %c0_i32_16 = arith.constant 0 : i32
    %15 = arith.index_cast %c0_i32_16 : i32 to index
    %c0_17 = arith.constant 0 : index
    %c0_18 = arith.constant 0 : index
    %16 = vector.load %arg9[%15, %c0_17, %c0_18] : memref<8x8x512xf32, #tpu.memory_space<vmem>>, vector<1x8x512xf32>
    %17 = vector.shape_cast %16 : vector<1x8x512xf32> to vector<8x512xf32>
    %cst_19 = arith.constant dense<0.000000e+00> : vector<8x512xf32>
    %18 = tpu.matmul %13, %12, %cst_19 {dimension_numbers = #tpu.dot_dimension_numbers<[1], [0], [0], [1], [0, 0, 1, 1], [], []>} : vector<8x128xf32>, vector<128x512xf32>, vector<8x512xf32> -> vector<8x512xf32>
    %19 = arith.addf %17, %18 : vector<8x512xf32>
    %20 = vector.extract_strided_slice %19 {offsets = [0, 0], sizes = [8, 128], strides = [1, 1]} : vector<8x512xf32> to vector<8x128xf32>
    %21 = arith.negf %20 : vector<8x128xf32>
    %22 = math.exp %21 : vector<8x128xf32>
    %cst_20 = arith.constant 1.000000e+00 : f32
    %23 = vector.broadcast %cst_20 : f32 to vector<8x128xf32>
    %24 = arith.addf %23, %22 : vector<8x128xf32>
    %25 = arith.divf %23, %24 : vector<8x128xf32>
    %26 = vector.extract_strided_slice %19 {offsets = [0, 128], sizes = [8, 128], strides = [1, 1]} : vector<8x512xf32> to vector<8x128xf32>
    %27 = arith.negf %26 : vector<8x128xf32>
    %28 = math.exp %27 : vector<8x128xf32>
    %cst_21 = arith.constant 1.000000e+00 : f32
    %29 = vector.broadcast %cst_21 : f32 to vector<8x128xf32>
    %30 = arith.addf %29, %28 : vector<8x128xf32>
    %31 = arith.divf %29, %30 : vector<8x128xf32>
    %32 = vector.extract_strided_slice %19 {offsets = [0, 256], sizes = [8, 128], strides = [1, 1]} : vector<8x512xf32> to vector<8x128xf32>
    %33 = math.tanh %32 : vector<8x128xf32>
    %34 = vector.extract_strided_slice %19 {offsets = [0, 384], sizes = [8, 128], strides = [1, 1]} : vector<8x512xf32> to vector<8x128xf32>
    %35 = arith.negf %34 : vector<8x128xf32>
    %36 = math.exp %35 : vector<8x128xf32>
    %cst_22 = arith.constant 1.000000e+00 : f32
    %37 = vector.broadcast %cst_22 : f32 to vector<8x128xf32>
    %38 = arith.addf %37, %36 : vector<8x128xf32>
    %39 = arith.divf %37, %38 : vector<8x128xf32>
    %40 = arith.mulf %31, %14 : vector<8x128xf32>
    %41 = arith.mulf %25, %33 : vector<8x128xf32>
    %42 = arith.addf %40, %41 : vector<8x128xf32>
    %43 = math.tanh %42 : vector<8x128xf32>
    %44 = arith.mulf %39, %43 : vector<8x128xf32>
    %c1_i32 = arith.constant 1 : i32
    %45 = arith.index_cast %c1_i32 : i32 to index
    %c0_23 = arith.constant 0 : index
    %c0_24 = arith.constant 0 : index
    %46 = vector.load %arg9[%45, %c0_23, %c0_24] : memref<8x8x512xf32, #tpu.memory_space<vmem>>, vector<1x8x512xf32>
    %47 = vector.shape_cast %46 : vector<1x8x512xf32> to vector<8x512xf32>
    %cst_25 = arith.constant dense<0.000000e+00> : vector<8x512xf32>
    %48 = tpu.matmul %44, %12, %cst_25 {dimension_numbers = #tpu.dot_dimension_numbers<[1], [0], [0], [1], [0, 0, 1, 1], [], []>} : vector<8x128xf32>, vector<128x512xf32>, vector<8x512xf32> -> vector<8x512xf32>
    %49 = arith.addf %47, %48 : vector<8x512xf32>
    %50 = vector.extract_strided_slice %49 {offsets = [0, 0], sizes = [8, 128], strides = [1, 1]} : vector<8x512xf32> to vector<8x128xf32>
    %51 = arith.negf %50 : vector<8x128xf32>
    %52 = math.exp %51 : vector<8x128xf32>
    %cst_26 = arith.constant 1.000000e+00 : f32
    %53 = vector.broadcast %cst_26 : f32 to vector<8x128xf32>
    %54 = arith.addf %53, %52 : vector<8x128xf32>
    %55 = arith.divf %53, %54 : vector<8x128xf32>
    %56 = vector.extract_strided_slice %49 {offsets = [0, 128], sizes = [8, 128], strides = [1, 1]} : vector<8x512xf32> to vector<8x128xf32>
    %57 = arith.negf %56 : vector<8x128xf32>
    %58 = math.exp %57 : vector<8x128xf32>
    %cst_27 = arith.constant 1.000000e+00 : f32
    %59 = vector.broadcast %cst_27 : f32 to vector<8x128xf32>
    %60 = arith.addf %59, %58 : vector<8x128xf32>
    %61 = arith.divf %59, %60 : vector<8x128xf32>
    %62 = vector.extract_strided_slice %49 {offsets = [0, 256], sizes = [8, 128], strides = [1, 1]} : vector<8x512xf32> to vector<8x128xf32>
    %63 = math.tanh %62 : vector<8x128xf32>
    %64 = vector.extract_strided_slice %49 {offsets = [0, 384], sizes = [8, 128], strides = [1, 1]} : vector<8x512xf32> to vector<8x128xf32>
    %65 = arith.negf %64 : vector<8x128xf32>
    %66 = math.exp %65 : vector<8x128xf32>
    %cst_28 = arith.constant 1.000000e+00 : f32
    %67 = vector.broadcast %cst_28 : f32 to vector<8x128xf32>
    %68 = arith.addf %67, %66 : vector<8x128xf32>
    %69 = arith.divf %67, %68 : vector<8x128xf32>
    %70 = arith.mulf %61, %42 : vector<8x128xf32>
    %71 = arith.mulf %55, %63 : vector<8x128xf32>
    %72 = arith.addf %70, %71 : vector<8x128xf32>
    %73 = math.tanh %72 : vector<8x128xf32>
    %74 = arith.mulf %69, %73 : vector<8x128xf32>
    %c2_i32 = arith.constant 2 : i32
    %75 = arith.index_cast %c2_i32 : i32 to index
    %c0_29 = arith.constant 0 : index
    %c0_30 = arith.constant 0 : index
    %76 = vector.load %arg9[%75, %c0_29, %c0_30] : memref<8x8x512xf32, #tpu.memory_space<vmem>>, vector<1x8x512xf32>
    %77 = vector.shape_cast %76 : vector<1x8x512xf32> to vector<8x512xf32>
    %cst_31 = arith.constant dense<0.000000e+00> : vector<8x512xf32>
    %78 = tpu.matmul %74, %12, %cst_31 {dimension_numbers = #tpu.dot_dimension_numbers<[1], [0], [0], [1], [0, 0, 1, 1], [], []>} : vector<8x128xf32>, vector<128x512xf32>, vector<8x512xf32> -> vector<8x512xf32>
    %79 = arith.addf %77, %78 : vector<8x512xf32>
    %80 = vector.extract_strided_slice %79 {offsets = [0, 0], sizes = [8, 128], strides = [1, 1]} : vector<8x512xf32> to vector<8x128xf32>
    %81 = arith.negf %80 : vector<8x128xf32>
    %82 = math.exp %81 : vector<8x128xf32>
    %cst_32 = arith.constant 1.000000e+00 : f32
    %83 = vector.broadcast %cst_32 : f32 to vector<8x128xf32>
    %84 = arith.addf %83, %82 : vector<8x128xf32>
    %85 = arith.divf %83, %84 : vector<8x128xf32>
    %86 = vector.extract_strided_slice %79 {offsets = [0, 128], sizes = [8, 128], strides = [1, 1]} : vector<8x512xf32> to vector<8x128xf32>
    %87 = arith.negf %86 : vector<8x128xf32>
    %88 = math.exp %87 : vector<8x128xf32>
    %cst_33 = arith.constant 1.000000e+00 : f32
    %89 = vector.broadcast %cst_33 : f32 to vector<8x128xf32>
    %90 = arith.addf %89, %88 : vector<8x128xf32>
    %91 = arith.divf %89, %90 : vector<8x128xf32>
    %92 = vector.extract_strided_slice %79 {offsets = [0, 256], sizes = [8, 128], strides = [1, 1]} : vector<8x512xf32> to vector<8x128xf32>
    %93 = math.tanh %92 : vector<8x128xf32>
    %94 = vector.extract_strided_slice %79 {offsets = [0, 384], sizes = [8, 128], strides = [1, 1]} : vector<8x512xf32> to vector<8x128xf32>
    %95 = arith.negf %94 : vector<8x128xf32>
    %96 = math.exp %95 : vector<8x128xf32>
    %cst_34 = arith.constant 1.000000e+00 : f32
    %97 = vector.broadcast %cst_34 : f32 to vector<8x128xf32>
    %98 = arith.addf %97, %96 : vector<8x128xf32>
    %99 = arith.divf %97, %98 : vector<8x128xf32>
    %100 = arith.mulf %91, %72 : vector<8x128xf32>
    %101 = arith.mulf %85, %93 : vector<8x128xf32>
    %102 = arith.addf %100, %101 : vector<8x128xf32>
    %103 = math.tanh %102 : vector<8x128xf32>
    %104 = arith.mulf %99, %103 : vector<8x128xf32>
    %c3_i32 = arith.constant 3 : i32
    %105 = arith.index_cast %c3_i32 : i32 to index
    %c0_35 = arith.constant 0 : index
    %c0_36 = arith.constant 0 : index
    %106 = vector.load %arg9[%105, %c0_35, %c0_36] : memref<8x8x512xf32, #tpu.memory_space<vmem>>, vector<1x8x512xf32>
    %107 = vector.shape_cast %106 : vector<1x8x512xf32> to vector<8x512xf32>
    %cst_37 = arith.constant dense<0.000000e+00> : vector<8x512xf32>
    %108 = tpu.matmul %104, %12, %cst_37 {dimension_numbers = #tpu.dot_dimension_numbers<[1], [0], [0], [1], [0, 0, 1, 1], [], []>} : vector<8x128xf32>, vector<128x512xf32>, vector<8x512xf32> -> vector<8x512xf32>
    %109 = arith.addf %107, %108 : vector<8x512xf32>
    %110 = vector.extract_strided_slice %109 {offsets = [0, 0], sizes = [8, 128], strides = [1, 1]} : vector<8x512xf32> to vector<8x128xf32>
    %111 = arith.negf %110 : vector<8x128xf32>
    %112 = math.exp %111 : vector<8x128xf32>
    %cst_38 = arith.constant 1.000000e+00 : f32
    %113 = vector.broadcast %cst_38 : f32 to vector<8x128xf32>
    %114 = arith.addf %113, %112 : vector<8x128xf32>
    %115 = arith.divf %113, %114 : vector<8x128xf32>
    %116 = vector.extract_strided_slice %109 {offsets = [0, 128], sizes = [8, 128], strides = [1, 1]} : vector<8x512xf32> to vector<8x128xf32>
    %117 = arith.negf %116 : vector<8x128xf32>
    %118 = math.exp %117 : vector<8x128xf32>
    %cst_39 = arith.constant 1.000000e+00 : f32
    %119 = vector.broadcast %cst_39 : f32 to vector<8x128xf32>
    %120 = arith.addf %119, %118 : vector<8x128xf32>
    %121 = arith.divf %119, %120 : vector<8x128xf32>
    %122 = vector.extract_strided_slice %109 {offsets = [0, 256], sizes = [8, 128], strides = [1, 1]} : vector<8x512xf32> to vector<8x128xf32>
    %123 = math.tanh %122 : vector<8x128xf32>
    %124 = vector.extract_strided_slice %109 {offsets = [0, 384], sizes = [8, 128], strides = [1, 1]} : vector<8x512xf32> to vector<8x128xf32>
    %125 = arith.negf %124 : vector<8x128xf32>
    %126 = math.exp %125 : vector<8x128xf32>
    %cst_40 = arith.constant 1.000000e+00 : f32
    %127 = vector.broadcast %cst_40 : f32 to vector<8x128xf32>
    %128 = arith.addf %127, %126 : vector<8x128xf32>
    %129 = arith.divf %127, %128 : vector<8x128xf32>
    %130 = arith.mulf %121, %102 : vector<8x128xf32>
    %131 = arith.mulf %115, %123 : vector<8x128xf32>
    %132 = arith.addf %130, %131 : vector<8x128xf32>
    %133 = math.tanh %132 : vector<8x128xf32>
    %134 = arith.mulf %129, %133 : vector<8x128xf32>
    %c4_i32 = arith.constant 4 : i32
    %135 = arith.index_cast %c4_i32 : i32 to index
    %c0_41 = arith.constant 0 : index
    %c0_42 = arith.constant 0 : index
    %136 = vector.load %arg9[%135, %c0_41, %c0_42] : memref<8x8x512xf32, #tpu.memory_space<vmem>>, vector<1x8x512xf32>
    %137 = vector.shape_cast %136 : vector<1x8x512xf32> to vector<8x512xf32>
    %cst_43 = arith.constant dense<0.000000e+00> : vector<8x512xf32>
    %138 = tpu.matmul %134, %12, %cst_43 {dimension_numbers = #tpu.dot_dimension_numbers<[1], [0], [0], [1], [0, 0, 1, 1], [], []>} : vector<8x128xf32>, vector<128x512xf32>, vector<8x512xf32> -> vector<8x512xf32>
    %139 = arith.addf %137, %138 : vector<8x512xf32>
    %140 = vector.extract_strided_slice %139 {offsets = [0, 0], sizes = [8, 128], strides = [1, 1]} : vector<8x512xf32> to vector<8x128xf32>
    %141 = arith.negf %140 : vector<8x128xf32>
    %142 = math.exp %141 : vector<8x128xf32>
    %cst_44 = arith.constant 1.000000e+00 : f32
    %143 = vector.broadcast %cst_44 : f32 to vector<8x128xf32>
    %144 = arith.addf %143, %142 : vector<8x128xf32>
    %145 = arith.divf %143, %144 : vector<8x128xf32>
    %146 = vector.extract_strided_slice %139 {offsets = [0, 128], sizes = [8, 128], strides = [1, 1]} : vector<8x512xf32> to vector<8x128xf32>
    %147 = arith.negf %146 : vector<8x128xf32>
    %148 = math.exp %147 : vector<8x128xf32>
    %cst_45 = arith.constant 1.000000e+00 : f32
    %149 = vector.broadcast %cst_45 : f32 to vector<8x128xf32>
    %150 = arith.addf %149, %148 : vector<8x128xf32>
    %151 = arith.divf %149, %150 : vector<8x128xf32>
    %152 = vector.extract_strided_slice %139 {offsets = [0, 256], sizes = [8, 128], strides = [1, 1]} : vector<8x512xf32> to vector<8x128xf32>
    %153 = math.tanh %152 : vector<8x128xf32>
    %154 = vector.extract_strided_slice %139 {offsets = [0, 384], sizes = [8, 128], strides = [1, 1]} : vector<8x512xf32> to vector<8x128xf32>
    %155 = arith.negf %154 : vector<8x128xf32>
    %156 = math.exp %155 : vector<8x128xf32>
    %cst_46 = arith.constant 1.000000e+00 : f32
    %157 = vector.broadcast %cst_46 : f32 to vector<8x128xf32>
    %158 = arith.addf %157, %156 : vector<8x128xf32>
    %159 = arith.divf %157, %158 : vector<8x128xf32>
    %160 = arith.mulf %151, %132 : vector<8x128xf32>
    %161 = arith.mulf %145, %153 : vector<8x128xf32>
    %162 = arith.addf %160, %161 : vector<8x128xf32>
    %163 = math.tanh %162 : vector<8x128xf32>
    %164 = arith.mulf %159, %163 : vector<8x128xf32>
    %c5_i32 = arith.constant 5 : i32
    %165 = arith.index_cast %c5_i32 : i32 to index
    %c0_47 = arith.constant 0 : index
    %c0_48 = arith.constant 0 : index
    %166 = vector.load %arg9[%165, %c0_47, %c0_48] : memref<8x8x512xf32, #tpu.memory_space<vmem>>, vector<1x8x512xf32>
    %167 = vector.shape_cast %166 : vector<1x8x512xf32> to vector<8x512xf32>
    %cst_49 = arith.constant dense<0.000000e+00> : vector<8x512xf32>
    %168 = tpu.matmul %164, %12, %cst_49 {dimension_numbers = #tpu.dot_dimension_numbers<[1], [0], [0], [1], [0, 0, 1, 1], [], []>} : vector<8x128xf32>, vector<128x512xf32>, vector<8x512xf32> -> vector<8x512xf32>
    %169 = arith.addf %167, %168 : vector<8x512xf32>
    %170 = vector.extract_strided_slice %169 {offsets = [0, 0], sizes = [8, 128], strides = [1, 1]} : vector<8x512xf32> to vector<8x128xf32>
    %171 = arith.negf %170 : vector<8x128xf32>
    %172 = math.exp %171 : vector<8x128xf32>
    %cst_50 = arith.constant 1.000000e+00 : f32
    %173 = vector.broadcast %cst_50 : f32 to vector<8x128xf32>
    %174 = arith.addf %173, %172 : vector<8x128xf32>
    %175 = arith.divf %173, %174 : vector<8x128xf32>
    %176 = vector.extract_strided_slice %169 {offsets = [0, 128], sizes = [8, 128], strides = [1, 1]} : vector<8x512xf32> to vector<8x128xf32>
    %177 = arith.negf %176 : vector<8x128xf32>
    %178 = math.exp %177 : vector<8x128xf32>
    %cst_51 = arith.constant 1.000000e+00 : f32
    %179 = vector.broadcast %cst_51 : f32 to vector<8x128xf32>
    %180 = arith.addf %179, %178 : vector<8x128xf32>
    %181 = arith.divf %179, %180 : vector<8x128xf32>
    %182 = vector.extract_strided_slice %169 {offsets = [0, 256], sizes = [8, 128], strides = [1, 1]} : vector<8x512xf32> to vector<8x128xf32>
    %183 = math.tanh %182 : vector<8x128xf32>
    %184 = vector.extract_strided_slice %169 {offsets = [0, 384], sizes = [8, 128], strides = [1, 1]} : vector<8x512xf32> to vector<8x128xf32>
    %185 = arith.negf %184 : vector<8x128xf32>
    %186 = math.exp %185 : vector<8x128xf32>
    %cst_52 = arith.constant 1.000000e+00 : f32
    %187 = vector.broadcast %cst_52 : f32 to vector<8x128xf32>
    %188 = arith.addf %187, %186 : vector<8x128xf32>
    %189 = arith.divf %187, %188 : vector<8x128xf32>
    %190 = arith.mulf %181, %162 : vector<8x128xf32>
    %191 = arith.mulf %175, %183 : vector<8x128xf32>
    %192 = arith.addf %190, %191 : vector<8x128xf32>
    %193 = math.tanh %192 : vector<8x128xf32>
    %194 = arith.mulf %189, %193 : vector<8x128xf32>
    %c6_i32 = arith.constant 6 : i32
    %195 = arith.index_cast %c6_i32 : i32 to index
    %c0_53 = arith.constant 0 : index
    %c0_54 = arith.constant 0 : index
    %196 = vector.load %arg9[%195, %c0_53, %c0_54] : memref<8x8x512xf32, #tpu.memory_space<vmem>>, vector<1x8x512xf32>
    %197 = vector.shape_cast %196 : vector<1x8x512xf32> to vector<8x512xf32>
    %cst_55 = arith.constant dense<0.000000e+00> : vector<8x512xf32>
    %198 = tpu.matmul %194, %12, %cst_55 {dimension_numbers = #tpu.dot_dimension_numbers<[1], [0], [0], [1], [0, 0, 1, 1], [], []>} : vector<8x128xf32>, vector<128x512xf32>, vector<8x512xf32> -> vector<8x512xf32>
    %199 = arith.addf %197, %198 : vector<8x512xf32>
    %200 = vector.extract_strided_slice %199 {offsets = [0, 0], sizes = [8, 128], strides = [1, 1]} : vector<8x512xf32> to vector<8x128xf32>
    %201 = arith.negf %200 : vector<8x128xf32>
    %202 = math.exp %201 : vector<8x128xf32>
    %cst_56 = arith.constant 1.000000e+00 : f32
    %203 = vector.broadcast %cst_56 : f32 to vector<8x128xf32>
    %204 = arith.addf %203, %202 : vector<8x128xf32>
    %205 = arith.divf %203, %204 : vector<8x128xf32>
    %206 = vector.extract_strided_slice %199 {offsets = [0, 128], sizes = [8, 128], strides = [1, 1]} : vector<8x512xf32> to vector<8x128xf32>
    %207 = arith.negf %206 : vector<8x128xf32>
    %208 = math.exp %207 : vector<8x128xf32>
    %cst_57 = arith.constant 1.000000e+00 : f32
    %209 = vector.broadcast %cst_57 : f32 to vector<8x128xf32>
    %210 = arith.addf %209, %208 : vector<8x128xf32>
    %211 = arith.divf %209, %210 : vector<8x128xf32>
    %212 = vector.extract_strided_slice %199 {offsets = [0, 256], sizes = [8, 128], strides = [1, 1]} : vector<8x512xf32> to vector<8x128xf32>
    %213 = math.tanh %212 : vector<8x128xf32>
    %214 = vector.extract_strided_slice %199 {offsets = [0, 384], sizes = [8, 128], strides = [1, 1]} : vector<8x512xf32> to vector<8x128xf32>
    %215 = arith.negf %214 : vector<8x128xf32>
    %216 = math.exp %215 : vector<8x128xf32>
    %cst_58 = arith.constant 1.000000e+00 : f32
    %217 = vector.broadcast %cst_58 : f32 to vector<8x128xf32>
    %218 = arith.addf %217, %216 : vector<8x128xf32>
    %219 = arith.divf %217, %218 : vector<8x128xf32>
    %220 = arith.mulf %211, %192 : vector<8x128xf32>
    %221 = arith.mulf %205, %213 : vector<8x128xf32>
    %222 = arith.addf %220, %221 : vector<8x128xf32>
    %223 = math.tanh %222 : vector<8x128xf32>
    %224 = arith.mulf %219, %223 : vector<8x128xf32>
    %c7_i32 = arith.constant 7 : i32
    %225 = arith.index_cast %c7_i32 : i32 to index
    %c0_59 = arith.constant 0 : index
    %c0_60 = arith.constant 0 : index
    %226 = vector.load %arg9[%225, %c0_59, %c0_60] : memref<8x8x512xf32, #tpu.memory_space<vmem>>, vector<1x8x512xf32>
    %227 = vector.shape_cast %226 : vector<1x8x512xf32> to vector<8x512xf32>
    %cst_61 = arith.constant dense<0.000000e+00> : vector<8x512xf32>
    %228 = tpu.matmul %224, %12, %cst_61 {dimension_numbers = #tpu.dot_dimension_numbers<[1], [0], [0], [1], [0, 0, 1, 1], [], []>} : vector<8x128xf32>, vector<128x512xf32>, vector<8x512xf32> -> vector<8x512xf32>
    %229 = arith.addf %227, %228 : vector<8x512xf32>
    %230 = vector.extract_strided_slice %229 {offsets = [0, 0], sizes = [8, 128], strides = [1, 1]} : vector<8x512xf32> to vector<8x128xf32>
    %231 = arith.negf %230 : vector<8x128xf32>
    %232 = math.exp %231 : vector<8x128xf32>
    %cst_62 = arith.constant 1.000000e+00 : f32
    %233 = vector.broadcast %cst_62 : f32 to vector<8x128xf32>
    %234 = arith.addf %233, %232 : vector<8x128xf32>
    %235 = arith.divf %233, %234 : vector<8x128xf32>
    %236 = vector.extract_strided_slice %229 {offsets = [0, 128], sizes = [8, 128], strides = [1, 1]} : vector<8x512xf32> to vector<8x128xf32>
    %237 = arith.negf %236 : vector<8x128xf32>
    %238 = math.exp %237 : vector<8x128xf32>
    %cst_63 = arith.constant 1.000000e+00 : f32
    %239 = vector.broadcast %cst_63 : f32 to vector<8x128xf32>
    %240 = arith.addf %239, %238 : vector<8x128xf32>
    %241 = arith.divf %239, %240 : vector<8x128xf32>
    %242 = vector.extract_strided_slice %229 {offsets = [0, 256], sizes = [8, 128], strides = [1, 1]} : vector<8x512xf32> to vector<8x128xf32>
    %243 = math.tanh %242 : vector<8x128xf32>
    %244 = vector.extract_strided_slice %229 {offsets = [0, 384], sizes = [8, 128], strides = [1, 1]} : vector<8x512xf32> to vector<8x128xf32>
    %245 = arith.negf %244 : vector<8x128xf32>
    %246 = math.exp %245 : vector<8x128xf32>
    %cst_64 = arith.constant 1.000000e+00 : f32
    %247 = vector.broadcast %cst_64 : f32 to vector<8x128xf32>
    %248 = arith.addf %247, %246 : vector<8x128xf32>
    %249 = arith.divf %247, %248 : vector<8x128xf32>
    %250 = arith.mulf %241, %222 : vector<8x128xf32>
    %251 = arith.mulf %235, %243 : vector<8x128xf32>
    %252 = arith.addf %250, %251 : vector<8x128xf32>
    %253 = math.tanh %252 : vector<8x128xf32>
    %254 = arith.mulf %249, %253 : vector<8x128xf32>
    %c8_i32 = arith.constant 8 : i32
    %c0_65 = arith.constant 0 : index
    %c0_66 = arith.constant 0 : index
    %255 = vector.load %arg10[%c0_65, %c0_66] : memref<8x128xf32, #tpu.memory_space<vmem>>, vector<8x128xf32>
    tpu.vector_store %arg10[%c0_65, %c0_66], %254 {strides = array<i32>} : memref<8x128xf32, #tpu.memory_space<vmem>>, vector<8x128xf32>,
    %c0_67 = arith.constant 0 : index
    %c0_68 = arith.constant 0 : index
    %256 = vector.load %arg11[%c0_67, %c0_68] : memref<8x128xf32, #tpu.memory_space<vmem>>, vector<8x128xf32>
    tpu.vector_store %arg11[%c0_67, %c0_68], %252 {strides = array<i32>} : memref<8x128xf32, #tpu.memory_space<vmem>>, vector<8x128xf32>,
    %c0_i32_69 = arith.constant 0 : i32
    %257 = arith.cmpi eq, %arg1, %c0_i32_69 : i32
    %258 = arith.extui %257 : i1 to i32
    %c0_i32_70 = arith.constant 0 : i32
    %259 = arith.cmpi ne, %258, %c0_i32_70 : i32
    scf.if %259 {
      %c0_71 = arith.constant 0 : index
      %c0_72 = arith.constant 0 : index
      %260 = vector.load %arg6[%c0_71, %c0_72] : memref<1x128xf32, #tpu.memory_space<vmem>>, vector<1x128xf32>
      %261 = vector.broadcast %260 : vector<1x128xf32> to vector<8x128xf32>
      %262 = arith.mulf %254, %261 : vector<8x128xf32>
      %cst_73 = arith.constant dense<0.000000e+00> : vector<8xf32>
      %263 = vector.multi_reduction <add>, %262, %cst_73 [1] : vector<8x128xf32> to vector<8xf32>
      %264 = vector.shape_cast %263 : vector<8xf32> to vector<8x1xf32>
      %c0_74 = arith.constant 0 : index
      %c0_75 = arith.constant 0 : index
      %265 = vector.load %arg7[%c0_74, %c0_75] : memref<1x1xf32, #tpu.memory_space<vmem>>, vector<1x1xf32>
      %266 = vector.broadcast %265 : vector<1x1xf32> to vector<8x1xf32>
      %267 = arith.addf %264, %266 : vector<8x1xf32>
      %c0_76 = arith.constant 0 : index
      %c0_77 = arith.constant 0 : index
      %268 = vector.load %arg8[%c0_76, %c0_77] : memref<8x1xf32, #tpu.memory_space<vmem>>, vector<8x1xf32>
      tpu.vector_store %arg8[%c0_76, %c0_77], %267 {strides = array<i32>} : memref<8x1xf32, #tpu.memory_space<vmem>>, vector<8x1xf32>,
    } else {
    }
    return
  }
  func.func @transform_0(%arg0: i32, %arg1: i32) -> (i32, i32, i32) {
    %c0_i32 = arith.constant 0 : i32
    %c0_i32_0 = arith.constant 0 : i32
    return %arg1, %arg0, %c0_i32 : i32, i32, i32
  }
  func.func @transform_1(%arg0: i32, %arg1: i32) -> (i32, i32) {
    %c0_i32 = arith.constant 0 : i32
    %c0_i32_0 = arith.constant 0 : i32
    %c0_i32_1 = arith.constant 0 : i32
    return %c0_i32, %c0_i32_0 : i32, i32
  }
  func.func @transform_2(%arg0: i32, %arg1: i32) -> (i32, i32) {
    %c0_i32 = arith.constant 0 : i32
    %c0_i32_0 = arith.constant 0 : i32
    %c0_i32_1 = arith.constant 0 : i32
    return %c0_i32, %c0_i32_0 : i32, i32
  }
  func.func @transform_3(%arg0: i32, %arg1: i32) -> (i32, i32) {
    %c0_i32 = arith.constant 0 : i32
    %c0_i32_0 = arith.constant 0 : i32
    %c0_i32_1 = arith.constant 0 : i32
    return %c0_i32, %c0_i32_0 : i32, i32
  }
  func.func @transform_4(%arg0: i32, %arg1: i32) -> (i32, i32) {
    %c0_i32 = arith.constant 0 : i32
    %c0_i32_0 = arith.constant 0 : i32
    %c0_i32_1 = arith.constant 0 : i32
    return %c0_i32, %c0_i32_0 : i32, i32
  }
  func.func @transform_5(%arg0: i32, %arg1: i32) -> (i32, i32) {
    %c0_i32 = arith.constant 0 : i32
    %c0_i32_0 = arith.constant 0 : i32
    %c0_i32_1 = arith.constant 0 : i32
    return %c0_i32, %c0_i32_0 : i32, i32
  }
  func.func @transform_6(%arg0: i32, %arg1: i32) -> (i32, i32) {
    %c0_i32 = arith.constant 0 : i32
    %c0_i32_0 = arith.constant 0 : i32
    return %arg0, %c0_i32 : i32, i32
  }
}

</mosaic_0001>

<bundles_post_ra>
// kernel: lstm_regressor_forward.2
= control target key start
LH: loop header
LB: loop body
LE: loop exit
PB: predicated region body
PF: predicated region fallthrough
CT: control target
= control target key end

     0   :  { %v2661_v3 = vmov 0.0   ;;  %s3540_s1 = inlined_call_operand.vmem [shape: f32[128,512], index: 1, kind: input, shape index: {}]   ;;  %s3541_s2 = inlined_call_operand.vmem [shape: f32[128,512], index: 2, kind: input, shape index: {}]   ;;  %s3542_s0 = inlined_call_operand.vmem [shape: f32[8,8,128], index: 0, kind: input, shape index: {}]   ;;  %s3543_s3 = inlined_call_operand.vmem [shape: f32[1,512], index: 3, kind: input, shape index: {}]   ;;  %s3544_s4 = inlined_call_operand.vmem [shape: f32[8,8,128], index: 4, kind: output, shape index: {}]  }
   0x1   :  { %v32_v0 = vld [vmem:[%s3540_s1 + $0x8] sm:$0xff]  ;;  %v34_v2 = vld [vmem:[%s3540_s1 + $0x18] sm:$0xff]  ;;  %181 = vmatprep.mubr.f32.mxu0 %v2661_v3  ;;  %294 = vmatprep.mubr.f32.mxu1 %v2661_v3  ;;  %v31_v6 = vld [vmem:[%s3540_s1] sm:$0xff] }
   0x2   :  { %v36_v1 = vld [vmem:[%s3540_s1 + $0x28] sm:$0xff]  ;;  %v38_v5 = vld [vmem:[%s3540_s1 + $0x38] sm:$0xff]  ;;  %v35_v7 = vld [vmem:[%s3540_s1 + $0x20] sm:$0xff] }
   0x3   :  { %v1892_v4 = vpack.c.bf16 %v36_v1, %v32_v0  ;;  %v1924_v8 = vpack.c.bf16 %v38_v5, %v34_v2  ;;  %v1894_v9 = vpack.c.bf16 %v35_v7, %v31_v6  ;;  %v33_v10 = vld [vmem:[%s3540_s1 + $0x10] sm:$0xff]  ;;  %v40_v12 = vld [vmem:[%s3540_s1 + $0x48] sm:$0xff]  ;;  %v42_v15 = vld [vmem:[%s3540_s1 + $0x58] sm:$0xff] }
   0x4   :  { %v37_v11 = vld [vmem:[%s3540_s1 + $0x30] sm:$0xff]  ;;  %v44_v14 = vld [vmem:[%s3540_s1 + $0x68] sm:$0xff]  ;;  %v46_v16 = vld [vmem:[%s3540_s1 + $0x78] sm:$0xff] }
   0x5   :  { %1893 = vmatprep.subr.bf16.mxu0 %v1892_v4  ;;  %v1926_v13 = vpack.c.bf16 %v37_v11, %v33_v10  ;;  %1925 = vmatprep.subr.bf16.mxu1 %v1924_v8  ;;  %v1896_v17 = vpack.c.bf16 %v44_v14, %v40_v12  ;;  %v1928_v18 = vpack.c.bf16 %v46_v16, %v42_v15  ;;  %v39_v19 = vld [vmem:[%s3540_s1 + $0x40] sm:$0xff]  ;;  %v41_v21 = vld [vmem:[%s3540_s1 + $0x50] sm:$0xff]  ;;  %v48_v24 = vld [vmem:[%s3540_s1 + $0x88] sm:$0xff] }
   0x6   :  { %1895 = vmatpush1.bf16.msra.mxu0 %v1894_v9  ;;  %v43_v20 = vld [vmem:[%s3540_s1 + $0x60] sm:$0xff]  ;;  %v45_v23 = vld [vmem:[%s3540_s1 + $0x70] sm:$0xff]  ;;  %v52_v25 = vld [vmem:[%s3540_s1 + $0xa8] sm:$0xff] }
   0x7   :  { %1927 = vmatpush1.bf16.msra.mxu1 %v1926_v13  ;;  %v1898_v22 = vpack.c.bf16 %v43_v20, %v39_v19  ;;  %1897 = vmatprep.subr.bf16.mxu0 %v1896_v17  ;;  %v1930_v26 = vpack.c.bf16 %v45_v23, %v41_v21  ;;  %v1900_v27 = vpack.c.bf16 %v52_v25, %v48_v24  ;;  %v50_v28 = vld [vmem:[%s3540_s1 + $0x98] sm:$0xff]  ;;  %v47_v30 = vld [vmem:[%s3540_s1 + $0x80] sm:$0xff]  ;;  %v49_v33 = vld [vmem:[%s3540_s1 + $0x90] sm:$0xff] }
   0x8   :  { %1929 = vmatprep.subr.bf16.mxu1 %v1928_v18  ;;  %v54_v29 = vld [vmem:[%s3540_s1 + $0xb8] sm:$0xff]  ;;  %v51_v32 = vld [vmem:[%s3540_s1 + $0xa0] sm:$0xff]  ;;  %v53_v34 = vld [vmem:[%s3540_s1 + $0xb0] sm:$0xff] }
   0x9   :  { %v1932_v31 = vpack.c.bf16 %v54_v29, %v50_v28  ;;  %v1902_v35 = vpack.c.bf16 %v51_v32, %v47_v30  ;;  %v56_v36 = vld [vmem:[%s3540_s1 + $0xc8] sm:$0xff]  ;;  %v58_v38 = vld [vmem:[%s3540_s1 + $0xd8] sm:$0xff]  ;;  %v1934_v39 = vpack.c.bf16 %v53_v34, %v49_v33  ;;  %v55_v42 = vld [vmem:[%s3540_s1 + $0xc0] sm:$0xff] }
   0xa   :  { %1899 = vmatpush1.bf16.msra.mxu0 %v1898_v22  ;;  %v60_v37 = vld [vmem:[%s3540_s1 + $0xe8] sm:$0xff]  ;;  %v62_v41 = vld [vmem:[%s3540_s1 + $0xf8] sm:$0xff]  ;;  %v59_v43 = vld [vmem:[%s3540_s1 + $0xe0] sm:$0xff] }
   0xb   :  { %1931 = vmatpush1.bf16.msra.mxu1 %v1930_v26  ;;  %1901 = vmatprep.subr.bf16.mxu0 %v1900_v27  ;;  %v1904_v40 = vpack.c.bf16 %v60_v37, %v56_v36  ;;  %v1936_v44 = vpack.c.bf16 %v62_v41, %v58_v38  ;;  %v57_v45 = vld [vmem:[%s3540_s1 + $0xd0] sm:$0xff]  ;;  %v64_v47 = vld [vmem:[%s3540_s1 + $0x108] sm:$0xff]  ;;  %v66_v49 = vld [vmem:[%s3540_s1 + $0x118] sm:$0xff]  ;;  %v1906_v51 = vpack.c.bf16 %v59_v43, %v55_v42 }
   0xc   :  { %1933 = vmatprep.subr.bf16.mxu1 %v1932_v31  ;;  %v61_v46 = vld [vmem:[%s3540_s1 + $0xf0] sm:$0xff]  ;;  %v68_v48 = vld [vmem:[%s3540_s1 + $0x128] sm:$0xff]  ;;  %v70_v50 = vld [vmem:[%s3540_s1 + $0x138] sm:$0xff] }
   0xd   :  { %v1938_v52 = vpack.c.bf16 %v61_v46, %v57_v45  ;;  %v1908_v53 = vpack.c.bf16 %v68_v48, %v64_v47  ;;  %v63_v54 = vld [vmem:[%s3540_s1 + $0x100] sm:$0xff]  ;;  %v65_v56 = vld [vmem:[%s3540_s1 + $0x110] sm:$0xff]  ;;  %v1940_v57 = vpack.c.bf16 %v70_v50, %v66_v49  ;;  %v72_v59 = vld [vmem:[%s3540_s1 + $0x148] sm:$0xff] }
   0xe   :  { %1903 = vmatpush1.bf16.msra.mxu0 %v1902_v35  ;;  %v67_v55 = vld [vmem:[%s3540_s1 + $0x120] sm:$0xff]  ;;  %v69_v58 = vld [vmem:[%s3540_s1 + $0x130] sm:$0xff]  ;;  %v76_v60 = vld [vmem:[%s3540_s1 + $0x168] sm:$0xff] }
   0xf   :  { %1935 = vmatpush1.bf16.msra.mxu1 %v1934_v39  ;;  %1905 = vmatprep.subr.bf16.mxu0 %v1904_v40  ;;  %v74_v61 = vld [vmem:[%s3540_s1 + $0x158] sm:$0xff]  ;;  %v1910_v63 = vpack.c.bf16 %v67_v55, %v63_v54  ;;  %v1942_v0 = vpack.c.bf16 %v69_v58, %v65_v56  ;;  %v1912_v1 = vpack.c.bf16 %v76_v60, %v72_v59  ;;  %v71_v2 = vld [vmem:[%s3540_s1 + $0x140] sm:$0xff]  ;;  %v73_v5 = vld [vmem:[%s3540_s1 + $0x150] sm:$0xff] }
  0x10   :  { %1937 = vmatprep.subr.bf16.mxu1 %v1936_v44  ;;  %v78_v62 = vld [vmem:[%s3540_s1 + $0x178] sm:$0xff]  ;;  %v75_v4 = vld [vmem:[%s3540_s1 + $0x160] sm:$0xff]  ;;  %v77_v7 = vld [vmem:[%s3540_s1 + $0x170] sm:$0xff] }
  0x11   :  { %v1944_v6 = vpack.c.bf16 %v78_v62, %v74_v61  ;;  %v80_v8 = vld [vmem:[%s3540_s1 + $0x188] sm:$0xff]  ;;  %v82_v10 = vld [vmem:[%s3540_s1 + $0x198] sm:$0xff]  ;;  %v1914_v12 = vpack.c.bf16 %v75_v4, %v71_v2  ;;  %v1946_v13 = vpack.c.bf16 %v77_v7, %v73_v5  ;;  %v79_v15 = vld [vmem:[%s3540_s1 + $0x180] sm:$0xff] }
  0x12   :  { %1907 = vmatpush1.bf16.msra.mxu0 %v1906_v51  ;;  %v84_v9 = vld [vmem:[%s3540_s1 + $0x1a8] sm:$0xff]  ;;  %v86_v11 = vld [vmem:[%s3540_s1 + $0x1b8] sm:$0xff]  ;;  %v83_v16 = vld [vmem:[%s3540_s1 + $0x1a0] sm:$0xff] }
  0x13   :  { %1939 = vmatpush1.bf16.msra.mxu1 %v1938_v52  ;;  %1909 = vmatprep.subr.bf16.mxu0 %v1908_v53  ;;  %v1916_v14 = vpack.c.bf16 %v84_v9, %v80_v8  ;;  %v81_v17 = vld [vmem:[%s3540_s1 + $0x190] sm:$0xff]  ;;  %v1948_v18 = vpack.c.bf16 %v86_v11, %v82_v10  ;;  %v88_v20 = vld [vmem:[%s3540_s1 + $0x1c8] sm:$0xff]  ;;  %v90_v22 = vld [vmem:[%s3540_s1 + $0x1d8] sm:$0xff]  ;;  %v1918_v24 = vpack.c.bf16 %v83_v16, %v79_v15 }
  0x14   :  { %1941 = vmatprep.subr.bf16.mxu1 %v1940_v57  ;;  %v85_v19 = vld [vmem:[%s3540_s1 + $0x1b0] sm:$0xff]  ;;  %v92_v21 = vld [vmem:[%s3540_s1 + $0x1e8] sm:$0xff]  ;;  %v94_v23 = vld [vmem:[%s3540_s1 + $0x1f8] sm:$0xff] }
  0x15   :  { %v1950_v25 = vpack.c.bf16 %v85_v19, %v81_v17  ;;  %v1920_v26 = vpack.c.bf16 %v92_v21, %v88_v20  ;;  %v87_v27 = vld [vmem:[%s3540_s1 + $0x1c0] sm:$0xff]  ;;  %v89_v29 = vld [vmem:[%s3540_s1 + $0x1d0] sm:$0xff]  ;;  %v1952_v30 = vpack.c.bf16 %v94_v23, %v90_v22  ;;  %v376_v32 = vld [vmem:[%s3541_s2 + $0x8] sm:$0xff] }
  0x16   :  { %1911 = vmatpush1.bf16.msra.mxu0 %v1910_v63  ;;  %v91_v28 = vld [vmem:[%s3540_s1 + $0x1e0] sm:$0xff]  ;;  %v93_v31 = vld [vmem:[%s3540_s1 + $0x1f0] sm:$0xff]  ;;  %v380_v33 = vld [vmem:[%s3541_s2 + $0x28] sm:$0xff] }
  0x17   :  { %1943 = vmatpush1.bf16.msra.mxu1 %v1942_v0  ;;  %1913 = vmatprep.subr.bf16.mxu0 %v1912_v1  ;;  %v378_v34 = vld [vmem:[%s3541_s2 + $0x18] sm:$0xff]  ;;  %v1922_v36 = vpack.c.bf16 %v91_v28, %v87_v27  ;;  %v1954_v37 = vpack.c.bf16 %v93_v31, %v89_v29  ;;  %v2893_v38 = vpack.c.bf16 %v380_v33, %v376_v32  ;;  %v375_v39 = vld [vmem:[%s3541_s2] sm:$0xff]  ;;  %v377_v42 = vld [vmem:[%s3541_s2 + $0x10] sm:$0xff] }
  0x18   :  { %1945 = vmatprep.subr.bf16.mxu1 %v1944_v6  ;;  %v382_v35 = vld [vmem:[%s3541_s2 + $0x38] sm:$0xff]  ;;  %v379_v40 = vld [vmem:[%s3541_s2 + $0x20] sm:$0xff]  ;;  %v381_v43 = vld [vmem:[%s3541_s2 + $0x30] sm:$0xff] }
  0x19   :  { %v2901_v41 = vpack.c.bf16 %v382_v35, %v378_v34  ;;  %v384_v44 = vld [vmem:[%s3541_s2 + $0x48] sm:$0xff]  ;;  %v23_v46 = vld [vmem:[%s3542_s0] sm:$0xff]  ;;  %v2918_v47 = vpack.c.bf16 %v379_v40, %v375_v39  ;;  %v386_v48 = vld [vmem:[%s3541_s2 + $0x58] sm:$0xff]  ;;  %v2927_v50 = vpack.c.bf16 %v381_v43, %v377_v42 }
  0x1a   :  { %1915 = vmatpush1.bf16.msra.mxu0 %v1914_v12  ;;  %v388_v45 = vld [vmem:[%s3541_s2 + $0x68] sm:$0xff]  ;;  %v390_v49 = vld [vmem:[%s3541_s2 + $0x78] sm:$0xff]  ;;  %v383_v51 = vld [vmem:[%s3541_s2 + $0x40] sm:$0xff] }
  0x1b   :  { %1947 = vmatpush1.bf16.msra.mxu1 %v1946_v13  ;;  %1917 = vmatprep.subr.bf16.mxu0 %v1916_v14  ;;  %v387_v52 = vld [vmem:[%s3541_s2 + $0x60] sm:$0xff]  ;;  %v2936_v53 = vpack.c.bf16 %v388_v45, %v384_v44  ;;  %v385_v54 = vld [vmem:[%s3541_s2 + $0x50] sm:$0xff]  ;;  %v2944_v56 = vpack.c.bf16 %v390_v49, %v386_v48  ;;  %v392_v57 = vld [vmem:[%s3541_s2 + $0x88] sm:$0xff] }
  0x1c   :  { %1949 = vmatprep.subr.bf16.mxu1 %v1948_v18  ;;  %v389_v55 = vld [vmem:[%s3541_s2 + $0x70] sm:$0xff]  ;;  %v396_v58 = vld [vmem:[%s3541_s2 + $0xa8] sm:$0xff]  ;;  %v2956_v60 = vpack.c.bf16 %v387_v52, %v383_v51  ;;  %v394_v61 = vld [vmem:[%s3541_s2 + $0x98] sm:$0xff] }
  0x1d   :  { %v24_v59 = vld [vmem:[%s3542_s0 + $0x8] sm:$0xff]  ;;  %v398_v62 = vld [vmem:[%s3541_s2 + $0xb8] sm:$0xff]  ;;  %v2966_v63 = vpack.c.bf16 %v389_v55, %v385_v54  ;;  %v391_v0 = vld [vmem:[%s3541_s2 + $0x80] sm:$0xff]  ;;  %v2976_v2 = vpack.c.bf16 %v396_v58, %v392_v57 }
  0x1e   :  { %1919 = vmatpush1.bf16.msra.mxu0 %v1918_v24  ;;  %v395_v1 = vld [vmem:[%s3541_s2 + $0xa0] sm:$0xff]  ;;  %v393_v4 = vld [vmem:[%s3541_s2 + $0x90] sm:$0xff]  ;;  %v2985_v6 = vpack.c.bf16 %v398_v62, %v394_v61  ;;  %v400_v7 = vld [vmem:[%s3541_s2 + $0xc8] sm:$0xff] }
  0x1f   :  { %1951 = vmatpush1.bf16.msra.mxu1 %v1950_v25  ;;  %1921 = vmatprep.subr.bf16.mxu0 %v1920_v26  ;;  %v397_v5 = vld [vmem:[%s3541_s2 + $0xb0] sm:$0xff]  ;;  %v404_v8 = vld [vmem:[%s3541_s2 + $0xe8] sm:$0xff]  ;;  %v2997_v10 = vpack.c.bf16 %v395_v1, %v391_v0  ;;  %v402_v11 = vld [vmem:[%s3541_s2 + $0xd8] sm:$0xff] }
  0x20   :  { %1953 = vmatprep.subr.bf16.mxu1 %v1952_v30  ;;  %v25_v9 = vld [vmem:[%s3542_s0 + $0x10] sm:$0xff]  ;;  %v406_v12 = vld [vmem:[%s3541_s2 + $0xf8] sm:$0xff]  ;;  %v3007_v13 = vpack.c.bf16 %v397_v5, %v393_v4  ;;  %v399_v14 = vld [vmem:[%s3541_s2 + $0xc0] sm:$0xff]  ;;  %v3017_v16 = vpack.c.bf16 %v404_v8, %v400_v7 }
  0x21   :  { %v403_v15 = vld [vmem:[%s3541_s2 + $0xe0] sm:$0xff]  ;;  %v401_v17 = vld [vmem:[%s3541_s2 + $0xd0] sm:$0xff]  ;;  %v3026_v19 = vpack.c.bf16 %v406_v12, %v402_v11  ;;  %v408_v20 = vld [vmem:[%s3541_s2 + $0x108] sm:$0xff] }
  0x22   :  { %1923 = vmatpush1.bf16.msra.mxu0 %v1922_v36  ;;  %v405_v18 = vld [vmem:[%s3541_s2 + $0xf0] sm:$0xff]  ;;  %v412_v21 = vld [vmem:[%s3541_s2 + $0x128] sm:$0xff]  ;;  %v26_v22 = vld [vmem:[%s3542_s0 + $0x18] sm:$0xff]  ;;  %v3038_v23 = vpack.c.bf16 %v403_v15, %v399_v14 }
  0x23   :  { %1955 = vmatpush1.bf16.msra.mxu1 %v1954_v37  ;;  %1957 = vmatprep.subr.bf16.mxu0 %v2893_v38  ;;  %v410_v24 = vld [vmem:[%s3541_s2 + $0x118] sm:$0xff]  ;;  %v3048_v26 = vpack.c.bf16 %v405_v18, %v401_v17  ;;  %v407_v27 = vld [vmem:[%s3541_s2 + $0x100] sm:$0xff]  ;;  %v3058_v29 = vpack.c.bf16 %v412_v21, %v408_v20  ;;  %v409_v30 = vld [vmem:[%s3541_s2 + $0x110] sm:$0xff] }
  0x24   :  { %1989 = vmatprep.subr.bf16.mxu1 %v2901_v41  ;;  %v414_v25 = vld [vmem:[%s3541_s2 + $0x138] sm:$0xff]  ;;  %v411_v28 = vld [vmem:[%s3541_s2 + $0x120] sm:$0xff]  ;;  %v413_v31 = vld [vmem:[%s3541_s2 + $0x130] sm:$0xff] }
  0x25   :  { %182 = vmatmul.mubr.f32.vlgmr.msra.gmra.mrb[0].mxu0 %v23_v46  ;;  %v3067_v32 = vpack.c.bf16 %v414_v25, %v410_v24  ;;  %v416_v33 = vld [vmem:[%s3541_s2 + $0x148] sm:$0xff]  ;;  %v27_v35 = vld [vmem:[%s3542_s0 + $0x20] sm:$0xff]  ;;  %v3079_v36 = vpack.c.bf16 %v411_v28, %v407_v27  ;;  %v418_v37 = vld [vmem:[%s3541_s2 + $0x158] sm:$0xff]  ;;  %v3089_v40 = vpack.c.bf16 %v413_v31, %v409_v30  ;;  %v97_v28 = vlaneseq }
  0x26   :  { %295 = vmatmul.mubr.f32.vlgmr.msra.gmra.mrb[0].mxu1 %v23_v46  ;;  %1959 = vmatpush1.bf16.msra.mxu0 %v2918_v47  ;;  %v420_v34 = vld [vmem:[%s3541_s2 + $0x168] sm:$0xff]  ;;  %v422_v39 = vld [vmem:[%s3541_s2 + $0x178] sm:$0xff]  ;;  %v415_v42 = vld [vmem:[%s3541_s2 + $0x140] sm:$0xff] }
  0x27   :  { %1991 = vmatpush1.bf16.msra.mxu1 %v2927_v50  ;;  %187 = vmatprep.mubr.f32.mxu0 %v2661_v3  ;;  %v419_v43 = vld [vmem:[%s3541_s2 + $0x160] sm:$0xff]  ;;  %v3099_v44 = vpack.c.bf16 %v420_v34, %v416_v33  ;;  %v417_v45 = vld [vmem:[%s3541_s2 + $0x150] sm:$0xff]  ;;  %v3108_v48 = vpack.c.bf16 %v422_v39, %v418_v37  ;;  %v424_v49 = vld [vmem:[%s3541_s2 + $0x188] sm:$0xff]  ;;  %v98_v30 = vshrl.u32 %v97_v28, 7 }
  0x28   :  { %300 = vmatprep.mubr.f32.mxu1 %v2661_v3  ;;  %1961 = vmatprep.subr.bf16.mxu0 %v2936_v53  ;;  %v421_v46 = vld [vmem:[%s3541_s2 + $0x170] sm:$0xff]  ;;  %v428_v51 = vld [vmem:[%s3541_s2 + $0x1a8] sm:$0xff]  ;;  %v3120_v54 = vpack.c.bf16 %v419_v43, %v415_v42  ;;  %v426_v55 = vld [vmem:[%s3541_s2 + $0x198] sm:$0xff] }
  0x29   :  { %188 = vmatmul.mubr.f32.gmra.mrb[2].mxu0 %v24_v59  ;;  %1993 = vmatprep.subr.bf16.mxu1 %v2944_v56  ;;  %v28_v52 = vld [vmem:[%s3542_s0 + $0x28] sm:$0xff]  ;;  %v430_v57 = vld [vmem:[%s3541_s2 + $0x1b8] sm:$0xff]  ;;  %v3130_v58 = vpack.c.bf16 %v421_v46, %v417_v45  ;;  %v427_v61 = vld [vmem:[%s3541_s2 + $0x1a0] sm:$0xff]  ;;  %v3140_v62 = vpack.c.bf16 %v428_v51, %v424_v49  ;;  %v99_v31 = vsub.s32 0, %v98_v30  ;;  %v103_v34 = vsub.s32 1, %v98_v30 }
  0x2a   :  { %301 = vmatmul.mubr.f32.gmra.mrb[2].mxu1 %v24_v59  ;;  %1963 = vmatpush1.bf16.msra.mxu0 %v2956_v60  ;;  %v423_v59 = vld [vmem:[%s3541_s2 + $0x180] sm:$0xff]  ;;  %v425_v0 = vld [vmem:[%s3541_s2 + $0x190] sm:$0xff]  ;;  %v3149_v4 = vpack.c.bf16 %v430_v57, %v426_v55  ;;  %v432_v5 = vld [vmem:[%s3541_s2 + $0x1c8] sm:$0xff]  ;;  %v111_v42 = vsub.s32 3, %v98_v30 }
  0x2b   :  { %1995 = vmatpush1.bf16.msra.mxu1 %v2966_v63  ;;  %193 = vmatprep.mubr.f32.mxu0 %v2661_v3  ;;  %v429_v1 = vld [vmem:[%s3541_s2 + $0x1b0] sm:$0xff]  ;;  %v436_v7 = vld [vmem:[%s3541_s2 + $0x1e8] sm:$0xff]  ;;  %v434_v11 = vld [vmem:[%s3541_s2 + $0x1d8] sm:$0xff] }
  0x2c   :  { %306 = vmatprep.mubr.f32.mxu1 %v2661_v3  ;;  %1965 = vmatprep.subr.bf16.mxu0 %v2976_v2  ;;  %v29_v8 = vld [vmem:[%s3542_s0 + $0x30] sm:$0xff]  ;;  %v438_v12 = vld [vmem:[%s3541_s2 + $0x1f8] sm:$0xff]  ;;  %v3171_v14 = vpack.c.bf16 %v429_v1, %v425_v0  ;;  %v431_v15 = vld [vmem:[%s3541_s2 + $0x1c0] sm:$0xff]  ;;  %v3181_v18 = vpack.c.bf16 %v436_v7, %v432_v5 }
  0x2d   :  { %194 = vmatmul.mubr.f32.gmra.mrb[4].mxu0 %v25_v9  ;;  %1997 = vmatprep.subr.bf16.mxu1 %v2985_v6  ;;  %v435_v17 = vld [vmem:[%s3541_s2 + $0x1e0] sm:$0xff]  ;;  %v433_v20 = vld [vmem:[%s3541_s2 + $0x1d0] sm:$0xff]  ;;  %v30_v24 = vld [vmem:[%s3542_s0 + $0x38] sm:$0xff] }
  0x2e   :  { %307 = vmatmul.mubr.f32.gmra.mrb[4].mxu1 %v25_v9  ;;  %1967 = vmatpush1.bf16.msra.mxu0 %v2997_v10  ;;  %v3161_v9 = vpack.c.bf16 %v427_v61, %v423_v59  ;;  %v437_v21 = vld [vmem:[%s3541_s2 + $0x1f0] sm:$0xff]  ;;  %v3196_v25 = vpack.c.bf16 %v435_v17, %v431_v15  ;;  %v95_v33 = vld [vmem:[%s3543_s3] sm:$0xf]  ;;  %v107_v59 = vsub.s32 2, %v98_v30 }
  0x2f   :  { %1999 = vmatpush1.bf16.msra.mxu1 %v3007_v13  ;;  %199 = vmatprep.mubr.f32.mxu0 %v2661_v3  ;;  %v3200_v27 = vpack.c.bf16 %v437_v21, %v433_v20  ;;  %v3252_v37 = vrot.slane %v95_v33, %v103_v34  ;;  %v3256_v57 = vrot.slane %v95_v33, %v111_v42 }
  0x30   :  { %312 = vmatprep.mubr.f32.mxu1 %v2661_v3  ;;  %1969 = vmatprep.subr.bf16.mxu0 %v3017_v16  ;;  %v3259_v0 = vrot.slane %v95_v33, %v107_v59 }
  0x31   :  { %200 = vmatmul.mubr.f32.gmra.mrb[6].mxu0 %v26_v22  ;;  %2001 = vmatprep.subr.bf16.mxu1 %v3026_v19 }
  0x32   :  { %313 = vmatmul.mubr.f32.gmra.mrb[6].mxu1 %v26_v22  ;;  %1971 = vmatpush1.bf16.msra.mxu0 %v3038_v23  ;;  %v3190_v22 = vpack.c.bf16 %v438_v12, %v434_v11 }
  0x33   :  { %2003 = vmatpush1.bf16.msra.mxu1 %v3048_v26  ;;  %205 = vmatprep.mubr.f32.mxu0 %v2661_v3 }
  0x34   :  { %318 = vmatprep.mubr.f32.mxu1 %v2661_v3  ;;  %1973 = vmatprep.subr.bf16.mxu0 %v3058_v29 }
  0x35   :  { %206 = vmatmul.mubr.f32.gmra.mrb[8].mxu0 %v27_v35  ;;  %2005 = vmatprep.subr.bf16.mxu1 %v3067_v32 }
  0x36   :  { %319 = vmatmul.mubr.f32.gmra.mrb[8].mxu1 %v27_v35  ;;  %1975 = vmatpush1.bf16.msra.mxu0 %v3079_v36  ;;  %v3250_v35 = vrot.slane %v95_v33, %v99_v31 }
  0x37   :  { %2007 = vmatpush1.bf16.msra.mxu1 %v3089_v40  ;;  %211 = vmatprep.mubr.f32.mxu0 %v2661_v3 }
  0x38   :  { %324 = vmatprep.mubr.f32.mxu1 %v2661_v3  ;;  %1977 = vmatprep.subr.bf16.mxu0 %v3099_v44 }
  0x39   :  { %212 = vmatmul.mubr.f32.gmra.mrb[10].mxu0 %v28_v52  ;;  %2009 = vmatprep.subr.bf16.mxu1 %v3108_v48 }
  0x3a   :  { %325 = vmatmul.mubr.f32.gmra.mrb[10].mxu1 %v28_v52  ;;  %1979 = vmatpush1.bf16.msra.mxu0 %v3120_v54 }
  0x3b   :  { %2011 = vmatpush1.bf16.msra.mxu1 %v3130_v58  ;;  %217 = vmatprep.mubr.f32.mxu0 %v2661_v3 }
  0x3c   :  { %330 = vmatprep.mubr.f32.mxu1 %v2661_v3  ;;  %1981 = vmatprep.subr.bf16.mxu0 %v3140_v62 }
  0x3d   :  { %218 = vmatmul.mubr.f32.gmra.mrb[12].mxu0 %v29_v8  ;;  %2013 = vmatprep.subr.bf16.mxu1 %v3149_v4 }
  0x3e   :  { %331 = vmatmul.mubr.f32.gmra.mrb[12].mxu1 %v29_v8  ;;  %1983 = vmatpush1.bf16.msra.mxu0 %v3161_v9 }
  0x3f   :  { %2015 = vmatpush1.bf16.msra.mxu1 %v3171_v14  ;;  %223 = vmatprep.mubr.f32.mxu0 %v2661_v3 }
  0x40   :  { %336 = vmatprep.mubr.f32.mxu1 %v2661_v3  ;;  %1985 = vmatprep.subr.bf16.mxu0 %v3181_v18 }
  0x41   :  { %224 = vmatmul.mubr.f32.gmra.mrb[14].mxu0 %v30_v24  ;;  %2017 = vmatprep.subr.bf16.mxu1 %v3190_v22 }
  0x42   :  { %337 = vmatmul.mubr.f32.gmra.mrb[14].mxu1 %v30_v24  ;;  %1987 = vmatpush1.bf16.msra.mxu0 %v3196_v25 }
  0x43   :  { %2019 = vmatpush1.bf16.msra.mxu1 %v3200_v27  ;;  %509 = vmatprep.mubr.f32.mxu0 %v2661_v3 }
  0x44   :  { %580 = vmatprep.mubr.f32.mxu1 %v2661_v3  ;;  %2021 = vmatprep.subr.bf16.mxu0 %v2893_v38 }
  0x45   :  { %510 = vmatmul.mubr.f32.vlgmr.msra.gmra.mrb[0].mxu0 %v2661_v3  ;;  %2053 = vmatprep.subr.bf16.mxu1 %v2901_v41 }
  0x46   :  { %581 = vmatmul.mubr.f32.vlgmr.msra.gmra.mrb[0].mxu1 %v2661_v3  ;;  %2023 = vmatpush1.bf16.msra.mxu0 %v2918_v47 }
  0x47   :  { %2055 = vmatpush1.bf16.msra.mxu1 %v2927_v50  ;;  %2025 = vmatprep.subr.bf16.mxu0 %v2936_v53 }
  0x48   :  { %2057 = vmatprep.subr.bf16.mxu1 %v2944_v56  ;;  %685 = vmatprep.mubr.f32.mxu0 %v2661_v3 }
  0x49   :  { %756 = vmatprep.mubr.f32.mxu1 %v2661_v3 }
  0x4a   :  { %2027 = vmatpush1.bf16.msra.mxu0 %v2956_v60 }
  0x4b   :  { %2059 = vmatpush1.bf16.msra.mxu1 %v2966_v63  ;;  %2029 = vmatprep.subr.bf16.mxu0 %v2976_v2 }
  0x4c   :  { %2061 = vmatprep.subr.bf16.mxu1 %v2985_v6 }
  0x4e   :  { %2031 = vmatpush1.bf16.msra.mxu0 %v2997_v10 }
  0x4f   :  { %2063 = vmatpush1.bf16.msra.mxu1 %v3007_v13  ;;  %2033 = vmatprep.subr.bf16.mxu0 %v3017_v16 }
  0x50   :  { %2065 = vmatprep.subr.bf16.mxu1 %v3026_v19 }
  0x52   :  { %2035 = vmatpush1.bf16.msra.mxu0 %v3038_v23 }
  0x53   :  { %2067 = vmatpush1.bf16.msra.mxu1 %v3048_v26  ;;  %2037 = vmatprep.subr.bf16.mxu0 %v3058_v29 }
  0x54   :  { %2069 = vmatprep.subr.bf16.mxu1 %v3067_v32 }
  0x56   :  { %2039 = vmatpush1.bf16.msra.mxu0 %v3079_v36 }
  0x57   :  { %2071 = vmatpush1.bf16.msra.mxu1 %v3089_v40  ;;  %2041 = vmatprep.subr.bf16.mxu0 %v3099_v44 }
  0x58   :  { %2073 = vmatprep.subr.bf16.mxu1 %v3108_v48 }
  0x5a   :  { %2043 = vmatpush1.bf16.msra.mxu0 %v3120_v54 }
  0x5b   :  { %2075 = vmatpush1.bf16.msra.mxu1 %v3130_v58  ;;  %2045 = vmatprep.subr.bf16.mxu0 %v3140_v62 }
  0x5c   :  { %2077 = vmatprep.subr.bf16.mxu1 %v3149_v4 }
  0x5e   :  { %2047 = vmatpush1.bf16.msra.mxu0 %v3161_v9 }
  0x5f   :  { %2079 = vmatpush1.bf16.msra.mxu1 %v3171_v14  ;;  %2049 = vmatprep.subr.bf16.mxu0 %v3181_v18 }
  0x60   :  { %2081 = vmatprep.subr.bf16.mxu1 %v3190_v22 }
  0x62   :  { %2051 = vmatpush1.bf16.msra.mxu0 %v3196_v25 }
  0x63   :  { %2083 = vmatpush1.bf16.msra.mxu1 %v3200_v27  ;;  %2085 = vmatprep.subr.bf16.mxu0 %v2893_v38 }
  0x64   :  { %2117 = vmatprep.subr.bf16.mxu1 %v2901_v41 }
 0x118   :  { %v511_v39 = vpop.f32.mrb[0].mxu0 }
 0x119   :  { %v2468_v43 = vadd.f32 %v511_v39, %v3250_v35  ;;  %v582_v45 = vpop.f32.mrb[0].mxu1  ;;  %v513_v46 = vpop.f32.mrb[1].mxu0 }
 0x11a   :  { %v2469_v49 = vadd.f32 %v513_v46, %v3252_v37  ;;  %v584_v51 = vpop.f32.mrb[1].mxu1  ;;  %v2484_v5 = vadd.f32 %v582_v45, %v3259_v0 }
 0x11b   :  { %v1861_v52 = vmul.f32 -1.442695, %v2468_v43  ;;  %v2485_v61 = vadd.f32 %v584_v51, %v3256_v57 }
 0x11c   :  { %v1862_v55 = vmul.f32 -1.442695, %v2469_v49 }
 0x11d   :  { %2533 = vpow2.f32 %v1861_v52  ;;  %v1863_v1 = vmul.f32 -1.442695, %v2485_v61 }
 0x11e   :  { %2535 = vpow2.f32 %v1862_v55 }
 0x11f   :  { %2537 = vpow2.f32 %v1863_v1 }
 0x120   :  { %2539 = vtanh.f32 %v2484_v5 }
 0x127   :  { %v2534_v7 = vpop.eup %2533 }
 0x128   :  { %v2536_v8 = vpop.eup %2535  ;;  %v594_v11 = vadd.f32 1.0, %v2534_v7 }
 0x129   :  { %v600_v12 = vadd.f32 1.0, %v2536_v8  ;;  %v2538_v15 = vpop.eup %2537 }
 0x12a   :  { %2541 = vrcp.f32 %v594_v11  ;;  %v2540_v17 = vpop.eup %2539  ;;  %v607_v28 = vadd.f32 1.0, %v2538_v15 }
 0x12b   :  { %2543 = vrcp.f32 %v600_v12 }
 0x12c   :  { %2545 = vrcp.f32 %v607_v28 }
 0x134   :  { %v2542_v20 = vpop.eup %2541 }
 0x135   :  { %v2544_v21 = vpop.eup %2543  ;;  %v611_v24 = vmul.f32 %v2542_v20, %v2540_v17 }
 0x136   :  { %v610_v30 = vmul.f32 0.0, %v2544_v21  ;;  %v2546_v33 = vpop.eup %2545 }
 0x138   :  { %v3262_v31 = vadd.f32 %v611_v24, %v610_v30 }
 0x13a   :  { %2547 = vtanh.f32 %v3262_v31 }
 0x144   :  { %v2548_v34 = vpop.eup %2547 }
 0x145   :  { %v614_v39 = vmul.f32 %v2548_v34, %v2546_v33 }
 0x147   :  { %615 = vst [vmem:[%s3544_s4] sm:$0xff] %v614_v39  ;;  %686 = vmatmul.mubr.f32.vlgmr.msra.gmra.mrb[2].mxu0 %v614_v39  ;;  %757 = vmatmul.mubr.f32.vlgmr.msra.gmra.mrb[2].mxu1 %v614_v39 }
 0x148   :  { %2087 = vmatpush1.bf16.msra.mxu0 %v2918_v47  ;;  %2119 = vmatpush1.bf16.msra.mxu1 %v2927_v50 }
 0x149   :  { %2089 = vmatprep.subr.bf16.mxu0 %v2936_v53  ;;  %2121 = vmatprep.subr.bf16.mxu1 %v2944_v56 }
 0x14a   :  { %862 = vmatprep.mubr.f32.mxu0 %v2661_v3  ;;  %933 = vmatprep.mubr.f32.mxu1 %v2661_v3 }
 0x14c   :  { %2091 = vmatpush1.bf16.msra.mxu0 %v2956_v60  ;;  %2123 = vmatpush1.bf16.msra.mxu1 %v2966_v63 }
 0x14d   :  { %2093 = vmatprep.subr.bf16.mxu0 %v2976_v2  ;;  %2125 = vmatprep.subr.bf16.mxu1 %v2985_v6 }
 0x150   :  { %2095 = vmatpush1.bf16.msra.mxu0 %v2997_v10  ;;  %2127 = vmatpush1.bf16.msra.mxu1 %v3007_v13 }
 0x151   :  { %2097 = vmatprep.subr.bf16.mxu0 %v3017_v16  ;;  %2129 = vmatprep.subr.bf16.mxu1 %v3026_v19 }
 0x154   :  { %2099 = vmatpush1.bf16.msra.mxu0 %v3038_v23  ;;  %2131 = vmatpush1.bf16.msra.mxu1 %v3048_v26 }
 0x155   :  { %2101 = vmatprep.subr.bf16.mxu0 %v3058_v29  ;;  %2133 = vmatprep.subr.bf16.mxu1 %v3067_v32 }
 0x158   :  { %2103 = vmatpush1.bf16.msra.mxu0 %v3079_v36  ;;  %2135 = vmatpush1.bf16.msra.mxu1 %v3089_v40 }
 0x159   :  { %2105 = vmatprep.subr.bf16.mxu0 %v3099_v44  ;;  %2137 = vmatprep.subr.bf16.mxu1 %v3108_v48 }
 0x15c   :  { %2107 = vmatpush1.bf16.msra.mxu0 %v3120_v54  ;;  %2139 = vmatpush1.bf16.msra.mxu1 %v3130_v58 }
 0x15d   :  { %2109 = vmatprep.subr.bf16.mxu0 %v3140_v62  ;;  %2141 = vmatprep.subr.bf16.mxu1 %v3149_v4 }
 0x160   :  { %2111 = vmatpush1.bf16.msra.mxu0 %v3161_v9  ;;  %2143 = vmatpush1.bf16.msra.mxu1 %v3171_v14 }
 0x161   :  { %2113 = vmatprep.subr.bf16.mxu0 %v3181_v18  ;;  %2145 = vmatprep.subr.bf16.mxu1 %v3190_v22 }
 0x164   :  { %2115 = vmatpush1.bf16.msra.mxu0 %v3196_v25  ;;  %2147 = vmatpush1.bf16.msra.mxu1 %v3200_v27 }
 0x165   :  { %2149 = vmatprep.subr.bf16.mxu0 %v2893_v38  ;;  %2181 = vmatprep.subr.bf16.mxu1 %v2901_v41 }
 0x21a   :  { %v687_v42 = vpop.f32.mrb[2].mxu0  ;;  %v758_v43 = vpop.f32.mrb[2].mxu1 }
 0x21b   :  { %v2470_v45 = vadd.f32 %v687_v42, %v3250_v35  ;;  %v689_v46 = vpop.f32.mrb[3].mxu0  ;;  %v760_v49 = vpop.f32.mrb[3].mxu1  ;;  %v2486_v1 = vadd.f32 %v758_v43, %v3259_v0 }
 0x21c   :  { %v2471_v51 = vadd.f32 %v689_v46, %v3252_v37  ;;  %v2487_v59 = vadd.f32 %v760_v49, %v3256_v57 }
 0x21d   :  { %v1864_v52 = vmul.f32 -1.442695, %v2470_v45 }
 0x21e   :  { %v1865_v55 = vmul.f32 -1.442695, %v2471_v51  ;;  %v1866_v61 = vmul.f32 -1.442695, %v2487_v59 }
 0x21f   :  { %2549 = vpow2.f32 %v1864_v52 }
 0x220   :  { %2551 = vpow2.f32 %v1865_v55 }
 0x221   :  { %2553 = vpow2.f32 %v1866_v61 }
 0x222   :  { %2555 = vtanh.f32 %v2486_v1 }
 0x229   :  { %v2550_v5 = vpop.eup %2549 }
 0x22a   :  { %v2552_v7 = vpop.eup %2551  ;;  %v770_v8 = vadd.f32 1.0, %v2550_v5 }
 0x22b   :  { %v776_v11 = vadd.f32 1.0, %v2552_v7  ;;  %v2554_v12 = vpop.eup %2553 }
 0x22c   :  { %2557 = vrcp.f32 %v770_v8  ;;  %v2556_v15 = vpop.eup %2555  ;;  %v783_v24 = vadd.f32 1.0, %v2554_v12 }
 0x22d   :  { %2559 = vrcp.f32 %v776_v11 }
 0x22e   :  { %2561 = vrcp.f32 %v783_v24 }
 0x236   :  { %v2558_v17 = vpop.eup %2557 }
 0x237   :  { %v2560_v20 = vpop.eup %2559  ;;  %v787_v21 = vmul.f32 %v2558_v17, %v2556_v15 }
 0x238   :  { %v786_v28 = vmul.f32 %v2560_v20, %v3262_v31  ;;  %v2562_v33 = vpop.eup %2561 }
 0x23a   :  { %v3307_v30 = vadd.f32 %v787_v21, %v786_v28 }
 0x23c   :  { %2563 = vtanh.f32 %v3307_v30 }
 0x246   :  { %v2564_v34 = vpop.eup %2563 }
 0x247   :  { %v790_v39 = vmul.f32 %v2564_v34, %v2562_v33 }
 0x249   :  { %1867 = vst [vmem:[%s3544_s4 + $0x8] sm:$0xff] %v790_v39  ;;  %863 = vmatmul.mubr.f32.vlgmr.msra.gmra.mrb[4].mxu0 %v790_v39  ;;  %934 = vmatmul.mubr.f32.vlgmr.msra.gmra.mrb[4].mxu1 %v790_v39 }
 0x24a   :  { %2151 = vmatpush1.bf16.msra.mxu0 %v2918_v47  ;;  %2183 = vmatpush1.bf16.msra.mxu1 %v2927_v50 }
 0x24b   :  { %2153 = vmatprep.subr.bf16.mxu0 %v2936_v53  ;;  %2185 = vmatprep.subr.bf16.mxu1 %v2944_v56 }
 0x24c   :  { %1039 = vmatprep.mubr.f32.mxu0 %v2661_v3  ;;  %1110 = vmatprep.mubr.f32.mxu1 %v2661_v3 }
 0x24e   :  { %2155 = vmatpush1.bf16.msra.mxu0 %v2956_v60  ;;  %2187 = vmatpush1.bf16.msra.mxu1 %v2966_v63 }
 0x24f   :  { %2157 = vmatprep.subr.bf16.mxu0 %v2976_v2  ;;  %2189 = vmatprep.subr.bf16.mxu1 %v2985_v6 }
 0x252   :  { %2159 = vmatpush1.bf16.msra.mxu0 %v2997_v10  ;;  %2191 = vmatpush1.bf16.msra.mxu1 %v3007_v13 }
 0x253   :  { %2161 = vmatprep.subr.bf16.mxu0 %v3017_v16  ;;  %2193 = vmatprep.subr.bf16.mxu1 %v3026_v19 }
 0x256   :  { %2163 = vmatpush1.bf16.msra.mxu0 %v3038_v23  ;;  %2195 = vmatpush1.bf16.msra.mxu1 %v3048_v26 }
 0x257   :  { %2165 = vmatprep.subr.bf16.mxu0 %v3058_v29  ;;  %2197 = vmatprep.subr.bf16.mxu1 %v3067_v32 }
 0x25a   :  { %2167 = vmatpush1.bf16.msra.mxu0 %v3079_v36  ;;  %2199 = vmatpush1.bf16.msra.mxu1 %v3089_v40 }
 0x25b   :  { %2169 = vmatprep.subr.bf16.mxu0 %v3099_v44  ;;  %2201 = vmatprep.subr.bf16.mxu1 %v3108_v48 }
 0x25e   :  { %2171 = vmatpush1.bf16.msra.mxu0 %v3120_v54  ;;  %2203 = vmatpush1.bf16.msra.mxu1 %v3130_v58 }
 0x25f   :  { %2173 = vmatprep.subr.bf16.mxu0 %v3140_v62  ;;  %2205 = vmatprep.subr.bf16.mxu1 %v3149_v4 }
 0x262   :  { %2175 = vmatpush1.bf16.msra.mxu0 %v3161_v9  ;;  %2207 = vmatpush1.bf16.msra.mxu1 %v3171_v14 }
 0x263   :  { %2177 = vmatprep.subr.bf16.mxu0 %v3181_v18  ;;  %2209 = vmatprep.subr.bf16.mxu1 %v3190_v22 }
 0x266   :  { %2179 = vmatpush1.bf16.msra.mxu0 %v3196_v25  ;;  %2211 = vmatpush1.bf16.msra.mxu1 %v3200_v27 }
 0x267   :  { %2213 = vmatprep.subr.bf16.mxu0 %v2893_v38  ;;  %2245 = vmatprep.subr.bf16.mxu1 %v2901_v41 }
 0x31c   :  { %v864_v31 = vpop.f32.mrb[4].mxu0  ;;  %v935_v42 = vpop.f32.mrb[4].mxu1 }
 0x31d   :  { %v2472_v43 = vadd.f32 %v864_v31, %v3250_v35  ;;  %v866_v45 = vpop.f32.mrb[5].mxu0  ;;  %v937_v46 = vpop.f32.mrb[5].mxu1  ;;  %v2488_v61 = vadd.f32 %v935_v42, %v3259_v0 }
 0x31e   :  { %v2473_v49 = vadd.f32 %v866_v45, %v3252_v37  ;;  %v2489_v55 = vadd.f32 %v937_v46, %v3256_v57 }
 0x31f   :  { %v1868_v51 = vmul.f32 -1.442695, %v2472_v43 }
 0x320   :  { %v1869_v52 = vmul.f32 -1.442695, %v2473_v49  ;;  %v1870_v59 = vmul.f32 -1.442695, %v2489_v55 }
 0x321   :  { %2565 = vpow2.f32 %v1868_v51 }
 0x322   :  { %2567 = vpow2.f32 %v1869_v52 }
 0x323   :  { %2569 = vpow2.f32 %v1870_v59 }
 0x324   :  { %2571 = vtanh.f32 %v2488_v61 }
 0x32b   :  { %v2566_v1 = vpop.eup %2565 }
 0x32c   :  { %v2568_v5 = vpop.eup %2567  ;;  %v947_v7 = vadd.f32 1.0, %v2566_v1 }
 0x32d   :  { %v953_v8 = vadd.f32 1.0, %v2568_v5  ;;  %v2570_v11 = vpop.eup %2569 }
 0x32e   :  { %2573 = vrcp.f32 %v947_v7  ;;  %v2572_v12 = vpop.eup %2571  ;;  %v960_v21 = vadd.f32 1.0, %v2570_v11 }
 0x32f   :  { %2575 = vrcp.f32 %v953_v8 }
 0x330   :  { %2577 = vrcp.f32 %v960_v21 }
 0x338   :  { %v2574_v15 = vpop.eup %2573 }
 0x339   :  { %v2576_v17 = vpop.eup %2575  ;;  %v964_v20 = vmul.f32 %v2574_v15, %v2572_v12 }
 0x33a   :  { %v963_v24 = vmul.f32 %v2576_v17, %v3307_v30  ;;  %v2578_v33 = vpop.eup %2577 }
 0x33c   :  { %v3352_v28 = vadd.f32 %v964_v20, %v963_v24 }
 0x33e   :  { %2579 = vtanh.f32 %v3352_v28 }
 0x348   :  { %v2580_v34 = vpop.eup %2579 }
 0x349   :  { %v967_v39 = vmul.f32 %v2580_v34, %v2578_v33 }
 0x34b   :  { %1871 = vst [vmem:[%s3544_s4 + $0x10] sm:$0xff] %v967_v39  ;;  %1040 = vmatmul.mubr.f32.vlgmr.msra.gmra.mrb[6].mxu0 %v967_v39  ;;  %1111 = vmatmul.mubr.f32.vlgmr.msra.gmra.mrb[6].mxu1 %v967_v39 }
 0x34c   :  { %2215 = vmatpush1.bf16.msra.mxu0 %v2918_v47  ;;  %2247 = vmatpush1.bf16.msra.mxu1 %v2927_v50 }
 0x34d   :  { %2217 = vmatprep.subr.bf16.mxu0 %v2936_v53  ;;  %2249 = vmatprep.subr.bf16.mxu1 %v2944_v56 }
 0x34e   :  { %1216 = vmatprep.mubr.f32.mxu0 %v2661_v3  ;;  %1287 = vmatprep.mubr.f32.mxu1 %v2661_v3 }
 0x350   :  { %2219 = vmatpush1.bf16.msra.mxu0 %v2956_v60  ;;  %2251 = vmatpush1.bf16.msra.mxu1 %v2966_v63 }
 0x351   :  { %2221 = vmatprep.subr.bf16.mxu0 %v2976_v2  ;;  %2253 = vmatprep.subr.bf16.mxu1 %v2985_v6 }
 0x354   :  { %2223 = vmatpush1.bf16.msra.mxu0 %v2997_v10  ;;  %2255 = vmatpush1.bf16.msra.mxu1 %v3007_v13 }
 0x355   :  { %2225 = vmatprep.subr.bf16.mxu0 %v3017_v16  ;;  %2257 = vmatprep.subr.bf16.mxu1 %v3026_v19 }
 0x358   :  { %2227 = vmatpush1.bf16.msra.mxu0 %v3038_v23  ;;  %2259 = vmatpush1.bf16.msra.mxu1 %v3048_v26 }
 0x359   :  { %2229 = vmatprep.subr.bf16.mxu0 %v3058_v29  ;;  %2261 = vmatprep.subr.bf16.mxu1 %v3067_v32 }
 0x35c   :  { %2231 = vmatpush1.bf16.msra.mxu0 %v3079_v36  ;;  %2263 = vmatpush1.bf16.msra.mxu1 %v3089_v40 }
 0x35d   :  { %2233 = vmatprep.subr.bf16.mxu0 %v3099_v44  ;;  %2265 = vmatprep.subr.bf16.mxu1 %v3108_v48 }
 0x360   :  { %2235 = vmatpush1.bf16.msra.mxu0 %v3120_v54  ;;  %2267 = vmatpush1.bf16.msra.mxu1 %v3130_v58 }
 0x361   :  { %2237 = vmatprep.subr.bf16.mxu0 %v3140_v62  ;;  %2269 = vmatprep.subr.bf16.mxu1 %v3149_v4 }
 0x364   :  { %2239 = vmatpush1.bf16.msra.mxu0 %v3161_v9  ;;  %2271 = vmatpush1.bf16.msra.mxu1 %v3171_v14 }
 0x365   :  { %2241 = vmatprep.subr.bf16.mxu0 %v3181_v18  ;;  %2273 = vmatprep.subr.bf16.mxu1 %v3190_v22 }
 0x368   :  { %2243 = vmatpush1.bf16.msra.mxu0 %v3196_v25  ;;  %2275 = vmatpush1.bf16.msra.mxu1 %v3200_v27 }
 0x369   :  { %2277 = vmatprep.subr.bf16.mxu0 %v2893_v38  ;;  %2309 = vmatprep.subr.bf16.mxu1 %v2901_v41 }
 0x41e   :  { %v1041_v30 = vpop.f32.mrb[6].mxu0  ;;  %v1112_v31 = vpop.f32.mrb[6].mxu1 }
 0x41f   :  { %v2474_v42 = vadd.f32 %v1041_v30, %v3250_v35  ;;  %v1043_v43 = vpop.f32.mrb[7].mxu0  ;;  %v1114_v45 = vpop.f32.mrb[7].mxu1  ;;  %v2490_v59 = vadd.f32 %v1112_v31, %v3259_v0 }
 0x420   :  { %v2475_v46 = vadd.f32 %v1043_v43, %v3252_v37  ;;  %v2491_v52 = vadd.f32 %v1114_v45, %v3256_v57 }
 0x421   :  { %v1872_v49 = vmul.f32 -1.442695, %v2474_v42 }
 0x422   :  { %v1873_v51 = vmul.f32 -1.442695, %v2475_v46  ;;  %v1874_v55 = vmul.f32 -1.442695, %v2491_v52 }
 0x423   :  { %2581 = vpow2.f32 %v1872_v49 }
 0x424   :  { %2583 = vpow2.f32 %v1873_v51 }
 0x425   :  { %2585 = vpow2.f32 %v1874_v55 }
 0x426   :  { %2587 = vtanh.f32 %v2490_v59 }
 0x42d   :  { %v2582_v61 = vpop.eup %2581 }
 0x42e   :  { %v2584_v1 = vpop.eup %2583  ;;  %v1124_v5 = vadd.f32 1.0, %v2582_v61 }
 0x42f   :  { %v1130_v7 = vadd.f32 1.0, %v2584_v1  ;;  %v2586_v8 = vpop.eup %2585 }
 0x430   :  { %2589 = vrcp.f32 %v1124_v5  ;;  %v2588_v11 = vpop.eup %2587  ;;  %v1137_v20 = vadd.f32 1.0, %v2586_v8 }
 0x431   :  { %2591 = vrcp.f32 %v1130_v7 }
 0x432   :  { %2593 = vrcp.f32 %v1137_v20 }
 0x43a   :  { %v2590_v12 = vpop.eup %2589 }
 0x43b   :  { %v2592_v15 = vpop.eup %2591  ;;  %v1141_v17 = vmul.f32 %v2590_v12, %v2588_v11 }
 0x43c   :  { %v1140_v21 = vmul.f32 %v2592_v15, %v3352_v28  ;;  %v2594_v33 = vpop.eup %2593 }
 0x43e   :  { %v3397_v24 = vadd.f32 %v1141_v17, %v1140_v21 }
 0x440   :  { %2595 = vtanh.f32 %v3397_v24 }
 0x44a   :  { %v2596_v34 = vpop.eup %2595 }
 0x44b   :  { %v1144_v39 = vmul.f32 %v2596_v34, %v2594_v33 }
 0x44d   :  { %1875 = vst [vmem:[%s3544_s4 + $0x18] sm:$0xff] %v1144_v39  ;;  %1217 = vmatmul.mubr.f32.vlgmr.msra.gmra.mrb[8].mxu0 %v1144_v39  ;;  %1288 = vmatmul.mubr.f32.vlgmr.msra.gmra.mrb[8].mxu1 %v1144_v39 }
 0x44e   :  { %2279 = vmatpush1.bf16.msra.mxu0 %v2918_v47  ;;  %2311 = vmatpush1.bf16.msra.mxu1 %v2927_v50 }
 0x44f   :  { %2281 = vmatprep.subr.bf16.mxu0 %v2936_v53  ;;  %2313 = vmatprep.subr.bf16.mxu1 %v2944_v56 }
 0x450   :  { %1393 = vmatprep.mubr.f32.mxu0 %v2661_v3  ;;  %1464 = vmatprep.mubr.f32.mxu1 %v2661_v3 }
 0x452   :  { %2283 = vmatpush1.bf16.msra.mxu0 %v2956_v60  ;;  %2315 = vmatpush1.bf16.msra.mxu1 %v2966_v63 }
 0x453   :  { %2285 = vmatprep.subr.bf16.mxu0 %v2976_v2  ;;  %2317 = vmatprep.subr.bf16.mxu1 %v2985_v6 }
 0x456   :  { %2287 = vmatpush1.bf16.msra.mxu0 %v2997_v10  ;;  %2319 = vmatpush1.bf16.msra.mxu1 %v3007_v13 }
 0x457   :  { %2289 = vmatprep.subr.bf16.mxu0 %v3017_v16  ;;  %2321 = vmatprep.subr.bf16.mxu1 %v3026_v19 }
 0x45a   :  { %2291 = vmatpush1.bf16.msra.mxu0 %v3038_v23  ;;  %2323 = vmatpush1.bf16.msra.mxu1 %v3048_v26 }
 0x45b   :  { %2293 = vmatprep.subr.bf16.mxu0 %v3058_v29  ;;  %2325 = vmatprep.subr.bf16.mxu1 %v3067_v32 }
 0x45e   :  { %2295 = vmatpush1.bf16.msra.mxu0 %v3079_v36  ;;  %2327 = vmatpush1.bf16.msra.mxu1 %v3089_v40 }
 0x45f   :  { %2297 = vmatprep.subr.bf16.mxu0 %v3099_v44  ;;  %2329 = vmatprep.subr.bf16.mxu1 %v3108_v48 }
 0x462   :  { %2299 = vmatpush1.bf16.msra.mxu0 %v3120_v54  ;;  %2331 = vmatpush1.bf16.msra.mxu1 %v3130_v58 }
 0x463   :  { %2301 = vmatprep.subr.bf16.mxu0 %v3140_v62  ;;  %2333 = vmatprep.subr.bf16.mxu1 %v3149_v4 }
 0x466   :  { %2303 = vmatpush1.bf16.msra.mxu0 %v3161_v9  ;;  %2335 = vmatpush1.bf16.msra.mxu1 %v3171_v14 }
 0x467   :  { %2305 = vmatprep.subr.bf16.mxu0 %v3181_v18  ;;  %2337 = vmatprep.subr.bf16.mxu1 %v3190_v22 }
 0x46a   :  { %2307 = vmatpush1.bf16.msra.mxu0 %v3196_v25  ;;  %2339 = vmatpush1.bf16.msra.mxu1 %v3200_v27 }
 0x46b   :  { %2341 = vmatprep.subr.bf16.mxu0 %v2893_v38  ;;  %2373 = vmatprep.subr.bf16.mxu1 %v2901_v41 }
 0x520   :  { %v1218_v28 = vpop.f32.mrb[8].mxu0  ;;  %v1289_v30 = vpop.f32.mrb[8].mxu1 }
 0x521   :  { %v2476_v31 = vadd.f32 %v1218_v28, %v3250_v35  ;;  %v1220_v42 = vpop.f32.mrb[9].mxu0  ;;  %v1291_v43 = vpop.f32.mrb[9].mxu1  ;;  %v2492_v55 = vadd.f32 %v1289_v30, %v3259_v0 }
 0x522   :  { %v2477_v45 = vadd.f32 %v1220_v42, %v3252_v37  ;;  %v2493_v51 = vadd.f32 %v1291_v43, %v3256_v57 }
 0x523   :  { %v1876_v46 = vmul.f32 -1.442695, %v2476_v31 }
 0x524   :  { %v1877_v49 = vmul.f32 -1.442695, %v2477_v45  ;;  %v1878_v52 = vmul.f32 -1.442695, %v2493_v51 }
 0x525   :  { %2597 = vpow2.f32 %v1876_v46 }
 0x526   :  { %2599 = vpow2.f32 %v1877_v49 }
 0x527   :  { %2601 = vpow2.f32 %v1878_v52 }
 0x528   :  { %2603 = vtanh.f32 %v2492_v55 }
 0x52f   :  { %v2598_v59 = vpop.eup %2597 }
 0x530   :  { %v2600_v61 = vpop.eup %2599  ;;  %v1301_v1 = vadd.f32 1.0, %v2598_v59 }
 0x531   :  { %v1307_v5 = vadd.f32 1.0, %v2600_v61  ;;  %v2602_v7 = vpop.eup %2601 }
 0x532   :  { %2605 = vrcp.f32 %v1301_v1  ;;  %v2604_v8 = vpop.eup %2603  ;;  %v1314_v17 = vadd.f32 1.0, %v2602_v7 }
 0x533   :  { %2607 = vrcp.f32 %v1307_v5 }
 0x534   :  { %2609 = vrcp.f32 %v1314_v17 }
 0x53c   :  { %v2606_v11 = vpop.eup %2605 }
 0x53d   :  { %v2608_v12 = vpop.eup %2607  ;;  %v1318_v15 = vmul.f32 %v2606_v11, %v2604_v8 }
 0x53e   :  { %v1317_v20 = vmul.f32 %v2608_v12, %v3397_v24  ;;  %v2610_v33 = vpop.eup %2609 }
 0x540   :  { %v3442_v21 = vadd.f32 %v1318_v15, %v1317_v20 }
 0x542   :  { %2611 = vtanh.f32 %v3442_v21 }
 0x54c   :  { %v2612_v34 = vpop.eup %2611 }
 0x54d   :  { %v1321_v39 = vmul.f32 %v2612_v34, %v2610_v33 }
 0x54f   :  { %1879 = vst [vmem:[%s3544_s4 + $0x20] sm:$0xff] %v1321_v39  ;;  %1394 = vmatmul.mubr.f32.vlgmr.msra.gmra.mrb[10].mxu0 %v1321_v39  ;;  %1465 = vmatmul.mubr.f32.vlgmr.msra.gmra.mrb[10].mxu1 %v1321_v39 }
 0x550   :  { %2343 = vmatpush1.bf16.msra.mxu0 %v2918_v47  ;;  %2375 = vmatpush1.bf16.msra.mxu1 %v2927_v50 }
 0x551   :  { %2345 = vmatprep.subr.bf16.mxu0 %v2936_v53  ;;  %2377 = vmatprep.subr.bf16.mxu1 %v2944_v56 }
 0x552   :  { %1570 = vmatprep.mubr.f32.mxu0 %v2661_v3  ;;  %1641 = vmatprep.mubr.f32.mxu1 %v2661_v3 }
 0x554   :  { %2347 = vmatpush1.bf16.msra.mxu0 %v2956_v60  ;;  %2379 = vmatpush1.bf16.msra.mxu1 %v2966_v63 }
 0x555   :  { %2349 = vmatprep.subr.bf16.mxu0 %v2976_v2  ;;  %2381 = vmatprep.subr.bf16.mxu1 %v2985_v6 }
 0x558   :  { %2351 = vmatpush1.bf16.msra.mxu0 %v2997_v10  ;;  %2383 = vmatpush1.bf16.msra.mxu1 %v3007_v13 }
 0x559   :  { %2353 = vmatprep.subr.bf16.mxu0 %v3017_v16  ;;  %2385 = vmatprep.subr.bf16.mxu1 %v3026_v19 }
 0x55c   :  { %2355 = vmatpush1.bf16.msra.mxu0 %v3038_v23  ;;  %2387 = vmatpush1.bf16.msra.mxu1 %v3048_v26 }
 0x55d   :  { %2357 = vmatprep.subr.bf16.mxu0 %v3058_v29  ;;  %2389 = vmatprep.subr.bf16.mxu1 %v3067_v32 }
 0x560   :  { %2359 = vmatpush1.bf16.msra.mxu0 %v3079_v36  ;;  %2391 = vmatpush1.bf16.msra.mxu1 %v3089_v40 }
 0x561   :  { %2361 = vmatprep.subr.bf16.mxu0 %v3099_v44  ;;  %2393 = vmatprep.subr.bf16.mxu1 %v3108_v48 }
 0x564   :  { %2363 = vmatpush1.bf16.msra.mxu0 %v3120_v54  ;;  %2395 = vmatpush1.bf16.msra.mxu1 %v3130_v58 }
 0x565   :  { %2365 = vmatprep.subr.bf16.mxu0 %v3140_v62  ;;  %2397 = vmatprep.subr.bf16.mxu1 %v3149_v4 }
 0x568   :  { %2367 = vmatpush1.bf16.msra.mxu0 %v3161_v9  ;;  %2399 = vmatpush1.bf16.msra.mxu1 %v3171_v14 }
 0x569   :  { %2369 = vmatprep.subr.bf16.mxu0 %v3181_v18  ;;  %2401 = vmatprep.subr.bf16.mxu1 %v3190_v22 }
 0x56c   :  { %2371 = vmatpush1.bf16.msra.mxu0 %v3196_v25  ;;  %2403 = vmatpush1.bf16.msra.mxu1 %v3200_v27 }
 0x56d   :  { %2405 = vmatprep.subr.bf16.mxu0 %v2893_v38  ;;  %2437 = vmatprep.subr.bf16.mxu1 %v2901_v41 }
 0x622   :  { %v1395_v24 = vpop.f32.mrb[10].mxu0  ;;  %v1466_v28 = vpop.f32.mrb[10].mxu1 }
 0x623   :  { %v2478_v30 = vadd.f32 %v1395_v24, %v3250_v35  ;;  %v1397_v31 = vpop.f32.mrb[11].mxu0  ;;  %v1468_v42 = vpop.f32.mrb[11].mxu1  ;;  %v2494_v52 = vadd.f32 %v1466_v28, %v3259_v0 }
 0x624   :  { %v2479_v43 = vadd.f32 %v1397_v31, %v3252_v37  ;;  %v2495_v49 = vadd.f32 %v1468_v42, %v3256_v57 }
 0x625   :  { %v1880_v45 = vmul.f32 -1.442695, %v2478_v30 }
 0x626   :  { %v1881_v46 = vmul.f32 -1.442695, %v2479_v43  ;;  %v1882_v51 = vmul.f32 -1.442695, %v2495_v49 }
 0x627   :  { %2613 = vpow2.f32 %v1880_v45 }
 0x628   :  { %2615 = vpow2.f32 %v1881_v46 }
 0x629   :  { %2617 = vpow2.f32 %v1882_v51 }
 0x62a   :  { %2619 = vtanh.f32 %v2494_v52 }
 0x631   :  { %v2614_v38 = vpop.eup %2613 }
 0x632   :  { %v2616_v55 = vpop.eup %2615  ;;  %v1478_v41 = vadd.f32 1.0, %v2614_v38 }
 0x633   :  { %v1484_v59 = vadd.f32 1.0, %v2616_v55  ;;  %v2618_v61 = vpop.eup %2617 }
 0x634   :  { %2621 = vrcp.f32 %v1478_v41  ;;  %v2620_v1 = vpop.eup %2619  ;;  %v1491_v11 = vadd.f32 1.0, %v2618_v61 }
 0x635   :  { %2623 = vrcp.f32 %v1484_v59 }
 0x636   :  { %2625 = vrcp.f32 %v1491_v11 }
 0x63e   :  { %v2622_v5 = vpop.eup %2621 }
 0x63f   :  { %v2624_v7 = vpop.eup %2623  ;;  %v1495_v8 = vmul.f32 %v2622_v5, %v2620_v1 }
 0x640   :  { %v1494_v12 = vmul.f32 %v2624_v7, %v3442_v21  ;;  %v2626_v17 = vpop.eup %2625 }
 0x642   :  { %v3487_v15 = vadd.f32 %v1495_v8, %v1494_v12 }
 0x644   :  { %2627 = vtanh.f32 %v3487_v15 }
 0x64e   :  { %v2628_v20 = vpop.eup %2627 }
 0x64f   :  { %v1498_v33 = vmul.f32 %v2628_v20, %v2626_v17 }
 0x651   :  { %1883 = vst [vmem:[%s3544_s4 + $0x28] sm:$0xff] %v1498_v33  ;;  %1571 = vmatmul.mubr.f32.vlgmr.msra.gmra.mrb[12].mxu0 %v1498_v33  ;;  %1642 = vmatmul.mubr.f32.vlgmr.msra.gmra.mrb[12].mxu1 %v1498_v33 }
 0x652   :  { %2407 = vmatpush1.bf16.msra.mxu0 %v2918_v47  ;;  %2439 = vmatpush1.bf16.msra.mxu1 %v2927_v50 }
 0x653   :  { %2409 = vmatprep.subr.bf16.mxu0 %v2936_v53  ;;  %2441 = vmatprep.subr.bf16.mxu1 %v2944_v56 }
 0x654   :  { %1747 = vmatprep.mubr.f32.mxu0 %v2661_v3  ;;  %1818 = vmatprep.mubr.f32.mxu1 %v2661_v3 }
 0x656   :  { %2411 = vmatpush1.bf16.msra.mxu0 %v2956_v60  ;;  %2443 = vmatpush1.bf16.msra.mxu1 %v2966_v63 }
 0x657   :  { %2413 = vmatprep.subr.bf16.mxu0 %v2976_v2  ;;  %2445 = vmatprep.subr.bf16.mxu1 %v2985_v6 }
 0x65a   :  { %2415 = vmatpush1.bf16.msra.mxu0 %v2997_v10  ;;  %2447 = vmatpush1.bf16.msra.mxu1 %v3007_v13 }
 0x65b   :  { %2417 = vmatprep.subr.bf16.mxu0 %v3017_v16  ;;  %2449 = vmatprep.subr.bf16.mxu1 %v3026_v19 }
 0x65e   :  { %2419 = vmatpush1.bf16.msra.mxu0 %v3038_v23  ;;  %2451 = vmatpush1.bf16.msra.mxu1 %v3048_v26 }
 0x65f   :  { %2421 = vmatprep.subr.bf16.mxu0 %v3058_v29  ;;  %2453 = vmatprep.subr.bf16.mxu1 %v3067_v32 }
 0x662   :  { %2423 = vmatpush1.bf16.msra.mxu0 %v3079_v36  ;;  %2455 = vmatpush1.bf16.msra.mxu1 %v3089_v40 }
 0x663   :  { %2425 = vmatprep.subr.bf16.mxu0 %v3099_v44  ;;  %2457 = vmatprep.subr.bf16.mxu1 %v3108_v48 }
 0x666   :  { %2427 = vmatpush1.bf16.msra.mxu0 %v3120_v54  ;;  %2459 = vmatpush1.bf16.msra.mxu1 %v3130_v58 }
 0x667   :  { %2429 = vmatprep.subr.bf16.mxu0 %v3140_v62  ;;  %2461 = vmatprep.subr.bf16.mxu1 %v3149_v4 }
 0x66a   :  { %2431 = vmatpush1.bf16.msra.mxu0 %v3161_v9  ;;  %2463 = vmatpush1.bf16.msra.mxu1 %v3171_v14 }
 0x66b   :  { %2433 = vmatprep.subr.bf16.mxu0 %v3181_v18  ;;  %2465 = vmatprep.subr.bf16.mxu1 %v3190_v22 }
 0x66e   :  { %2435 = vmatpush1.bf16.msra.mxu0 %v3196_v25  ;;  %2467 = vmatpush1.bf16.msra.mxu1 %v3200_v27 }
 0x724   :  { %v1572_v3 = vpop.f32.mrb[12].mxu0  ;;  %v1643_v47 = vpop.f32.mrb[12].mxu1 }
 0x725   :  { %v2480_v50 = vadd.f32 %v1572_v3, %v3250_v35  ;;  %v1574_v53 = vpop.f32.mrb[13].mxu0  ;;  %v1645_v56 = vpop.f32.mrb[13].mxu1  ;;  %v2496_v13 = vadd.f32 %v1643_v47, %v3259_v0 }
 0x726   :  { %v2481_v60 = vadd.f32 %v1574_v53, %v3252_v37  ;;  %v2497_v6 = vadd.f32 %v1645_v56, %v3256_v57 }
 0x727   :  { %v1884_v63 = vmul.f32 -1.442695, %v2480_v50 }
 0x728   :  { %v1885_v2 = vmul.f32 -1.442695, %v2481_v60  ;;  %v1886_v10 = vmul.f32 -1.442695, %v2497_v6 }
 0x729   :  { %2629 = vpow2.f32 %v1884_v63 }
 0x72a   :  { %2631 = vpow2.f32 %v1885_v2 }
 0x72b   :  { %2633 = vpow2.f32 %v1886_v10 }
 0x72c   :  { %2635 = vtanh.f32 %v2496_v13 }
 0x733   :  { %v2630_v16 = vpop.eup %2629 }
 0x734   :  { %v2632_v19 = vpop.eup %2631  ;;  %v1655_v23 = vadd.f32 1.0, %v2630_v16 }
 0x735   :  { %v1661_v26 = vadd.f32 1.0, %v2632_v19  ;;  %v2634_v29 = vpop.eup %2633 }
 0x736   :  { %2637 = vrcp.f32 %v1655_v23  ;;  %v2636_v32 = vpop.eup %2635  ;;  %v1668_v48 = vadd.f32 1.0, %v2634_v29 }
 0x737   :  { %2639 = vrcp.f32 %v1661_v26 }
 0x738   :  { %2641 = vrcp.f32 %v1668_v48 }
 0x740   :  { %v2638_v36 = vpop.eup %2637 }
 0x741   :  { %v2640_v40 = vpop.eup %2639  ;;  %v1672_v44 = vmul.f32 %v2638_v36, %v2636_v32 }
 0x742   :  { %v1671_v54 = vmul.f32 %v2640_v40, %v3487_v15  ;;  %v2642_v62 = vpop.eup %2641 }
 0x744   :  { %v1673_v58 = vadd.f32 %v1672_v44, %v1671_v54 }
 0x746   :  { %2643 = vtanh.f32 %v1673_v58 }
 0x750   :  { %v2644_v4 = vpop.eup %2643 }
 0x751   :  { %v1675_v9 = vmul.f32 %v2644_v4, %v2642_v62 }
 0x753   :  { %1887 = vst [vmem:[%s3544_s4 + $0x30] sm:$0xff] %v1675_v9  ;;  %1748 = vmatmul.mubr.f32.vlgmr.msra.gmra.mrb[14].mxu0 %v1675_v9  ;;  %1819 = vmatmul.mubr.f32.vlgmr.msra.gmra.mrb[14].mxu1 %v1675_v9 }
 0x826   :  { %v1749_v14 = vpop.f32.mrb[14].mxu0  ;;  %v1820_v18 = vpop.f32.mrb[14].mxu1 }
 0x827   :  { %v2482_v22 = vadd.f32 %v1749_v14, %v3250_v35  ;;  %v1751_v25 = vpop.f32.mrb[15].mxu0  ;;  %v1822_v27 = vpop.f32.mrb[15].mxu1  ;;  %v2498_v30 = vadd.f32 %v1820_v18, %v3259_v0 }
 0x828   :  { %v2483_v21 = vadd.f32 %v1751_v25, %v3252_v37  ;;  %v2499_v24 = vadd.f32 %v1822_v27, %v3256_v57 }
 0x829   :  { %v1888_v34 = vmul.f32 -1.442695, %v2482_v22 }
 0x82a   :  { %v1889_v39 = vmul.f32 -1.442695, %v2483_v21  ;;  %v1890_v28 = vmul.f32 -1.442695, %v2499_v24 }
 0x82b   :  { %2645 = vpow2.f32 %v1888_v34 }
 0x82c   :  { %2647 = vpow2.f32 %v1889_v39 }
 0x82d   :  { %2649 = vpow2.f32 %v1890_v28 }
 0x82e   :  { %2651 = vtanh.f32 %v2498_v30 }
 0x835   :  { %v2646_v31 = vpop.eup %2645 }
 0x836   :  { %v2648_v42 = vpop.eup %2647  ;;  %v1832_v43 = vadd.f32 1.0, %v2646_v31 }
 0x837   :  { %v1838_v45 = vadd.f32 1.0, %v2648_v42  ;;  %v2650_v35 = vpop.eup %2649 }
 0x838   :  { %2653 = vrcp.f32 %v1832_v43  ;;  %v2652_v46 = vpop.eup %2651  ;;  %v1845_v52 = vadd.f32 1.0, %v2650_v35 }
 0x839   :  { %2655 = vrcp.f32 %v1838_v45 }
 0x83a   :  { %2657 = vrcp.f32 %v1845_v52 }
 0x842   :  { %v2654_v37 = vpop.eup %2653 }
 0x843   :  { %v2656_v49 = vpop.eup %2655  ;;  %v1849_v51 = vmul.f32 %v2654_v37, %v2652_v46 }
 0x844   :  { %v1848_v38 = vmul.f32 %v2656_v49, %v1673_v58  ;;  %v2658_v57 = vpop.eup %2657 }
 0x846   :  { %v1850_v55 = vadd.f32 %v1849_v51, %v1848_v38 }
 0x848   :  { %2659 = vtanh.f32 %v1850_v55 }
 0x852   :  { %v2660_v0 = vpop.eup %2659 }
 0x853   :  { %v1852_v41 = vmul.f32 %v2660_v0, %v2658_v57 }
 0x855   :  { %1891 = vst [vmem:[%s3544_s4 + $0x38] sm:$0xff] %v1852_v41 }

// kernel: lstm_regressor_forward.3
= control target key start
LH: loop header
LB: loop body
LE: loop exit
PB: predicated region body
PF: predicated region fallthrough
CT: control target
= control target key end

     0   :  { %v2672_v3 = vmov 0.0   ;;  %vm1871_vm0 = vcmask 7168   ;;  %s3546_s1 = inlined_call_operand.vmem [shape: f32[128,512], index: 1, kind: input, shape index: {}]   ;;  %s3547_s2 = inlined_call_operand.vmem [shape: f32[128,512], index: 2, kind: input, shape index: {}]   ;;  %s3548_s0 = inlined_call_operand.vmem [shape: f32[8,8,128], index: 0, kind: input, shape index: {}]   ;;  %s3549_s3 = inlined_call_operand.vmem [shape: f32[1,512], index: 3, kind: input, shape index: {}]   ;;  %s3550_s5 = inlined_call_operand.<no memory space> [shape: f32[1,1], index: 5, kind: input, shape index: {}]   ;;  %s3551_s4 = inlined_call_operand.vmem [shape: f32[1,128], index: 4, kind: input, shape index: {}]   ;;  %s3552_s6 = inlined_call_operand.vmem [shape: f32[8,1], index: 6, kind: output, shape index: {}]  }
   0x1   :  { %v40_v0 = vld [vmem:[%s3546_s1 + $0x8] sm:$0xff]  ;;  %v42_v2 = vld [vmem:[%s3546_s1 + $0x18] sm:$0xff]  ;;  %189 = vmatprep.mubr.f32.mxu0 %v2672_v3  ;;  %302 = vmatprep.mubr.f32.mxu1 %v2672_v3  ;;  %v39_v6 = vld [vmem:[%s3546_s1] sm:$0xff] }
   0x2   :  { %v44_v1 = vld [vmem:[%s3546_s1 + $0x28] sm:$0xff]  ;;  %v46_v5 = vld [vmem:[%s3546_s1 + $0x38] sm:$0xff]  ;;  %v43_v7 = vld [vmem:[%s3546_s1 + $0x20] sm:$0xff] }
   0x3   :  { %v1903_v4 = vpack.c.bf16 %v44_v1, %v40_v0  ;;  %v1935_v8 = vpack.c.bf16 %v46_v5, %v42_v2  ;;  %v1905_v9 = vpack.c.bf16 %v43_v7, %v39_v6  ;;  %v41_v10 = vld [vmem:[%s3546_s1 + $0x10] sm:$0xff]  ;;  %v48_v12 = vld [vmem:[%s3546_s1 + $0x48] sm:$0xff]  ;;  %v50_v15 = vld [vmem:[%s3546_s1 + $0x58] sm:$0xff] }
   0x4   :  { %v45_v11 = vld [vmem:[%s3546_s1 + $0x30] sm:$0xff]  ;;  %v52_v14 = vld [vmem:[%s3546_s1 + $0x68] sm:$0xff]  ;;  %v54_v16 = vld [vmem:[%s3546_s1 + $0x78] sm:$0xff] }
   0x5   :  { %1904 = vmatprep.subr.bf16.mxu0 %v1903_v4  ;;  %v1937_v13 = vpack.c.bf16 %v45_v11, %v41_v10  ;;  %1936 = vmatprep.subr.bf16.mxu1 %v1935_v8  ;;  %v1907_v17 = vpack.c.bf16 %v52_v14, %v48_v12  ;;  %v1939_v18 = vpack.c.bf16 %v54_v16, %v50_v15  ;;  %v47_v19 = vld [vmem:[%s3546_s1 + $0x40] sm:$0xff]  ;;  %v49_v21 = vld [vmem:[%s3546_s1 + $0x50] sm:$0xff]  ;;  %v56_v24 = vld [vmem:[%s3546_s1 + $0x88] sm:$0xff] }
   0x6   :  { %1906 = vmatpush1.bf16.msra.mxu0 %v1905_v9  ;;  %v51_v20 = vld [vmem:[%s3546_s1 + $0x60] sm:$0xff]  ;;  %v53_v23 = vld [vmem:[%s3546_s1 + $0x70] sm:$0xff]  ;;  %v60_v25 = vld [vmem:[%s3546_s1 + $0xa8] sm:$0xff] }
   0x7   :  { %1938 = vmatpush1.bf16.msra.mxu1 %v1937_v13  ;;  %v1909_v22 = vpack.c.bf16 %v51_v20, %v47_v19  ;;  %1908 = vmatprep.subr.bf16.mxu0 %v1907_v17  ;;  %v1941_v26 = vpack.c.bf16 %v53_v23, %v49_v21  ;;  %v1911_v27 = vpack.c.bf16 %v60_v25, %v56_v24  ;;  %v58_v28 = vld [vmem:[%s3546_s1 + $0x98] sm:$0xff]  ;;  %v55_v30 = vld [vmem:[%s3546_s1 + $0x80] sm:$0xff]  ;;  %v57_v33 = vld [vmem:[%s3546_s1 + $0x90] sm:$0xff] }
   0x8   :  { %1940 = vmatprep.subr.bf16.mxu1 %v1939_v18  ;;  %v62_v29 = vld [vmem:[%s3546_s1 + $0xb8] sm:$0xff]  ;;  %v59_v32 = vld [vmem:[%s3546_s1 + $0xa0] sm:$0xff]  ;;  %v61_v34 = vld [vmem:[%s3546_s1 + $0xb0] sm:$0xff] }
   0x9   :  { %v1943_v31 = vpack.c.bf16 %v62_v29, %v58_v28  ;;  %v1913_v35 = vpack.c.bf16 %v59_v32, %v55_v30  ;;  %v64_v36 = vld [vmem:[%s3546_s1 + $0xc8] sm:$0xff]  ;;  %v66_v38 = vld [vmem:[%s3546_s1 + $0xd8] sm:$0xff]  ;;  %v1945_v39 = vpack.c.bf16 %v61_v34, %v57_v33  ;;  %v63_v42 = vld [vmem:[%s3546_s1 + $0xc0] sm:$0xff] }
   0xa   :  { %1910 = vmatpush1.bf16.msra.mxu0 %v1909_v22  ;;  %v68_v37 = vld [vmem:[%s3546_s1 + $0xe8] sm:$0xff]  ;;  %v70_v41 = vld [vmem:[%s3546_s1 + $0xf8] sm:$0xff]  ;;  %v67_v43 = vld [vmem:[%s3546_s1 + $0xe0] sm:$0xff] }
   0xb   :  { %1942 = vmatpush1.bf16.msra.mxu1 %v1941_v26  ;;  %1912 = vmatprep.subr.bf16.mxu0 %v1911_v27  ;;  %v1915_v40 = vpack.c.bf16 %v68_v37, %v64_v36  ;;  %v1947_v44 = vpack.c.bf16 %v70_v41, %v66_v38  ;;  %v65_v45 = vld [vmem:[%s3546_s1 + $0xd0] sm:$0xff]  ;;  %v72_v47 = vld [vmem:[%s3546_s1 + $0x108] sm:$0xff]  ;;  %v74_v49 = vld [vmem:[%s3546_s1 + $0x118] sm:$0xff]  ;;  %v1917_v51 = vpack.c.bf16 %v67_v43, %v63_v42 }
   0xc   :  { %1944 = vmatprep.subr.bf16.mxu1 %v1943_v31  ;;  %v69_v46 = vld [vmem:[%s3546_s1 + $0xf0] sm:$0xff]  ;;  %v76_v48 = vld [vmem:[%s3546_s1 + $0x128] sm:$0xff]  ;;  %v78_v50 = vld [vmem:[%s3546_s1 + $0x138] sm:$0xff] }
   0xd   :  { %v1949_v52 = vpack.c.bf16 %v69_v46, %v65_v45  ;;  %v1919_v53 = vpack.c.bf16 %v76_v48, %v72_v47  ;;  %v71_v54 = vld [vmem:[%s3546_s1 + $0x100] sm:$0xff]  ;;  %v73_v56 = vld [vmem:[%s3546_s1 + $0x110] sm:$0xff]  ;;  %v1951_v57 = vpack.c.bf16 %v78_v50, %v74_v49  ;;  %v80_v59 = vld [vmem:[%s3546_s1 + $0x148] sm:$0xff] }
   0xe   :  { %1914 = vmatpush1.bf16.msra.mxu0 %v1913_v35  ;;  %v75_v55 = vld [vmem:[%s3546_s1 + $0x120] sm:$0xff]  ;;  %v77_v58 = vld [vmem:[%s3546_s1 + $0x130] sm:$0xff]  ;;  %v84_v60 = vld [vmem:[%s3546_s1 + $0x168] sm:$0xff] }
   0xf   :  { %1946 = vmatpush1.bf16.msra.mxu1 %v1945_v39  ;;  %1916 = vmatprep.subr.bf16.mxu0 %v1915_v40  ;;  %v82_v61 = vld [vmem:[%s3546_s1 + $0x158] sm:$0xff]  ;;  %v1921_v63 = vpack.c.bf16 %v75_v55, %v71_v54  ;;  %v1953_v0 = vpack.c.bf16 %v77_v58, %v73_v56  ;;  %v1923_v1 = vpack.c.bf16 %v84_v60, %v80_v59  ;;  %v79_v2 = vld [vmem:[%s3546_s1 + $0x140] sm:$0xff]  ;;  %v81_v5 = vld [vmem:[%s3546_s1 + $0x150] sm:$0xff] }
  0x10   :  { %1948 = vmatprep.subr.bf16.mxu1 %v1947_v44  ;;  %v86_v62 = vld [vmem:[%s3546_s1 + $0x178] sm:$0xff]  ;;  %v83_v4 = vld [vmem:[%s3546_s1 + $0x160] sm:$0xff]  ;;  %v85_v7 = vld [vmem:[%s3546_s1 + $0x170] sm:$0xff] }
  0x11   :  { %v1955_v6 = vpack.c.bf16 %v86_v62, %v82_v61  ;;  %v88_v8 = vld [vmem:[%s3546_s1 + $0x188] sm:$0xff]  ;;  %v90_v10 = vld [vmem:[%s3546_s1 + $0x198] sm:$0xff]  ;;  %v1925_v12 = vpack.c.bf16 %v83_v4, %v79_v2  ;;  %v1957_v13 = vpack.c.bf16 %v85_v7, %v81_v5  ;;  %v87_v15 = vld [vmem:[%s3546_s1 + $0x180] sm:$0xff] }
  0x12   :  { %1918 = vmatpush1.bf16.msra.mxu0 %v1917_v51  ;;  %v92_v9 = vld [vmem:[%s3546_s1 + $0x1a8] sm:$0xff]  ;;  %v94_v11 = vld [vmem:[%s3546_s1 + $0x1b8] sm:$0xff]  ;;  %v91_v16 = vld [vmem:[%s3546_s1 + $0x1a0] sm:$0xff] }
  0x13   :  { %1950 = vmatpush1.bf16.msra.mxu1 %v1949_v52  ;;  %1920 = vmatprep.subr.bf16.mxu0 %v1919_v53  ;;  %v1927_v14 = vpack.c.bf16 %v92_v9, %v88_v8  ;;  %v89_v17 = vld [vmem:[%s3546_s1 + $0x190] sm:$0xff]  ;;  %v1959_v18 = vpack.c.bf16 %v94_v11, %v90_v10  ;;  %v96_v20 = vld [vmem:[%s3546_s1 + $0x1c8] sm:$0xff]  ;;  %v98_v22 = vld [vmem:[%s3546_s1 + $0x1d8] sm:$0xff]  ;;  %v1929_v24 = vpack.c.bf16 %v91_v16, %v87_v15 }
  0x14   :  { %1952 = vmatprep.subr.bf16.mxu1 %v1951_v57  ;;  %v93_v19 = vld [vmem:[%s3546_s1 + $0x1b0] sm:$0xff]  ;;  %v100_v21 = vld [vmem:[%s3546_s1 + $0x1e8] sm:$0xff]  ;;  %v102_v23 = vld [vmem:[%s3546_s1 + $0x1f8] sm:$0xff] }
  0x15   :  { %v1961_v25 = vpack.c.bf16 %v93_v19, %v89_v17  ;;  %v1931_v26 = vpack.c.bf16 %v100_v21, %v96_v20  ;;  %v95_v27 = vld [vmem:[%s3546_s1 + $0x1c0] sm:$0xff]  ;;  %v97_v29 = vld [vmem:[%s3546_s1 + $0x1d0] sm:$0xff]  ;;  %v1963_v30 = vpack.c.bf16 %v102_v23, %v98_v22  ;;  %v384_v32 = vld [vmem:[%s3547_s2 + $0x8] sm:$0xff] }
  0x16   :  { %1922 = vmatpush1.bf16.msra.mxu0 %v1921_v63  ;;  %v99_v28 = vld [vmem:[%s3546_s1 + $0x1e0] sm:$0xff]  ;;  %v101_v31 = vld [vmem:[%s3546_s1 + $0x1f0] sm:$0xff]  ;;  %v388_v33 = vld [vmem:[%s3547_s2 + $0x28] sm:$0xff] }
  0x17   :  { %1954 = vmatpush1.bf16.msra.mxu1 %v1953_v0  ;;  %1924 = vmatprep.subr.bf16.mxu0 %v1923_v1  ;;  %v386_v34 = vld [vmem:[%s3547_s2 + $0x18] sm:$0xff]  ;;  %v1933_v36 = vpack.c.bf16 %v99_v28, %v95_v27  ;;  %v1965_v37 = vpack.c.bf16 %v101_v31, %v97_v29  ;;  %v2914_v38 = vpack.c.bf16 %v388_v33, %v384_v32  ;;  %v383_v39 = vld [vmem:[%s3547_s2] sm:$0xff]  ;;  %v385_v42 = vld [vmem:[%s3547_s2 + $0x10] sm:$0xff] }
  0x18   :  { %1956 = vmatprep.subr.bf16.mxu1 %v1955_v6  ;;  %v390_v35 = vld [vmem:[%s3547_s2 + $0x38] sm:$0xff]  ;;  %v387_v40 = vld [vmem:[%s3547_s2 + $0x20] sm:$0xff]  ;;  %v389_v43 = vld [vmem:[%s3547_s2 + $0x30] sm:$0xff] }
  0x19   :  { %v2922_v41 = vpack.c.bf16 %v390_v35, %v386_v34  ;;  %v392_v44 = vld [vmem:[%s3547_s2 + $0x48] sm:$0xff]  ;;  %v31_v46 = vld [vmem:[%s3548_s0] sm:$0xff]  ;;  %v2939_v47 = vpack.c.bf16 %v387_v40, %v383_v39  ;;  %v394_v48 = vld [vmem:[%s3547_s2 + $0x58] sm:$0xff]  ;;  %v2948_v50 = vpack.c.bf16 %v389_v43, %v385_v42 }
  0x1a   :  { %1926 = vmatpush1.bf16.msra.mxu0 %v1925_v12  ;;  %v396_v45 = vld [vmem:[%s3547_s2 + $0x68] sm:$0xff]  ;;  %v398_v49 = vld [vmem:[%s3547_s2 + $0x78] sm:$0xff]  ;;  %v391_v51 = vld [vmem:[%s3547_s2 + $0x40] sm:$0xff] }
  0x1b   :  { %1958 = vmatpush1.bf16.msra.mxu1 %v1957_v13  ;;  %1928 = vmatprep.subr.bf16.mxu0 %v1927_v14  ;;  %v395_v52 = vld [vmem:[%s3547_s2 + $0x60] sm:$0xff]  ;;  %v2957_v53 = vpack.c.bf16 %v396_v45, %v392_v44  ;;  %v393_v54 = vld [vmem:[%s3547_s2 + $0x50] sm:$0xff]  ;;  %v2965_v56 = vpack.c.bf16 %v398_v49, %v394_v48  ;;  %v400_v57 = vld [vmem:[%s3547_s2 + $0x88] sm:$0xff] }
  0x1c   :  { %1960 = vmatprep.subr.bf16.mxu1 %v1959_v18  ;;  %v397_v55 = vld [vmem:[%s3547_s2 + $0x70] sm:$0xff]  ;;  %v404_v58 = vld [vmem:[%s3547_s2 + $0xa8] sm:$0xff]  ;;  %v2977_v60 = vpack.c.bf16 %v395_v52, %v391_v51  ;;  %v402_v61 = vld [vmem:[%s3547_s2 + $0x98] sm:$0xff] }
  0x1d   :  { %v32_v59 = vld [vmem:[%s3548_s0 + $0x8] sm:$0xff]  ;;  %v406_v62 = vld [vmem:[%s3547_s2 + $0xb8] sm:$0xff]  ;;  %v2987_v63 = vpack.c.bf16 %v397_v55, %v393_v54  ;;  %v399_v0 = vld [vmem:[%s3547_s2 + $0x80] sm:$0xff]  ;;  %v2997_v2 = vpack.c.bf16 %v404_v58, %v400_v57 }
  0x1e   :  { %1930 = vmatpush1.bf16.msra.mxu0 %v1929_v24  ;;  %v403_v1 = vld [vmem:[%s3547_s2 + $0xa0] sm:$0xff]  ;;  %v401_v4 = vld [vmem:[%s3547_s2 + $0x90] sm:$0xff]  ;;  %v3006_v6 = vpack.c.bf16 %v406_v62, %v402_v61  ;;  %v408_v7 = vld [vmem:[%s3547_s2 + $0xc8] sm:$0xff] }
  0x1f   :  { %1962 = vmatpush1.bf16.msra.mxu1 %v1961_v25  ;;  %1932 = vmatprep.subr.bf16.mxu0 %v1931_v26  ;;  %v405_v5 = vld [vmem:[%s3547_s2 + $0xb0] sm:$0xff]  ;;  %v412_v8 = vld [vmem:[%s3547_s2 + $0xe8] sm:$0xff]  ;;  %v3018_v10 = vpack.c.bf16 %v403_v1, %v399_v0  ;;  %v410_v11 = vld [vmem:[%s3547_s2 + $0xd8] sm:$0xff] }
  0x20   :  { %1964 = vmatprep.subr.bf16.mxu1 %v1963_v30  ;;  %v33_v9 = vld [vmem:[%s3548_s0 + $0x10] sm:$0xff]  ;;  %v414_v12 = vld [vmem:[%s3547_s2 + $0xf8] sm:$0xff]  ;;  %v3028_v13 = vpack.c.bf16 %v405_v5, %v401_v4  ;;  %v407_v14 = vld [vmem:[%s3547_s2 + $0xc0] sm:$0xff]  ;;  %v3038_v16 = vpack.c.bf16 %v412_v8, %v408_v7 }
  0x21   :  { %v411_v15 = vld [vmem:[%s3547_s2 + $0xe0] sm:$0xff]  ;;  %v409_v17 = vld [vmem:[%s3547_s2 + $0xd0] sm:$0xff]  ;;  %v3047_v19 = vpack.c.bf16 %v414_v12, %v410_v11  ;;  %v416_v20 = vld [vmem:[%s3547_s2 + $0x108] sm:$0xff] }
  0x22   :  { %1934 = vmatpush1.bf16.msra.mxu0 %v1933_v36  ;;  %v413_v18 = vld [vmem:[%s3547_s2 + $0xf0] sm:$0xff]  ;;  %v420_v21 = vld [vmem:[%s3547_s2 + $0x128] sm:$0xff]  ;;  %v34_v22 = vld [vmem:[%s3548_s0 + $0x18] sm:$0xff]  ;;  %v3059_v23 = vpack.c.bf16 %v411_v15, %v407_v14 }
  0x23   :  { %1966 = vmatpush1.bf16.msra.mxu1 %v1965_v37  ;;  %1968 = vmatprep.subr.bf16.mxu0 %v2914_v38  ;;  %v418_v24 = vld [vmem:[%s3547_s2 + $0x118] sm:$0xff]  ;;  %v3069_v26 = vpack.c.bf16 %v413_v18, %v409_v17  ;;  %v415_v27 = vld [vmem:[%s3547_s2 + $0x100] sm:$0xff]  ;;  %v3079_v29 = vpack.c.bf16 %v420_v21, %v416_v20  ;;  %v417_v30 = vld [vmem:[%s3547_s2 + $0x110] sm:$0xff] }
  0x24   :  { %2000 = vmatprep.subr.bf16.mxu1 %v2922_v41  ;;  %v422_v25 = vld [vmem:[%s3547_s2 + $0x138] sm:$0xff]  ;;  %v419_v28 = vld [vmem:[%s3547_s2 + $0x120] sm:$0xff]  ;;  %v421_v31 = vld [vmem:[%s3547_s2 + $0x130] sm:$0xff] }
  0x25   :  { %190 = vmatmul.mubr.f32.vlgmr.msra.gmra.mrb[0].mxu0 %v31_v46  ;;  %v3088_v32 = vpack.c.bf16 %v422_v25, %v418_v24  ;;  %v424_v33 = vld [vmem:[%s3547_s2 + $0x148] sm:$0xff]  ;;  %v35_v35 = vld [vmem:[%s3548_s0 + $0x20] sm:$0xff]  ;;  %v3100_v36 = vpack.c.bf16 %v419_v28, %v415_v27  ;;  %v426_v37 = vld [vmem:[%s3547_s2 + $0x158] sm:$0xff]  ;;  %v3110_v40 = vpack.c.bf16 %v421_v31, %v417_v30  ;;  %v105_v28 = vlaneseq }
  0x26   :  { %303 = vmatmul.mubr.f32.vlgmr.msra.gmra.mrb[0].mxu1 %v31_v46  ;;  %1970 = vmatpush1.bf16.msra.mxu0 %v2939_v47  ;;  %v428_v34 = vld [vmem:[%s3547_s2 + $0x168] sm:$0xff]  ;;  %v430_v39 = vld [vmem:[%s3547_s2 + $0x178] sm:$0xff]  ;;  %v423_v42 = vld [vmem:[%s3547_s2 + $0x140] sm:$0xff] }
  0x27   :  { %2002 = vmatpush1.bf16.msra.mxu1 %v2948_v50  ;;  %195 = vmatprep.mubr.f32.mxu0 %v2672_v3  ;;  %v427_v43 = vld [vmem:[%s3547_s2 + $0x160] sm:$0xff]  ;;  %v3120_v44 = vpack.c.bf16 %v428_v34, %v424_v33  ;;  %v425_v45 = vld [vmem:[%s3547_s2 + $0x150] sm:$0xff]  ;;  %v3129_v48 = vpack.c.bf16 %v430_v39, %v426_v37  ;;  %v432_v49 = vld [vmem:[%s3547_s2 + $0x188] sm:$0xff]  ;;  %v106_v30 = vshrl.u32 %v105_v28, 7 }
  0x28   :  { %308 = vmatprep.mubr.f32.mxu1 %v2672_v3  ;;  %1972 = vmatprep.subr.bf16.mxu0 %v2957_v53  ;;  %v429_v46 = vld [vmem:[%s3547_s2 + $0x170] sm:$0xff]  ;;  %v436_v51 = vld [vmem:[%s3547_s2 + $0x1a8] sm:$0xff]  ;;  %v3141_v54 = vpack.c.bf16 %v427_v43, %v423_v42  ;;  %v434_v55 = vld [vmem:[%s3547_s2 + $0x198] sm:$0xff] }
  0x29   :  { %196 = vmatmul.mubr.f32.gmra.mrb[2].mxu0 %v32_v59  ;;  %2004 = vmatprep.subr.bf16.mxu1 %v2965_v56  ;;  %v36_v52 = vld [vmem:[%s3548_s0 + $0x28] sm:$0xff]  ;;  %v438_v57 = vld [vmem:[%s3547_s2 + $0x1b8] sm:$0xff]  ;;  %v3151_v58 = vpack.c.bf16 %v429_v46, %v425_v45  ;;  %v435_v61 = vld [vmem:[%s3547_s2 + $0x1a0] sm:$0xff]  ;;  %v3161_v62 = vpack.c.bf16 %v436_v51, %v432_v49  ;;  %v107_v31 = vsub.s32 0, %v106_v30  ;;  %v111_v34 = vsub.s32 1, %v106_v30 }
  0x2a   :  { %309 = vmatmul.mubr.f32.gmra.mrb[2].mxu1 %v32_v59  ;;  %1974 = vmatpush1.bf16.msra.mxu0 %v2977_v60  ;;  %v431_v59 = vld [vmem:[%s3547_s2 + $0x180] sm:$0xff]  ;;  %v433_v0 = vld [vmem:[%s3547_s2 + $0x190] sm:$0xff]  ;;  %v3170_v4 = vpack.c.bf16 %v438_v57, %v434_v55  ;;  %v440_v5 = vld [vmem:[%s3547_s2 + $0x1c8] sm:$0xff]  ;;  %v119_v42 = vsub.s32 3, %v106_v30 }
  0x2b   :  { %2006 = vmatpush1.bf16.msra.mxu1 %v2987_v63  ;;  %201 = vmatprep.mubr.f32.mxu0 %v2672_v3  ;;  %v437_v1 = vld [vmem:[%s3547_s2 + $0x1b0] sm:$0xff]  ;;  %v444_v7 = vld [vmem:[%s3547_s2 + $0x1e8] sm:$0xff]  ;;  %v442_v11 = vld [vmem:[%s3547_s2 + $0x1d8] sm:$0xff] }
  0x2c   :  { %314 = vmatprep.mubr.f32.mxu1 %v2672_v3  ;;  %1976 = vmatprep.subr.bf16.mxu0 %v2997_v2  ;;  %v37_v8 = vld [vmem:[%s3548_s0 + $0x30] sm:$0xff]  ;;  %v446_v12 = vld [vmem:[%s3547_s2 + $0x1f8] sm:$0xff]  ;;  %v3192_v14 = vpack.c.bf16 %v437_v1, %v433_v0  ;;  %v439_v15 = vld [vmem:[%s3547_s2 + $0x1c0] sm:$0xff]  ;;  %v3202_v18 = vpack.c.bf16 %v444_v7, %v440_v5 }
  0x2d   :  { %202 = vmatmul.mubr.f32.gmra.mrb[4].mxu0 %v33_v9  ;;  %2008 = vmatprep.subr.bf16.mxu1 %v3006_v6  ;;  %v443_v17 = vld [vmem:[%s3547_s2 + $0x1e0] sm:$0xff]  ;;  %v441_v20 = vld [vmem:[%s3547_s2 + $0x1d0] sm:$0xff]  ;;  %v38_v24 = vld [vmem:[%s3548_s0 + $0x38] sm:$0xff] }
  0x2e   :  { %315 = vmatmul.mubr.f32.gmra.mrb[4].mxu1 %v33_v9  ;;  %1978 = vmatpush1.bf16.msra.mxu0 %v3018_v10  ;;  %v3182_v9 = vpack.c.bf16 %v435_v61, %v431_v59  ;;  %v445_v21 = vld [vmem:[%s3547_s2 + $0x1f0] sm:$0xff]  ;;  %v3217_v25 = vpack.c.bf16 %v443_v17, %v439_v15  ;;  %v103_v33 = vld [vmem:[%s3549_s3] sm:$0xf]  ;;  %v115_v59 = vsub.s32 2, %v106_v30 }
  0x2f   :  { %2010 = vmatpush1.bf16.msra.mxu1 %v3028_v13  ;;  %207 = vmatprep.mubr.f32.mxu0 %v2672_v3  ;;  %v3221_v27 = vpack.c.bf16 %v445_v21, %v441_v20  ;;  %v3273_v37 = vrot.slane %v103_v33, %v111_v34  ;;  %v3277_v57 = vrot.slane %v103_v33, %v119_v42 }
  0x30   :  { %320 = vmatprep.mubr.f32.mxu1 %v2672_v3  ;;  %1980 = vmatprep.subr.bf16.mxu0 %v3038_v16  ;;  %v3280_v0 = vrot.slane %v103_v33, %v115_v59 }
  0x31   :  { %208 = vmatmul.mubr.f32.gmra.mrb[6].mxu0 %v34_v22  ;;  %2012 = vmatprep.subr.bf16.mxu1 %v3047_v19 }
  0x32   :  { %321 = vmatmul.mubr.f32.gmra.mrb[6].mxu1 %v34_v22  ;;  %1982 = vmatpush1.bf16.msra.mxu0 %v3059_v23  ;;  %v3211_v22 = vpack.c.bf16 %v446_v12, %v442_v11 }
  0x33   :  { %2014 = vmatpush1.bf16.msra.mxu1 %v3069_v26  ;;  %213 = vmatprep.mubr.f32.mxu0 %v2672_v3 }
  0x34   :  { %326 = vmatprep.mubr.f32.mxu1 %v2672_v3  ;;  %1984 = vmatprep.subr.bf16.mxu0 %v3079_v29 }
  0x35   :  { %214 = vmatmul.mubr.f32.gmra.mrb[8].mxu0 %v35_v35  ;;  %2016 = vmatprep.subr.bf16.mxu1 %v3088_v32 }
  0x36   :  { %327 = vmatmul.mubr.f32.gmra.mrb[8].mxu1 %v35_v35  ;;  %1986 = vmatpush1.bf16.msra.mxu0 %v3100_v36  ;;  %v3271_v35 = vrot.slane %v103_v33, %v107_v31 }
  0x37   :  { %2018 = vmatpush1.bf16.msra.mxu1 %v3110_v40  ;;  %219 = vmatprep.mubr.f32.mxu0 %v2672_v3 }
  0x38   :  { %332 = vmatprep.mubr.f32.mxu1 %v2672_v3  ;;  %1988 = vmatprep.subr.bf16.mxu0 %v3120_v44 }
  0x39   :  { %220 = vmatmul.mubr.f32.gmra.mrb[10].mxu0 %v36_v52  ;;  %2020 = vmatprep.subr.bf16.mxu1 %v3129_v48 }
  0x3a   :  { %333 = vmatmul.mubr.f32.gmra.mrb[10].mxu1 %v36_v52  ;;  %1990 = vmatpush1.bf16.msra.mxu0 %v3141_v54 }
  0x3b   :  { %2022 = vmatpush1.bf16.msra.mxu1 %v3151_v58  ;;  %225 = vmatprep.mubr.f32.mxu0 %v2672_v3 }
  0x3c   :  { %338 = vmatprep.mubr.f32.mxu1 %v2672_v3  ;;  %1992 = vmatprep.subr.bf16.mxu0 %v3161_v62 }
  0x3d   :  { %226 = vmatmul.mubr.f32.gmra.mrb[12].mxu0 %v37_v8  ;;  %2024 = vmatprep.subr.bf16.mxu1 %v3170_v4 }
  0x3e   :  { %339 = vmatmul.mubr.f32.gmra.mrb[12].mxu1 %v37_v8  ;;  %1994 = vmatpush1.bf16.msra.mxu0 %v3182_v9 }
  0x3f   :  { %2026 = vmatpush1.bf16.msra.mxu1 %v3192_v14  ;;  %231 = vmatprep.mubr.f32.mxu0 %v2672_v3 }
  0x40   :  { %344 = vmatprep.mubr.f32.mxu1 %v2672_v3  ;;  %1996 = vmatprep.subr.bf16.mxu0 %v3202_v18 }
  0x41   :  { %232 = vmatmul.mubr.f32.gmra.mrb[14].mxu0 %v38_v24  ;;  %2028 = vmatprep.subr.bf16.mxu1 %v3211_v22 }
  0x42   :  { %345 = vmatmul.mubr.f32.gmra.mrb[14].mxu1 %v38_v24  ;;  %1998 = vmatpush1.bf16.msra.mxu0 %v3217_v25 }
  0x43   :  { %2030 = vmatpush1.bf16.msra.mxu1 %v3221_v27  ;;  %517 = vmatprep.mubr.f32.mxu0 %v2672_v3 }
  0x44   :  { %588 = vmatprep.mubr.f32.mxu1 %v2672_v3  ;;  %2032 = vmatprep.subr.bf16.mxu0 %v2914_v38 }
  0x45   :  { %518 = vmatmul.mubr.f32.vlgmr.msra.gmra.mrb[0].mxu0 %v2672_v3  ;;  %2064 = vmatprep.subr.bf16.mxu1 %v2922_v41 }
  0x46   :  { %589 = vmatmul.mubr.f32.vlgmr.msra.gmra.mrb[0].mxu1 %v2672_v3  ;;  %2034 = vmatpush1.bf16.msra.mxu0 %v2939_v47 }
  0x47   :  { %2066 = vmatpush1.bf16.msra.mxu1 %v2948_v50  ;;  %2036 = vmatprep.subr.bf16.mxu0 %v2957_v53 }
  0x48   :  { %2068 = vmatprep.subr.bf16.mxu1 %v2965_v56  ;;  %692 = vmatprep.mubr.f32.mxu0 %v2672_v3 }
  0x49   :  { %763 = vmatprep.mubr.f32.mxu1 %v2672_v3 }
  0x4a   :  { %2038 = vmatpush1.bf16.msra.mxu0 %v2977_v60 }
  0x4b   :  { %2070 = vmatpush1.bf16.msra.mxu1 %v2987_v63  ;;  %2040 = vmatprep.subr.bf16.mxu0 %v2997_v2 }
  0x4c   :  { %2072 = vmatprep.subr.bf16.mxu1 %v3006_v6 }
  0x4e   :  { %2042 = vmatpush1.bf16.msra.mxu0 %v3018_v10 }
  0x4f   :  { %2074 = vmatpush1.bf16.msra.mxu1 %v3028_v13  ;;  %2044 = vmatprep.subr.bf16.mxu0 %v3038_v16 }
  0x50   :  { %2076 = vmatprep.subr.bf16.mxu1 %v3047_v19 }
  0x52   :  { %2046 = vmatpush1.bf16.msra.mxu0 %v3059_v23 }
  0x53   :  { %2078 = vmatpush1.bf16.msra.mxu1 %v3069_v26  ;;  %2048 = vmatprep.subr.bf16.mxu0 %v3079_v29 }
  0x54   :  { %2080 = vmatprep.subr.bf16.mxu1 %v3088_v32 }
  0x56   :  { %2050 = vmatpush1.bf16.msra.mxu0 %v3100_v36 }
  0x57   :  { %2082 = vmatpush1.bf16.msra.mxu1 %v3110_v40  ;;  %2052 = vmatprep.subr.bf16.mxu0 %v3120_v44 }
  0x58   :  { %2084 = vmatprep.subr.bf16.mxu1 %v3129_v48 }
  0x5a   :  { %2054 = vmatpush1.bf16.msra.mxu0 %v3141_v54 }
  0x5b   :  { %2086 = vmatpush1.bf16.msra.mxu1 %v3151_v58  ;;  %2056 = vmatprep.subr.bf16.mxu0 %v3161_v62 }
  0x5c   :  { %2088 = vmatprep.subr.bf16.mxu1 %v3170_v4 }
  0x5e   :  { %2058 = vmatpush1.bf16.msra.mxu0 %v3182_v9 }
  0x5f   :  { %2090 = vmatpush1.bf16.msra.mxu1 %v3192_v14  ;;  %2060 = vmatprep.subr.bf16.mxu0 %v3202_v18 }
  0x60   :  { %2092 = vmatprep.subr.bf16.mxu1 %v3211_v22 }
  0x62   :  { %2062 = vmatpush1.bf16.msra.mxu0 %v3217_v25 }
  0x63   :  { %2094 = vmatpush1.bf16.msra.mxu1 %v3221_v27  ;;  %2096 = vmatprep.subr.bf16.mxu0 %v2914_v38 }
  0x64   :  { %2128 = vmatprep.subr.bf16.mxu1 %v2922_v41 }
 0x118   :  { %v519_v39 = vpop.f32.mrb[0].mxu0 }
 0x119   :  { %v2479_v43 = vadd.f32 %v519_v39, %v3271_v35  ;;  %v590_v45 = vpop.f32.mrb[0].mxu1  ;;  %v521_v46 = vpop.f32.mrb[1].mxu0 }
 0x11a   :  { %v2480_v49 = vadd.f32 %v521_v46, %v3273_v37  ;;  %v592_v51 = vpop.f32.mrb[1].mxu1  ;;  %v2495_v5 = vadd.f32 %v590_v45, %v3280_v0 }
 0x11b   :  { %v1877_v52 = vmul.f32 -1.442695, %v2479_v43  ;;  %v2496_v61 = vadd.f32 %v592_v51, %v3277_v57 }
 0x11c   :  { %v1878_v55 = vmul.f32 -1.442695, %v2480_v49 }
 0x11d   :  { %2544 = vpow2.f32 %v1877_v52  ;;  %v1879_v1 = vmul.f32 -1.442695, %v2496_v61 }
 0x11e   :  { %2546 = vpow2.f32 %v1878_v55 }
 0x11f   :  { %2548 = vpow2.f32 %v1879_v1 }
 0x120   :  { %2550 = vtanh.f32 %v2495_v5 }
 0x127   :  { %v2545_v7 = vpop.eup %2544 }
 0x128   :  { %v2547_v8 = vpop.eup %2546  ;;  %v602_v11 = vadd.f32 1.0, %v2545_v7 }
 0x129   :  { %v608_v12 = vadd.f32 1.0, %v2547_v8  ;;  %v2549_v15 = vpop.eup %2548 }
 0x12a   :  { %2552 = vrcp.f32 %v602_v11  ;;  %v2551_v17 = vpop.eup %2550  ;;  %v615_v28 = vadd.f32 1.0, %v2549_v15 }
 0x12b   :  { %2554 = vrcp.f32 %v608_v12 }
 0x12c   :  { %2556 = vrcp.f32 %v615_v28 }
 0x134   :  { %v2553_v20 = vpop.eup %2552 }
 0x135   :  { %v2555_v21 = vpop.eup %2554  ;;  %v619_v24 = vmul.f32 %v2553_v20, %v2551_v17 }
 0x136   :  { %v618_v30 = vmul.f32 0.0, %v2555_v21  ;;  %v2557_v33 = vpop.eup %2556 }
 0x138   :  { %v3283_v31 = vadd.f32 %v619_v24, %v618_v30 }
 0x13a   :  { %2558 = vtanh.f32 %v3283_v31 }
 0x144   :  { %v2559_v34 = vpop.eup %2558 }
 0x145   :  { %v622_v39 = vmul.f32 %v2559_v34, %v2557_v33 }
 0x147   :  { %693 = vmatmul.mubr.f32.vlgmr.msra.gmra.mrb[2].mxu0 %v622_v39  ;;  %764 = vmatmul.mubr.f32.vlgmr.msra.gmra.mrb[2].mxu1 %v622_v39 }
 0x148   :  { %2098 = vmatpush1.bf16.msra.mxu0 %v2939_v47  ;;  %2130 = vmatpush1.bf16.msra.mxu1 %v2948_v50 }
 0x149   :  { %2100 = vmatprep.subr.bf16.mxu0 %v2957_v53  ;;  %2132 = vmatprep.subr.bf16.mxu1 %v2965_v56 }
 0x14a   :  { %867 = vmatprep.mubr.f32.mxu0 %v2672_v3  ;;  %938 = vmatprep.mubr.f32.mxu1 %v2672_v3 }
 0x14c   :  { %2102 = vmatpush1.bf16.msra.mxu0 %v2977_v60  ;;  %2134 = vmatpush1.bf16.msra.mxu1 %v2987_v63 }
 0x14d   :  { %2104 = vmatprep.subr.bf16.mxu0 %v2997_v2  ;;  %2136 = vmatprep.subr.bf16.mxu1 %v3006_v6 }
 0x150   :  { %2106 = vmatpush1.bf16.msra.mxu0 %v3018_v10  ;;  %2138 = vmatpush1.bf16.msra.mxu1 %v3028_v13 }
 0x151   :  { %2108 = vmatprep.subr.bf16.mxu0 %v3038_v16  ;;  %2140 = vmatprep.subr.bf16.mxu1 %v3047_v19 }
 0x154   :  { %2110 = vmatpush1.bf16.msra.mxu0 %v3059_v23  ;;  %2142 = vmatpush1.bf16.msra.mxu1 %v3069_v26 }
 0x155   :  { %2112 = vmatprep.subr.bf16.mxu0 %v3079_v29  ;;  %2144 = vmatprep.subr.bf16.mxu1 %v3088_v32 }
 0x158   :  { %2114 = vmatpush1.bf16.msra.mxu0 %v3100_v36  ;;  %2146 = vmatpush1.bf16.msra.mxu1 %v3110_v40 }
 0x159   :  { %2116 = vmatprep.subr.bf16.mxu0 %v3120_v44  ;;  %2148 = vmatprep.subr.bf16.mxu1 %v3129_v48 }
 0x15c   :  { %2118 = vmatpush1.bf16.msra.mxu0 %v3141_v54  ;;  %2150 = vmatpush1.bf16.msra.mxu1 %v3151_v58 }
 0x15d   :  { %2120 = vmatprep.subr.bf16.mxu0 %v3161_v62  ;;  %2152 = vmatprep.subr.bf16.mxu1 %v3170_v4 }
 0x160   :  { %2122 = vmatpush1.bf16.msra.mxu0 %v3182_v9  ;;  %2154 = vmatpush1.bf16.msra.mxu1 %v3192_v14 }
 0x161   :  { %2124 = vmatprep.subr.bf16.mxu0 %v3202_v18  ;;  %2156 = vmatprep.subr.bf16.mxu1 %v3211_v22 }
 0x164   :  { %2126 = vmatpush1.bf16.msra.mxu0 %v3217_v25  ;;  %2158 = vmatpush1.bf16.msra.mxu1 %v3221_v27 }
 0x165   :  { %2160 = vmatprep.subr.bf16.mxu0 %v2914_v38  ;;  %2192 = vmatprep.subr.bf16.mxu1 %v2922_v41 }
 0x21a   :  { %v694_v42 = vpop.f32.mrb[2].mxu0  ;;  %v765_v43 = vpop.f32.mrb[2].mxu1 }
 0x21b   :  { %v2481_v45 = vadd.f32 %v694_v42, %v3271_v35  ;;  %v696_v46 = vpop.f32.mrb[3].mxu0  ;;  %v767_v49 = vpop.f32.mrb[3].mxu1  ;;  %v2497_v1 = vadd.f32 %v765_v43, %v3280_v0 }
 0x21c   :  { %v2482_v51 = vadd.f32 %v696_v46, %v3273_v37  ;;  %v2498_v59 = vadd.f32 %v767_v49, %v3277_v57 }
 0x21d   :  { %v1880_v52 = vmul.f32 -1.442695, %v2481_v45 }
 0x21e   :  { %v1881_v55 = vmul.f32 -1.442695, %v2482_v51  ;;  %v1882_v61 = vmul.f32 -1.442695, %v2498_v59 }
 0x21f   :  { %2560 = vpow2.f32 %v1880_v52 }
 0x220   :  { %2562 = vpow2.f32 %v1881_v55 }
 0x221   :  { %2564 = vpow2.f32 %v1882_v61 }
 0x222   :  { %2566 = vtanh.f32 %v2497_v1 }
 0x229   :  { %v2561_v5 = vpop.eup %2560 }
 0x22a   :  { %v2563_v7 = vpop.eup %2562  ;;  %v777_v8 = vadd.f32 1.0, %v2561_v5 }
 0x22b   :  { %v783_v11 = vadd.f32 1.0, %v2563_v7  ;;  %v2565_v12 = vpop.eup %2564 }
 0x22c   :  { %2568 = vrcp.f32 %v777_v8  ;;  %v2567_v15 = vpop.eup %2566  ;;  %v790_v24 = vadd.f32 1.0, %v2565_v12 }
 0x22d   :  { %2570 = vrcp.f32 %v783_v11 }
 0x22e   :  { %2572 = vrcp.f32 %v790_v24 }
 0x236   :  { %v2569_v17 = vpop.eup %2568 }
 0x237   :  { %v2571_v20 = vpop.eup %2570  ;;  %v794_v21 = vmul.f32 %v2569_v17, %v2567_v15 }
 0x238   :  { %v793_v28 = vmul.f32 %v2571_v20, %v3283_v31  ;;  %v2573_v33 = vpop.eup %2572 }
 0x23a   :  { %v3325_v30 = vadd.f32 %v794_v21, %v793_v28 }
 0x23c   :  { %2574 = vtanh.f32 %v3325_v30 }
 0x246   :  { %v2575_v34 = vpop.eup %2574 }
 0x247   :  { %v797_v39 = vmul.f32 %v2575_v34, %v2573_v33 }
 0x249   :  { %868 = vmatmul.mubr.f32.vlgmr.msra.gmra.mrb[4].mxu0 %v797_v39  ;;  %939 = vmatmul.mubr.f32.vlgmr.msra.gmra.mrb[4].mxu1 %v797_v39 }
 0x24a   :  { %2162 = vmatpush1.bf16.msra.mxu0 %v2939_v47  ;;  %2194 = vmatpush1.bf16.msra.mxu1 %v2948_v50 }
 0x24b   :  { %2164 = vmatprep.subr.bf16.mxu0 %v2957_v53  ;;  %2196 = vmatprep.subr.bf16.mxu1 %v2965_v56 }
 0x24c   :  { %1042 = vmatprep.mubr.f32.mxu0 %v2672_v3  ;;  %1113 = vmatprep.mubr.f32.mxu1 %v2672_v3 }
 0x24e   :  { %2166 = vmatpush1.bf16.msra.mxu0 %v2977_v60  ;;  %2198 = vmatpush1.bf16.msra.mxu1 %v2987_v63 }
 0x24f   :  { %2168 = vmatprep.subr.bf16.mxu0 %v2997_v2  ;;  %2200 = vmatprep.subr.bf16.mxu1 %v3006_v6 }
 0x252   :  { %2170 = vmatpush1.bf16.msra.mxu0 %v3018_v10  ;;  %2202 = vmatpush1.bf16.msra.mxu1 %v3028_v13 }
 0x253   :  { %2172 = vmatprep.subr.bf16.mxu0 %v3038_v16  ;;  %2204 = vmatprep.subr.bf16.mxu1 %v3047_v19 }
 0x256   :  { %2174 = vmatpush1.bf16.msra.mxu0 %v3059_v23  ;;  %2206 = vmatpush1.bf16.msra.mxu1 %v3069_v26 }
 0x257   :  { %2176 = vmatprep.subr.bf16.mxu0 %v3079_v29  ;;  %2208 = vmatprep.subr.bf16.mxu1 %v3088_v32 }
 0x25a   :  { %2178 = vmatpush1.bf16.msra.mxu0 %v3100_v36  ;;  %2210 = vmatpush1.bf16.msra.mxu1 %v3110_v40 }
 0x25b   :  { %2180 = vmatprep.subr.bf16.mxu0 %v3120_v44  ;;  %2212 = vmatprep.subr.bf16.mxu1 %v3129_v48 }
 0x25e   :  { %2182 = vmatpush1.bf16.msra.mxu0 %v3141_v54  ;;  %2214 = vmatpush1.bf16.msra.mxu1 %v3151_v58 }
 0x25f   :  { %2184 = vmatprep.subr.bf16.mxu0 %v3161_v62  ;;  %2216 = vmatprep.subr.bf16.mxu1 %v3170_v4 }
 0x262   :  { %2186 = vmatpush1.bf16.msra.mxu0 %v3182_v9  ;;  %2218 = vmatpush1.bf16.msra.mxu1 %v3192_v14 }
 0x263   :  { %2188 = vmatprep.subr.bf16.mxu0 %v3202_v18  ;;  %2220 = vmatprep.subr.bf16.mxu1 %v3211_v22 }
 0x266   :  { %2190 = vmatpush1.bf16.msra.mxu0 %v3217_v25  ;;  %2222 = vmatpush1.bf16.msra.mxu1 %v3221_v27 }
 0x267   :  { %2224 = vmatprep.subr.bf16.mxu0 %v2914_v38  ;;  %2256 = vmatprep.subr.bf16.mxu1 %v2922_v41 }
 0x31c   :  { %v869_v31 = vpop.f32.mrb[4].mxu0  ;;  %v940_v42 = vpop.f32.mrb[4].mxu1 }
 0x31d   :  { %v2483_v43 = vadd.f32 %v869_v31, %v3271_v35  ;;  %v871_v45 = vpop.f32.mrb[5].mxu0  ;;  %v942_v46 = vpop.f32.mrb[5].mxu1  ;;  %v2499_v61 = vadd.f32 %v940_v42, %v3280_v0 }
 0x31e   :  { %v2484_v49 = vadd.f32 %v871_v45, %v3273_v37  ;;  %v2500_v55 = vadd.f32 %v942_v46, %v3277_v57 }
 0x31f   :  { %v1883_v51 = vmul.f32 -1.442695, %v2483_v43 }
 0x320   :  { %v1884_v52 = vmul.f32 -1.442695, %v2484_v49  ;;  %v1885_v59 = vmul.f32 -1.442695, %v2500_v55 }
 0x321   :  { %2576 = vpow2.f32 %v1883_v51 }
 0x322   :  { %2578 = vpow2.f32 %v1884_v52 }
 0x323   :  { %2580 = vpow2.f32 %v1885_v59 }
 0x324   :  { %2582 = vtanh.f32 %v2499_v61 }
 0x32b   :  { %v2577_v1 = vpop.eup %2576 }
 0x32c   :  { %v2579_v5 = vpop.eup %2578  ;;  %v952_v7 = vadd.f32 1.0, %v2577_v1 }
 0x32d   :  { %v958_v8 = vadd.f32 1.0, %v2579_v5  ;;  %v2581_v11 = vpop.eup %2580 }
 0x32e   :  { %2584 = vrcp.f32 %v952_v7  ;;  %v2583_v12 = vpop.eup %2582  ;;  %v965_v21 = vadd.f32 1.0, %v2581_v11 }
 0x32f   :  { %2586 = vrcp.f32 %v958_v8 }
 0x330   :  { %2588 = vrcp.f32 %v965_v21 }
 0x338   :  { %v2585_v15 = vpop.eup %2584 }
 0x339   :  { %v2587_v17 = vpop.eup %2586  ;;  %v969_v20 = vmul.f32 %v2585_v15, %v2583_v12 }
 0x33a   :  { %v968_v24 = vmul.f32 %v2587_v17, %v3325_v30  ;;  %v2589_v33 = vpop.eup %2588 }
 0x33c   :  { %v3367_v28 = vadd.f32 %v969_v20, %v968_v24 }
 0x33e   :  { %2590 = vtanh.f32 %v3367_v28 }
 0x348   :  { %v2591_v34 = vpop.eup %2590 }
 0x349   :  { %v972_v39 = vmul.f32 %v2591_v34, %v2589_v33 }
 0x34b   :  { %1043 = vmatmul.mubr.f32.vlgmr.msra.gmra.mrb[6].mxu0 %v972_v39  ;;  %1114 = vmatmul.mubr.f32.vlgmr.msra.gmra.mrb[6].mxu1 %v972_v39 }
 0x34c   :  { %2226 = vmatpush1.bf16.msra.mxu0 %v2939_v47  ;;  %2258 = vmatpush1.bf16.msra.mxu1 %v2948_v50 }
 0x34d   :  { %2228 = vmatprep.subr.bf16.mxu0 %v2957_v53  ;;  %2260 = vmatprep.subr.bf16.mxu1 %v2965_v56 }
 0x34e   :  { %1217 = vmatprep.mubr.f32.mxu0 %v2672_v3  ;;  %1288 = vmatprep.mubr.f32.mxu1 %v2672_v3 }
 0x350   :  { %2230 = vmatpush1.bf16.msra.mxu0 %v2977_v60  ;;  %2262 = vmatpush1.bf16.msra.mxu1 %v2987_v63 }
 0x351   :  { %2232 = vmatprep.subr.bf16.mxu0 %v2997_v2  ;;  %2264 = vmatprep.subr.bf16.mxu1 %v3006_v6 }
 0x354   :  { %2234 = vmatpush1.bf16.msra.mxu0 %v3018_v10  ;;  %2266 = vmatpush1.bf16.msra.mxu1 %v3028_v13 }
 0x355   :  { %2236 = vmatprep.subr.bf16.mxu0 %v3038_v16  ;;  %2268 = vmatprep.subr.bf16.mxu1 %v3047_v19 }
 0x358   :  { %2238 = vmatpush1.bf16.msra.mxu0 %v3059_v23  ;;  %2270 = vmatpush1.bf16.msra.mxu1 %v3069_v26 }
 0x359   :  { %2240 = vmatprep.subr.bf16.mxu0 %v3079_v29  ;;  %2272 = vmatprep.subr.bf16.mxu1 %v3088_v32 }
 0x35c   :  { %2242 = vmatpush1.bf16.msra.mxu0 %v3100_v36  ;;  %2274 = vmatpush1.bf16.msra.mxu1 %v3110_v40 }
 0x35d   :  { %2244 = vmatprep.subr.bf16.mxu0 %v3120_v44  ;;  %2276 = vmatprep.subr.bf16.mxu1 %v3129_v48 }
 0x360   :  { %2246 = vmatpush1.bf16.msra.mxu0 %v3141_v54  ;;  %2278 = vmatpush1.bf16.msra.mxu1 %v3151_v58 }
 0x361   :  { %2248 = vmatprep.subr.bf16.mxu0 %v3161_v62  ;;  %2280 = vmatprep.subr.bf16.mxu1 %v3170_v4 }
 0x364   :  { %2250 = vmatpush1.bf16.msra.mxu0 %v3182_v9  ;;  %2282 = vmatpush1.bf16.msra.mxu1 %v3192_v14 }
 0x365   :  { %2252 = vmatprep.subr.bf16.mxu0 %v3202_v18  ;;  %2284 = vmatprep.subr.bf16.mxu1 %v3211_v22 }
 0x368   :  { %2254 = vmatpush1.bf16.msra.mxu0 %v3217_v25  ;;  %2286 = vmatpush1.bf16.msra.mxu1 %v3221_v27 }
 0x369   :  { %2288 = vmatprep.subr.bf16.mxu0 %v2914_v38  ;;  %2320 = vmatprep.subr.bf16.mxu1 %v2922_v41 }
 0x41e   :  { %v1044_v30 = vpop.f32.mrb[6].mxu0  ;;  %v1115_v31 = vpop.f32.mrb[6].mxu1 }
 0x41f   :  { %v2485_v42 = vadd.f32 %v1044_v30, %v3271_v35  ;;  %v1046_v43 = vpop.f32.mrb[7].mxu0  ;;  %v1117_v45 = vpop.f32.mrb[7].mxu1  ;;  %v2501_v59 = vadd.f32 %v1115_v31, %v3280_v0 }
 0x420   :  { %v2486_v46 = vadd.f32 %v1046_v43, %v3273_v37  ;;  %v2502_v52 = vadd.f32 %v1117_v45, %v3277_v57 }
 0x421   :  { %v1886_v49 = vmul.f32 -1.442695, %v2485_v42 }
 0x422   :  { %v1887_v51 = vmul.f32 -1.442695, %v2486_v46  ;;  %v1888_v55 = vmul.f32 -1.442695, %v2502_v52 }
 0x423   :  { %2592 = vpow2.f32 %v1886_v49 }
 0x424   :  { %2594 = vpow2.f32 %v1887_v51 }
 0x425   :  { %2596 = vpow2.f32 %v1888_v55 }
 0x426   :  { %2598 = vtanh.f32 %v2501_v59 }
 0x42d   :  { %v2593_v61 = vpop.eup %2592 }
 0x42e   :  { %v2595_v1 = vpop.eup %2594  ;;  %v1127_v5 = vadd.f32 1.0, %v2593_v61 }
 0x42f   :  { %v1133_v7 = vadd.f32 1.0, %v2595_v1  ;;  %v2597_v8 = vpop.eup %2596 }
 0x430   :  { %2600 = vrcp.f32 %v1127_v5  ;;  %v2599_v11 = vpop.eup %2598  ;;  %v1140_v20 = vadd.f32 1.0, %v2597_v8 }
 0x431   :  { %2602 = vrcp.f32 %v1133_v7 }
 0x432   :  { %2604 = vrcp.f32 %v1140_v20 }
 0x43a   :  { %v2601_v12 = vpop.eup %2600 }
 0x43b   :  { %v2603_v15 = vpop.eup %2602  ;;  %v1144_v17 = vmul.f32 %v2601_v12, %v2599_v11 }
 0x43c   :  { %v1143_v21 = vmul.f32 %v2603_v15, %v3367_v28  ;;  %v2605_v33 = vpop.eup %2604 }
 0x43e   :  { %v3409_v24 = vadd.f32 %v1144_v17, %v1143_v21 }
 0x440   :  { %2606 = vtanh.f32 %v3409_v24 }
 0x44a   :  { %v2607_v34 = vpop.eup %2606 }
 0x44b   :  { %v1147_v39 = vmul.f32 %v2607_v34, %v2605_v33 }
 0x44d   :  { %1218 = vmatmul.mubr.f32.vlgmr.msra.gmra.mrb[8].mxu0 %v1147_v39  ;;  %1289 = vmatmul.mubr.f32.vlgmr.msra.gmra.mrb[8].mxu1 %v1147_v39 }
 0x44e   :  { %2290 = vmatpush1.bf16.msra.mxu0 %v2939_v47  ;;  %2322 = vmatpush1.bf16.msra.mxu1 %v2948_v50 }
 0x44f   :  { %2292 = vmatprep.subr.bf16.mxu0 %v2957_v53  ;;  %2324 = vmatprep.subr.bf16.mxu1 %v2965_v56 }
 0x450   :  { %1392 = vmatprep.mubr.f32.mxu0 %v2672_v3  ;;  %1463 = vmatprep.mubr.f32.mxu1 %v2672_v3 }
 0x452   :  { %2294 = vmatpush1.bf16.msra.mxu0 %v2977_v60  ;;  %2326 = vmatpush1.bf16.msra.mxu1 %v2987_v63 }
 0x453   :  { %2296 = vmatprep.subr.bf16.mxu0 %v2997_v2  ;;  %2328 = vmatprep.subr.bf16.mxu1 %v3006_v6 }
 0x456   :  { %2298 = vmatpush1.bf16.msra.mxu0 %v3018_v10  ;;  %2330 = vmatpush1.bf16.msra.mxu1 %v3028_v13 }
 0x457   :  { %2300 = vmatprep.subr.bf16.mxu0 %v3038_v16  ;;  %2332 = vmatprep.subr.bf16.mxu1 %v3047_v19 }
 0x45a   :  { %2302 = vmatpush1.bf16.msra.mxu0 %v3059_v23  ;;  %2334 = vmatpush1.bf16.msra.mxu1 %v3069_v26 }
 0x45b   :  { %2304 = vmatprep.subr.bf16.mxu0 %v3079_v29  ;;  %2336 = vmatprep.subr.bf16.mxu1 %v3088_v32 }
 0x45e   :  { %2306 = vmatpush1.bf16.msra.mxu0 %v3100_v36  ;;  %2338 = vmatpush1.bf16.msra.mxu1 %v3110_v40 }
 0x45f   :  { %2308 = vmatprep.subr.bf16.mxu0 %v3120_v44  ;;  %2340 = vmatprep.subr.bf16.mxu1 %v3129_v48 }
 0x462   :  { %2310 = vmatpush1.bf16.msra.mxu0 %v3141_v54  ;;  %2342 = vmatpush1.bf16.msra.mxu1 %v3151_v58 }
 0x463   :  { %2312 = vmatprep.subr.bf16.mxu0 %v3161_v62  ;;  %2344 = vmatprep.subr.bf16.mxu1 %v3170_v4 }
 0x466   :  { %2314 = vmatpush1.bf16.msra.mxu0 %v3182_v9  ;;  %2346 = vmatpush1.bf16.msra.mxu1 %v3192_v14 }
 0x467   :  { %2316 = vmatprep.subr.bf16.mxu0 %v3202_v18  ;;  %2348 = vmatprep.subr.bf16.mxu1 %v3211_v22 }
 0x46a   :  { %2318 = vmatpush1.bf16.msra.mxu0 %v3217_v25  ;;  %2350 = vmatpush1.bf16.msra.mxu1 %v3221_v27 }
 0x46b   :  { %2352 = vmatprep.subr.bf16.mxu0 %v2914_v38  ;;  %2384 = vmatprep.subr.bf16.mxu1 %v2922_v41 }
 0x520   :  { %v1219_v28 = vpop.f32.mrb[8].mxu0  ;;  %v1290_v30 = vpop.f32.mrb[8].mxu1 }
 0x521   :  { %v2487_v31 = vadd.f32 %v1219_v28, %v3271_v35  ;;  %v1221_v42 = vpop.f32.mrb[9].mxu0  ;;  %v1292_v43 = vpop.f32.mrb[9].mxu1  ;;  %v2503_v55 = vadd.f32 %v1290_v30, %v3280_v0 }
 0x522   :  { %v2488_v45 = vadd.f32 %v1221_v42, %v3273_v37  ;;  %v2504_v51 = vadd.f32 %v1292_v43, %v3277_v57 }
 0x523   :  { %v1889_v46 = vmul.f32 -1.442695, %v2487_v31 }
 0x524   :  { %v1890_v49 = vmul.f32 -1.442695, %v2488_v45  ;;  %v1891_v52 = vmul.f32 -1.442695, %v2504_v51 }
 0x525   :  { %2608 = vpow2.f32 %v1889_v46 }
 0x526   :  { %2610 = vpow2.f32 %v1890_v49 }
 0x527   :  { %2612 = vpow2.f32 %v1891_v52 }
 0x528   :  { %2614 = vtanh.f32 %v2503_v55 }
 0x52f   :  { %v2609_v59 = vpop.eup %2608 }
 0x530   :  { %v2611_v61 = vpop.eup %2610  ;;  %v1302_v1 = vadd.f32 1.0, %v2609_v59 }
 0x531   :  { %v1308_v5 = vadd.f32 1.0, %v2611_v61  ;;  %v2613_v7 = vpop.eup %2612 }
 0x532   :  { %2616 = vrcp.f32 %v1302_v1  ;;  %v2615_v8 = vpop.eup %2614  ;;  %v1315_v17 = vadd.f32 1.0, %v2613_v7 }
 0x533   :  { %2618 = vrcp.f32 %v1308_v5 }
 0x534   :  { %2620 = vrcp.f32 %v1315_v17 }
 0x53c   :  { %v2617_v11 = vpop.eup %2616 }
 0x53d   :  { %v2619_v12 = vpop.eup %2618  ;;  %v1319_v15 = vmul.f32 %v2617_v11, %v2615_v8 }
 0x53e   :  { %v1318_v20 = vmul.f32 %v2619_v12, %v3409_v24  ;;  %v2621_v33 = vpop.eup %2620 }
 0x540   :  { %v3451_v21 = vadd.f32 %v1319_v15, %v1318_v20 }
 0x542   :  { %2622 = vtanh.f32 %v3451_v21 }
 0x54c   :  { %v2623_v34 = vpop.eup %2622 }
 0x54d   :  { %v1322_v39 = vmul.f32 %v2623_v34, %v2621_v33 }
 0x54f   :  { %1393 = vmatmul.mubr.f32.vlgmr.msra.gmra.mrb[10].mxu0 %v1322_v39  ;;  %1464 = vmatmul.mubr.f32.vlgmr.msra.gmra.mrb[10].mxu1 %v1322_v39 }
 0x550   :  { %2354 = vmatpush1.bf16.msra.mxu0 %v2939_v47  ;;  %2386 = vmatpush1.bf16.msra.mxu1 %v2948_v50 }
 0x551   :  { %2356 = vmatprep.subr.bf16.mxu0 %v2957_v53  ;;  %2388 = vmatprep.subr.bf16.mxu1 %v2965_v56 }
 0x552   :  { %1567 = vmatprep.mubr.f32.mxu0 %v2672_v3  ;;  %1638 = vmatprep.mubr.f32.mxu1 %v2672_v3 }
 0x554   :  { %2358 = vmatpush1.bf16.msra.mxu0 %v2977_v60  ;;  %2390 = vmatpush1.bf16.msra.mxu1 %v2987_v63 }
 0x555   :  { %2360 = vmatprep.subr.bf16.mxu0 %v2997_v2  ;;  %2392 = vmatprep.subr.bf16.mxu1 %v3006_v6 }
 0x558   :  { %2362 = vmatpush1.bf16.msra.mxu0 %v3018_v10  ;;  %2394 = vmatpush1.bf16.msra.mxu1 %v3028_v13 }
 0x559   :  { %2364 = vmatprep.subr.bf16.mxu0 %v3038_v16  ;;  %2396 = vmatprep.subr.bf16.mxu1 %v3047_v19 }
 0x55c   :  { %2366 = vmatpush1.bf16.msra.mxu0 %v3059_v23  ;;  %2398 = vmatpush1.bf16.msra.mxu1 %v3069_v26 }
 0x55d   :  { %2368 = vmatprep.subr.bf16.mxu0 %v3079_v29  ;;  %2400 = vmatprep.subr.bf16.mxu1 %v3088_v32 }
 0x560   :  { %2370 = vmatpush1.bf16.msra.mxu0 %v3100_v36  ;;  %2402 = vmatpush1.bf16.msra.mxu1 %v3110_v40 }
 0x561   :  { %2372 = vmatprep.subr.bf16.mxu0 %v3120_v44  ;;  %2404 = vmatprep.subr.bf16.mxu1 %v3129_v48 }
 0x564   :  { %2374 = vmatpush1.bf16.msra.mxu0 %v3141_v54  ;;  %2406 = vmatpush1.bf16.msra.mxu1 %v3151_v58 }
 0x565   :  { %2376 = vmatprep.subr.bf16.mxu0 %v3161_v62  ;;  %2408 = vmatprep.subr.bf16.mxu1 %v3170_v4 }
 0x568   :  { %2378 = vmatpush1.bf16.msra.mxu0 %v3182_v9  ;;  %2410 = vmatpush1.bf16.msra.mxu1 %v3192_v14 }
 0x569   :  { %2380 = vmatprep.subr.bf16.mxu0 %v3202_v18  ;;  %2412 = vmatprep.subr.bf16.mxu1 %v3211_v22 }
 0x56c   :  { %2382 = vmatpush1.bf16.msra.mxu0 %v3217_v25  ;;  %2414 = vmatpush1.bf16.msra.mxu1 %v3221_v27 }
 0x56d   :  { %2416 = vmatprep.subr.bf16.mxu0 %v2914_v38  ;;  %2448 = vmatprep.subr.bf16.mxu1 %v2922_v41 }
 0x622   :  { %v1394_v24 = vpop.f32.mrb[10].mxu0  ;;  %v1465_v28 = vpop.f32.mrb[10].mxu1 }
 0x623   :  { %v2489_v30 = vadd.f32 %v1394_v24, %v3271_v35  ;;  %v1396_v31 = vpop.f32.mrb[11].mxu0  ;;  %v1467_v42 = vpop.f32.mrb[11].mxu1  ;;  %v2505_v52 = vadd.f32 %v1465_v28, %v3280_v0 }
 0x624   :  { %v2490_v43 = vadd.f32 %v1396_v31, %v3273_v37  ;;  %v2506_v49 = vadd.f32 %v1467_v42, %v3277_v57 }
 0x625   :  { %v1892_v45 = vmul.f32 -1.442695, %v2489_v30 }
 0x626   :  { %v1893_v46 = vmul.f32 -1.442695, %v2490_v43  ;;  %v1894_v51 = vmul.f32 -1.442695, %v2506_v49 }
 0x627   :  { %2624 = vpow2.f32 %v1892_v45 }
 0x628   :  { %2626 = vpow2.f32 %v1893_v46 }
 0x629   :  { %2628 = vpow2.f32 %v1894_v51 }
 0x62a   :  { %2630 = vtanh.f32 %v2505_v52 }
 0x631   :  { %v2625_v38 = vpop.eup %2624 }
 0x632   :  { %v2627_v55 = vpop.eup %2626  ;;  %v1477_v41 = vadd.f32 1.0, %v2625_v38 }
 0x633   :  { %v1483_v59 = vadd.f32 1.0, %v2627_v55  ;;  %v2629_v61 = vpop.eup %2628 }
 0x634   :  { %2632 = vrcp.f32 %v1477_v41  ;;  %v2631_v1 = vpop.eup %2630  ;;  %v1490_v11 = vadd.f32 1.0, %v2629_v61 }
 0x635   :  { %2634 = vrcp.f32 %v1483_v59  ;;  %v1901_v59 = vld [vmem:[%s3551_s4] ss:$0 sm:$0xff] }
 0x636   :  { %2636 = vrcp.f32 %v1490_v11 }
 0x63e   :  { %v2633_v5 = vpop.eup %2632 }
 0x63f   :  { %v2635_v7 = vpop.eup %2634  ;;  %v1494_v8 = vmul.f32 %v2633_v5, %v2631_v1 }
 0x640   :  { %v1493_v12 = vmul.f32 %v2635_v7, %v3451_v21  ;;  %v2637_v17 = vpop.eup %2636 }
 0x642   :  { %v3493_v15 = vadd.f32 %v1494_v8, %v1493_v12 }
 0x644   :  { %2638 = vtanh.f32 %v3493_v15 }
 0x64e   :  { %v2639_v20 = vpop.eup %2638 }
 0x64f   :  { %v1497_v33 = vmul.f32 %v2639_v20, %v2637_v17 }
 0x651   :  { %1568 = vmatmul.mubr.f32.vlgmr.msra.gmra.mrb[12].mxu0 %v1497_v33  ;;  %1639 = vmatmul.mubr.f32.vlgmr.msra.gmra.mrb[12].mxu1 %v1497_v33 }
 0x652   :  { %2418 = vmatpush1.bf16.msra.mxu0 %v2939_v47  ;;  %2450 = vmatpush1.bf16.msra.mxu1 %v2948_v50 }
 0x653   :  { %2420 = vmatprep.subr.bf16.mxu0 %v2957_v53  ;;  %2452 = vmatprep.subr.bf16.mxu1 %v2965_v56 }
 0x654   :  { %1742 = vmatprep.mubr.f32.mxu0 %v2672_v3  ;;  %1813 = vmatprep.mubr.f32.mxu1 %v2672_v3 }
 0x656   :  { %2422 = vmatpush1.bf16.msra.mxu0 %v2977_v60  ;;  %2454 = vmatpush1.bf16.msra.mxu1 %v2987_v63 }
 0x657   :  { %2424 = vmatprep.subr.bf16.mxu0 %v2997_v2  ;;  %2456 = vmatprep.subr.bf16.mxu1 %v3006_v6 }
 0x65a   :  { %2426 = vmatpush1.bf16.msra.mxu0 %v3018_v10  ;;  %2458 = vmatpush1.bf16.msra.mxu1 %v3028_v13 }
 0x65b   :  { %2428 = vmatprep.subr.bf16.mxu0 %v3038_v16  ;;  %2460 = vmatprep.subr.bf16.mxu1 %v3047_v19 }
 0x65e   :  { %2430 = vmatpush1.bf16.msra.mxu0 %v3059_v23  ;;  %2462 = vmatpush1.bf16.msra.mxu1 %v3069_v26 }
 0x65f   :  { %2432 = vmatprep.subr.bf16.mxu0 %v3079_v29  ;;  %2464 = vmatprep.subr.bf16.mxu1 %v3088_v32 }
 0x662   :  { %2434 = vmatpush1.bf16.msra.mxu0 %v3100_v36  ;;  %2466 = vmatpush1.bf16.msra.mxu1 %v3110_v40 }
 0x663   :  { %2436 = vmatprep.subr.bf16.mxu0 %v3120_v44  ;;  %2468 = vmatprep.subr.bf16.mxu1 %v3129_v48 }
 0x666   :  { %2438 = vmatpush1.bf16.msra.mxu0 %v3141_v54  ;;  %2470 = vmatpush1.bf16.msra.mxu1 %v3151_v58 }
 0x667   :  { %2440 = vmatprep.subr.bf16.mxu0 %v3161_v62  ;;  %2472 = vmatprep.subr.bf16.mxu1 %v3170_v4 }
 0x66a   :  { %2442 = vmatpush1.bf16.msra.mxu0 %v3182_v9  ;;  %2474 = vmatpush1.bf16.msra.mxu1 %v3192_v14  ;;  %v11_v14 = vstv %s3550_s5 }
 0x66b   :  { %2444 = vmatprep.subr.bf16.mxu0 %v3202_v18  ;;  %2476 = vmatprep.subr.bf16.mxu1 %v3211_v22  ;;  %12 = vst [vmem:[#allocation5] sm:$0x1] %v11_v14 }
 0x66e   :  { %2446 = vmatpush1.bf16.msra.mxu0 %v3217_v25  ;;  %2478 = vmatpush1.bf16.msra.mxu1 %v3221_v27 }
 0x672   :  { %v1902_v5 = vld [vmem:[#allocation5] ss:$0 sm:$0xff] }
 0x724   :  { %v1569_v3 = vpop.f32.mrb[12].mxu0  ;;  %v1640_v47 = vpop.f32.mrb[12].mxu1 }
 0x725   :  { %v2491_v50 = vadd.f32 %v1569_v3, %v3271_v35  ;;  %v1571_v53 = vpop.f32.mrb[13].mxu0  ;;  %v1642_v56 = vpop.f32.mrb[13].mxu1  ;;  %v2507_v13 = vadd.f32 %v1640_v47, %v3280_v0 }
 0x726   :  { %v2492_v60 = vadd.f32 %v1571_v53, %v3273_v37  ;;  %v2508_v6 = vadd.f32 %v1642_v56, %v3277_v57 }
 0x727   :  { %v1895_v63 = vmul.f32 -1.442695, %v2491_v50 }
 0x728   :  { %v1896_v2 = vmul.f32 -1.442695, %v2492_v60  ;;  %v1897_v10 = vmul.f32 -1.442695, %v2508_v6 }
 0x729   :  { %2640 = vpow2.f32 %v1895_v63 }
 0x72a   :  { %2642 = vpow2.f32 %v1896_v2 }
 0x72b   :  { %2644 = vpow2.f32 %v1897_v10 }
 0x72c   :  { %2646 = vtanh.f32 %v2507_v13 }
 0x733   :  { %v2641_v16 = vpop.eup %2640 }
 0x734   :  { %v2643_v19 = vpop.eup %2642  ;;  %v1652_v23 = vadd.f32 1.0, %v2641_v16 }
 0x735   :  { %v1658_v26 = vadd.f32 1.0, %v2643_v19  ;;  %v2645_v29 = vpop.eup %2644 }
 0x736   :  { %2648 = vrcp.f32 %v1652_v23  ;;  %v2647_v32 = vpop.eup %2646  ;;  %v1665_v48 = vadd.f32 1.0, %v2645_v29 }
 0x737   :  { %2650 = vrcp.f32 %v1658_v26 }
 0x738   :  { %2652 = vrcp.f32 %v1665_v48 }
 0x740   :  { %v2649_v36 = vpop.eup %2648 }
 0x741   :  { %v2651_v40 = vpop.eup %2650  ;;  %v1669_v44 = vmul.f32 %v2649_v36, %v2647_v32 }
 0x742   :  { %v1668_v54 = vmul.f32 %v2651_v40, %v3493_v15  ;;  %v2653_v62 = vpop.eup %2652 }
 0x744   :  { %v1670_v58 = vadd.f32 %v1669_v44, %v1668_v54 }
 0x746   :  { %2654 = vtanh.f32 %v1670_v58 }
 0x750   :  { %v2655_v4 = vpop.eup %2654 }
 0x751   :  { %v1672_v9 = vmul.f32 %v2655_v4, %v2653_v62 }
 0x753   :  { %1743 = vmatmul.mubr.f32.vlgmr.msra.gmra.mrb[14].mxu0 %v1672_v9  ;;  %1814 = vmatmul.mubr.f32.vlgmr.msra.gmra.mrb[14].mxu1 %v1672_v9 }
 0x826   :  { %v1744_v18 = vpop.f32.mrb[14].mxu0  ;;  %v1815_v22 = vpop.f32.mrb[14].mxu1 }
 0x827   :  { %v2493_v25 = vadd.f32 %v1744_v18, %v3271_v35  ;;  %v1746_v27 = vpop.f32.mrb[15].mxu0  ;;  %v1817_v21 = vpop.f32.mrb[15].mxu1  ;;  %v2509_v31 = vadd.f32 %v1815_v22, %v3280_v0 }
 0x828   :  { %v2494_v34 = vadd.f32 %v1746_v27, %v3273_v37  ;;  %v2510_v28 = vadd.f32 %v1817_v21, %v3277_v57 }
 0x829   :  { %v1898_v39 = vmul.f32 -1.442695, %v2493_v25 }
 0x82a   :  { %v1899_v24 = vmul.f32 -1.442695, %v2494_v34  ;;  %v1900_v30 = vmul.f32 -1.442695, %v2510_v28 }
 0x82b   :  { %2656 = vpow2.f32 %v1898_v39 }
 0x82c   :  { %2658 = vpow2.f32 %v1899_v24 }
 0x82d   :  { %2660 = vpow2.f32 %v1900_v30 }
 0x82e   :  { %2662 = vtanh.f32 %v2509_v31 }
 0x835   :  { %v2657_v42 = vpop.eup %2656 }
 0x836   :  { %v2659_v43 = vpop.eup %2658  ;;  %v1827_v45 = vadd.f32 1.0, %v2657_v42 }
 0x837   :  { %v1833_v46 = vadd.f32 1.0, %v2659_v43  ;;  %v2661_v35 = vpop.eup %2660 }
 0x838   :  { %2664 = vrcp.f32 %v1827_v45  ;;  %v2663_v49 = vpop.eup %2662  ;;  %v1840_v38 = vadd.f32 1.0, %v2661_v35 }
 0x839   :  { %2666 = vrcp.f32 %v1833_v46 }
 0x83a   :  { %2668 = vrcp.f32 %v1840_v38 }
 0x842   :  { %v2665_v37 = vpop.eup %2664 }
 0x843   :  { %v2667_v51 = vpop.eup %2666  ;;  %v1844_v52 = vmul.f32 %v2665_v37, %v2663_v49 }
 0x844   :  { %v1843_v55 = vmul.f32 %v2667_v51, %v1670_v58  ;;  %v2669_v57 = vpop.eup %2668 }
 0x846   :  { %v1845_v41 = vadd.f32 %v1844_v52, %v1843_v55 }
 0x848   :  { %2670 = vtanh.f32 %v1845_v41 }
 0x852   :  { %v2671_v0 = vpop.eup %2670 }
 0x853   :  { %v1847_v61 = vmul.f32 %v2671_v0, %v2669_v57 }
 0x855   :  { %v1860_v1 = vmul.f32 %v1901_v59, %v1847_v61 }
 0x857   :  { %1861 = vadd.xlane.f32.xlu0 %v1860_v1 }
 0x8e4   :  { %v1862_v7 = vpop.xlane.xlu0 %1861 }
 0x8e5   :  { %v1870_v8 = vadd.f32 %v1902_v5, %v1862_v7 }
 0x8e7   :  { %1872 = vst.msk [vmem:[%s3552_s6] sm:$0xff] %vm1871_vm0, %v1870_v8 }

</bundles_post_ra>
